<compile_context>
chip_gen: v6e
topology: v6e:2x2x1
jax: 0.10.0
libtpu: 0.0.40
codegen_flags: <defaults>
</compile_context>

<pallas_src>
import functools

import jax
import jax.numpy as jnp
from jax import lax
from jax.experimental import pallas as pl
from jax.experimental.pallas import tpu as pltpu


_MXU_DTYPE = jnp.bfloat16          # MXU operand dtype (fp32 accumulation everywhere)


def _round_up(x, m):
    return (x + m - 1) // m * m


def _pick_tile_m(M, K, N, *, max_tile=512, budget_bytes=8 * 1024 * 1024):
    """Largest multiple-of-8 M tile whose double-buffered fp32 footprint
    (2 x-tiles + 2 out-tiles + resident weight) stays under `budget_bytes`.
    Conservative enough for v7x's 64 MiB VMEM; bigger tiles amortize the
    ~0.35 us per-grid-step overhead on v5e/v6e."""
    tm = max_tile
    while tm > 8 and (2 * tm * K + 2 * tm * N) * 4 + K * N * 4 > budget_bytes:
        tm //= 2
    return int(min(tm, _round_up(M, 8)))


# -----------------------------------------------------------------------------
# Kernel 1: fused matmul + bias (+ optional ReLU), tiled over M and N.
# Used for the attention qkv / out projections and the final dense 1x1 conv.
# -----------------------------------------------------------------------------
def _matmul_bias_kernel(x_ref, w_ref, b_ref, o_ref, *, relu):
    acc = jnp.dot(x_ref[...].astype(_MXU_DTYPE), w_ref[...].astype(_MXU_DTYPE),
                  preferred_element_type=jnp.float32)
    acc = acc + b_ref[...]
    if relu:
        acc = jnp.maximum(acc, 0.0)
    o_ref[...] = acc.astype(o_ref.dtype)


def matmul_bias(x, w, b, *, relu=False, tile_m=512, tile_n=512):
    M, K = x.shape
    K2, N = w.shape
    assert K == K2
    tm = _pick_tile_m(M, K, N, max_tile=tile_m)
    tn = min(tile_n, _round_up(N, 128))            # lane-dense, 128-aligned N tiles
    Mp = _round_up(M, tm)
    Np = _round_up(N, tn)
    if Mp != M:
        x = jnp.pad(x, ((0, Mp - M), (0, 0)))
    if Np != N:
        w = jnp.pad(w, ((0, 0), (0, Np - N)))
        b = jnp.pad(b, (0, Np - N))
    grid = (pl.cdiv(Mp, tm), pl.cdiv(Np, tn))
    out = pl.pallas_call(
        functools.partial(_matmul_bias_kernel, relu=relu),
        out_shape=jax.ShapeDtypeStruct((Mp, Np), x.dtype),
        grid=grid,
        in_specs=[
            pl.BlockSpec((tm, K), lambda i, j: (i, 0)),      # K is small here; untiled
            pl.BlockSpec((K, tn), lambda i, j: (0, j)),
            pl.BlockSpec((1, tn), lambda i, j: (0, j)),
        ],
        out_specs=pl.BlockSpec((tm, tn), lambda i, j: (i, j)),
        compiler_params=pltpu.CompilerParams(
            dimension_semantics=("parallel", "parallel")),
    )(x, w, b.reshape(1, Np))
    return out[:M, :N]


# -----------------------------------------------------------------------------
# Kernel 2: fused DenseLayer = 1x1 conv + bias + ReLU + 3x3 conv (pad=1) + bias
# + ReLU for one image per grid step.  The 1x1 output stays in a halo-padded
# VMEM scratch; the 3x3 is 9 shifted matmuls accumulated in fp32 (no im2col).
# -----------------------------------------------------------------------------
def _dense_layer_kernel(x_ref, w1_ref, b1_ref, w2_ref, b2_ref, o_ref, ypad_ref,
                        *, H, W):
    cin = x_ref.shape[-1]
    growth = o_ref.shape[-1]

    # 1x1 conv + bias + ReLU on the flattened pixels of this image.
    x = x_ref[0].reshape(H * W, cin)
    y1 = jnp.dot(x.astype(_MXU_DTYPE), w1_ref[...].astype(_MXU_DTYPE),
                 preferred_element_type=jnp.float32)
    y1 = jnp.maximum(y1 + b1_ref[...], 0.0)

    # Halo-padded copy of the 1x1 output, held entirely in VMEM.
    ypad_ref[...] = jnp.zeros_like(ypad_ref)
    ypad_ref[1:H + 1, 1:W + 1, :] = y1.reshape(H, W, cin).astype(ypad_ref.dtype)

    # 3x3 conv (padding=1) as 9 shifted (H*W, cin) @ (cin, growth) matmuls.
    acc = jnp.zeros((H * W, growth), jnp.float32)
    for dy in range(3):
        for dx in range(3):
            patch = ypad_ref[dy:dy + H, dx:dx + W, :].reshape(H * W, cin)
            acc = acc + jnp.dot(patch.astype(_MXU_DTYPE),
                                w2_ref[dy * 3 + dx].astype(_MXU_DTYPE),
                                preferred_element_type=jnp.float32)
    y2 = jnp.maximum(acc + b2_ref[...], 0.0)
    o_ref[0] = y2.reshape(H, W, growth).astype(o_ref.dtype)


def dense_layer(x_nhwc, w1, b1, w2, b2):
    N, H, W, cin = x_nhwc.shape
    growth = w2.shape[-1]
    return pl.pallas_call(
        functools.partial(_dense_layer_kernel, H=H, W=W),
        out_shape=jax.ShapeDtypeStruct((N, H, W, growth), x_nhwc.dtype),
        grid=(N,),
        in_specs=[
            pl.BlockSpec((1, H, W, cin), lambda b: (b, 0, 0, 0)),
            pl.BlockSpec((cin, cin), lambda b: (0, 0)),
            pl.BlockSpec((1, cin), lambda b: (0, 0)),
            pl.BlockSpec((9, cin, growth), lambda b: (0, 0, 0)),
            pl.BlockSpec((1, growth), lambda b: (0, 0)),
        ],
        out_specs=pl.BlockSpec((1, H, W, growth), lambda b: (b, 0, 0, 0)),
        scratch_shapes=[pltpu.VMEM((H + 2, W + 2, cin), jnp.float32)],
        compiler_params=pltpu.CompilerParams(dimension_semantics=("parallel",)),
    )(x_nhwc, w1, b1.reshape(1, cin), w2, b2.reshape(1, growth))


# -----------------------------------------------------------------------------
# Kernel 3: Nystromformer attention, all heads of one batch per grid step.
#   q,k,v: (heads, n, d); q_l,k_l: (heads, m, d) landmark means (pooled in XLA).
# -----------------------------------------------------------------------------
def _softmax_lastdim(s):
    s = s - jnp.max(s, axis=-1, keepdims=True)
    e = jnp.exp(s)
    return e * pl.reciprocal(jnp.sum(e, axis=-1, keepdims=True), approx=True)


def _nystrom_kernel(q_ref, k_ref, v_ref, ql_ref, kl_ref, o_ref, *, n_iter):
    q = q_ref[0].astype(jnp.float32)      # (h, n, d); already scaled by d**-0.5
    k = k_ref[0].astype(jnp.float32)
    v = v_ref[0].astype(jnp.float32)
    ql = ql_ref[0].astype(jnp.float32)    # (h, m, d)
    kl = kl_ref[0].astype(jnp.float32)
    h = q.shape[0]
    m = ql.shape[1]

    qb, kb, vb = q.astype(_MXU_DTYPE), k.astype(_MXU_DTYPE), v.astype(_MXU_DTYPE)
    qlb, klb = ql.astype(_MXU_DTYPE), kl.astype(_MXU_DTYPE)

    sim1 = jnp.einsum('hnd,hmd->hnm', qb, klb, preferred_element_type=jnp.float32)
    sim2 = jnp.einsum('hmd,hed->hme', qlb, klb, preferred_element_type=jnp.float32)
    sim3 = jnp.einsum('hmd,hnd->hmn', qlb, kb, preferred_element_type=jnp.float32)

    attn1 = _softmax_lastdim(sim1)    # (h, n, m)
    attn2 = _softmax_lastdim(sim2)    # (h, m, m)
    attn3 = _softmax_lastdim(sim3)    # (h, m, n)

    # 6-step Moore-Penrose pseudo-inverse of attn2, batched over heads (fp32).
    ident = (lax.broadcasted_iota(jnp.int32, (h, m, m), 1)
             == lax.broadcasted_iota(jnp.int32, (h, m, m), 2)).astype(jnp.float32)
    a = attn2
    abs_a = jnp.abs(a)
    colmax = jnp.max(jnp.sum(abs_a, axis=-1, keepdims=True), axis=-2, keepdims=True)
    rowmax = jnp.max(jnp.sum(abs_a, axis=-2, keepdims=True), axis=-1, keepdims=True)
    z0 = jnp.transpose(a, (0, 2, 1)) / (colmax * rowmax)

    def body(_, z):
        az = jnp.einsum('hij,hjk->hik', a, z, preferred_element_type=jnp.float32)
        t = 7.0 * ident - az
        t = 15.0 * ident - jnp.einsum('hij,hjk->hik', az, t,
                                      preferred_element_type=jnp.float32)
        t = 13.0 * ident - jnp.einsum('hij,hjk->hik', az, t,
                                      preferred_element_type=jnp.float32)
        return 0.25 * jnp.einsum('hij,hjk->hik', z, t,
                                 preferred_element_type=jnp.float32)

    z = lax.fori_loop(0, n_iter, body, z0, unroll=True)

    ctx = jnp.einsum('hmn,hnd->hmd', attn3.astype(_MXU_DTYPE), vb,
                     preferred_element_type=jnp.float32)                  # (h, m, d)
    zc = jnp.einsum('hme,hed->hmd', z, ctx, preferred_element_type=jnp.float32)
    out = jnp.einsum('hnm,hmd->hnd', attn1.astype(_MXU_DTYPE),
                     zc.astype(_MXU_DTYPE), preferred_element_type=jnp.float32)
    o_ref[0] = out.astype(o_ref.dtype)


def nystrom_attention(q, k, v, q_l, k_l, *, n_iter=6):
    N, heads, n, d = q.shape
    m = q_l.shape[2]
    return pl.pallas_call(
        functools.partial(_nystrom_kernel, n_iter=n_iter),
        out_shape=jax.ShapeDtypeStruct((N, heads, n, d), q.dtype),
        grid=(N,),
        in_specs=[
            pl.BlockSpec((1, heads, n, d), lambda b: (b, 0, 0, 0)),
            pl.BlockSpec((1, heads, n, d), lambda b: (b, 0, 0, 0)),
            pl.BlockSpec((1, heads, n, d), lambda b: (b, 0, 0, 0)),
            pl.BlockSpec((1, heads, m, d), lambda b: (b, 0, 0, 0)),
            pl.BlockSpec((1, heads, m, d), lambda b: (b, 0, 0, 0)),
        ],
        out_specs=pl.BlockSpec((1, heads, n, d), lambda b: (b, 0, 0, 0)),
        compiler_params=pltpu.CompilerParams(dimension_semantics=("parallel",)),
    )(q, k, v, q_l, k_l)


# -----------------------------------------------------------------------------
# Kernel 4: mix_conv = BatchNorm2d(batch stats) + ReLU + 1x1 conv (no bias).
# Stats are a single full-M reduction in XLA (per-tile stats would be wrong);
# the normalize + ReLU + matmul runs tiled over M.
# -----------------------------------------------------------------------------
def _bn_relu_matmul_kernel(x_ref, s_ref, t_ref, w_ref, o_ref):
    x = x_ref[...].astype(jnp.float32)
    y = jnp.maximum(x * s_ref[...] + t_ref[...], 0.0)
    o_ref[...] = jnp.dot(y.astype(_MXU_DTYPE), w_ref[...].astype(_MXU_DTYPE),
                         preferred_element_type=jnp.float32).astype(o_ref.dtype)


def bn_relu_conv1x1(x, gamma, beta, w, *, eps=1e-5, tile_m=512):
    M, C2 = x.shape
    Cout = w.shape[1]
    xf = x.astype(jnp.float32)
    mean = jnp.mean(xf, axis=0)
    var = jnp.mean(jnp.square(xf - mean[None, :]), axis=0)   # biased, as in BN training
    scale = gamma * lax.rsqrt(var + eps)
    shift = beta - mean * scale

    tm = _pick_tile_m(M, C2, Cout, max_tile=tile_m)
    Mp = _round_up(M, tm)
    if Mp != M:
        x = jnp.pad(x, ((0, Mp - M), (0, 0)))
    out = pl.pallas_call(
        _bn_relu_matmul_kernel,
        out_shape=jax.ShapeDtypeStruct((Mp, Cout), x.dtype),
        grid=(pl.cdiv(Mp, tm),),
        in_specs=[
            pl.BlockSpec((tm, C2), lambda i: (i, 0)),
            pl.BlockSpec((1, C2), lambda i: (0, 0)),
            pl.BlockSpec((1, C2), lambda i: (0, 0)),
            pl.BlockSpec((C2, Cout), lambda i: (0, 0)),
        ],
        out_specs=pl.BlockSpec((tm, Cout), lambda i: (i, 0)),
        compiler_params=pltpu.CompilerParams(dimension_semantics=("parallel",)),
    )(x, scale.reshape(1, C2).astype(jnp.float32),
      shift.reshape(1, C2).astype(jnp.float32), w)
    return out[:M]


# -----------------------------------------------------------------------------
# Parameters (deterministic, synthetic).
# -----------------------------------------------------------------------------
def init_params(key, C, depth, growth, heads, dim_head):
    keys = iter(jax.random.split(key, 8 + 4 * depth))

    def w(shape, fan_in):
        return jax.random.normal(next(keys), shape, jnp.float32) / jnp.sqrt(
            jnp.asarray(fan_in, jnp.float32))

    params = {"dense_layers": []}
    c = C
    for _ in range(depth):
        params["dense_layers"].append({
            "w1": w((c, c), c), "b1": w((c,), c),
            "w2": w((3, 3, c, growth), 9 * c).reshape(9, c, growth),
            "b2": w((growth,), 9 * c),
        })
        c += growth
    params["dense_final_w"] = w((c, C), c)
    params["dense_final_b"] = w((C,), c)

    inner = heads * dim_head
    params["wqkv"] = w((C, 3 * inner), C)              # to_qkv, no bias
    params["wout"] = w((inner, C), inner)              # to_out
    params["bout"] = w((C,), inner)

    params["bn_gamma"] = jnp.ones((2 * C,), jnp.float32)
    params["bn_beta"] = jnp.zeros((2 * C,), jnp.float32)
    params["mix_w"] = w((2 * C, C), 2 * C)             # conv1x1, bias=False
    return params


# -----------------------------------------------------------------------------
# Forward pass.
# -----------------------------------------------------------------------------
def multihead_dense_block(x_nchw, params, *, depth, growth, heads, dim_head,
                          landmarks):
    N, C, H, W = x_nchw.shape
    x = jnp.transpose(x_nchw, (0, 2, 3, 1))            # NHWC
    M = N * H * W
    n = H * W
    assert n % landmarks == 0
    inner = heads * dim_head
    x_flat = x.reshape(M, C)

    # ---------------- attention branch (NystromAttention) ----------------
    qkv = matmul_bias(x_flat, params["wqkv"], jnp.zeros((3 * inner,), jnp.float32))
    qkv = qkv.reshape(N, n, 3, heads, dim_head)
    qkv = jnp.transpose(qkv, (2, 0, 3, 1, 4))          # (3, N, heads, n, d)
    scale = float(dim_head) ** -0.5
    q = qkv[0] * scale
    k = qkv[1]
    v = qkv[2]
    seg = n // landmarks
    # Landmarks = segment means (block-sparse pooling) -- no dense P matmul.
    q_l = q.reshape(N, heads, landmarks, seg, dim_head).mean(axis=3)
    k_l = k.reshape(N, heads, landmarks, seg, dim_head).mean(axis=3)
    attn = nystrom_attention(q, k, v, q_l, k_l)        # (N, heads, n, d)
    attn = attn.transpose(0, 2, 1, 3).reshape(M, inner)
    mha_out = matmul_bias(attn, params["wout"], params["bout"])        # (M, C)

    # ---------------- dense branch (DenseBlock) ----------------
    h = x
    c = C
    for layer in params["dense_layers"]:
        y2 = dense_layer(h, layer["w1"], layer["b1"], layer["w2"], layer["b2"])
        h = jnp.concatenate([h, y2], axis=-1)
        c += growth
    dense_out = matmul_bias(h.reshape(M, c), params["dense_final_w"],
                            params["dense_final_b"])                    # (M, C)

    # ---------------- concat + mix_conv ----------------
    cat = jnp.concatenate([mha_out, dense_out], axis=-1)                # (M, 2C)
    out = bn_relu_conv1x1(cat, params["bn_gamma"], params["bn_beta"],
                          params["mix_w"])                              # (M, C)
    return out.reshape(N, H, W, C).transpose(0, 3, 1, 2)                # NCHW


if __name__ == "__main__":
    batch, in_channels, Hsp, Wsp = 2, 8, 8, 8
    depth, growth = 2, 4
    heads, dim_head = 4, in_channels // 2
    landmarks = 8                        # n = H*W = 64 divisible by landmarks

    key = jax.random.PRNGKey(0)
    kx, kp = jax.random.split(key)
    x = jax.random.normal(kx, (batch, in_channels, Hsp, Wsp), jnp.float32)
    params = init_params(kp, in_channels, depth, growth, heads, dim_head)

    fwd = jax.jit(functools.partial(multihead_dense_block, depth=depth,
                                    growth=growth, heads=heads,
                                    dim_head=dim_head, landmarks=landmarks))
    y = fwd(x, params)
    jax.block_until_ready(y)
    assert y.shape == (batch, in_channels, Hsp, Wsp), y.shape
    assert bool(jnp.all(jnp.isfinite(y)))
    print("KERNEL_OK")
</pallas_src>

<mosaic_0001>
module attributes {stable_mosaic.version = 11 : i64} {
  func.func @_matmul_bias_kernel(%arg0: i32, %arg1: i32, %arg2: memref<128x8xf32, #tpu.memory_space<vmem>>, %arg3: memref<8x128xf32, #tpu.memory_space<vmem>>, %arg4: memref<1x128xf32, #tpu.memory_space<vmem>>, %arg5: memref<128x128xf32, #tpu.memory_space<vmem>>) attributes {dimension_semantics = [#tpu.dimension_semantics<parallel>, #tpu.dimension_semantics<parallel>], iteration_bounds = array<i64: 1, 1>, scalar_prefetch = 0 : i64, scratch_operands = 0 : i64, tpu.core_type = #tpu.core_type<tc>, window_params = [{transform_indices = @transform_0, window_bounds = array<i64: 128, 8>}, {transform_indices = @transform_1, window_bounds = array<i64: 8, 128>}, {transform_indices = @transform_2, window_bounds = array<i64: 1, 128>}, {transform_indices = @transform_3, window_bounds = array<i64: 128, 128>}]} {
    %c0 = arith.constant 0 : index
    %c0_0 = arith.constant 0 : index
    %0 = vector.load %arg2[%c0, %c0_0] : memref<128x8xf32, #tpu.memory_space<vmem>>, vector<128x8xf32>
    %1 = arith.truncf %0 : vector<128x8xf32> to vector<128x8xbf16>
    %c0_1 = arith.constant 0 : index
    %c0_2 = arith.constant 0 : index
    %2 = vector.load %arg3[%c0_1, %c0_2] : memref<8x128xf32, #tpu.memory_space<vmem>>, vector<8x128xf32>
    %3 = arith.truncf %2 : vector<8x128xf32> to vector<8x128xbf16>
    %cst = arith.constant dense<0.000000e+00> : vector<128x128xf32>
    %4 = tpu.matmul %1, %3, %cst {dimension_numbers = #tpu.dot_dimension_numbers<[1], [0], [0], [1], [0, 0, 1, 1], [], []>} : vector<128x8xbf16>, vector<8x128xbf16>, vector<128x128xf32> -> vector<128x128xf32>
    %c0_3 = arith.constant 0 : index
    %c0_4 = arith.constant 0 : index
    %5 = vector.load %arg4[%c0_3, %c0_4] : memref<1x128xf32, #tpu.memory_space<vmem>>, vector<1x128xf32>
    %6 = vector.broadcast %5 : vector<1x128xf32> to vector<128x128xf32>
    %7 = arith.addf %4, %6 : vector<128x128xf32>
    %c0_5 = arith.constant 0 : index
    %c0_6 = arith.constant 0 : index
    %8 = vector.load %arg5[%c0_5, %c0_6] : memref<128x128xf32, #tpu.memory_space<vmem>>, vector<128x128xf32>
    tpu.vector_store %arg5[%c0_5, %c0_6], %7 {strides = array<i32>} : memref<128x128xf32, #tpu.memory_space<vmem>>, vector<128x128xf32>,
    return
  }
  func.func @transform_0(%arg0: i32, %arg1: i32) -> (i32, i32) {
    %c0_i32 = arith.constant 0 : i32
    %c0_i32_0 = arith.constant 0 : i32
    return %arg0, %c0_i32 : i32, i32
  }
  func.func @transform_1(%arg0: i32, %arg1: i32) -> (i32, i32) {
    %c0_i32 = arith.constant 0 : i32
    %c0_i32_0 = arith.constant 0 : i32
    return %c0_i32, %arg1 : i32, i32
  }
  func.func @transform_2(%arg0: i32, %arg1: i32) -> (i32, i32) {
    %c0_i32 = arith.constant 0 : i32
    %c0_i32_0 = arith.constant 0 : i32
    return %c0_i32, %arg1 : i32, i32
  }
  func.func @transform_3(%arg0: i32, %arg1: i32) -> (i32, i32) {
    %c0_i32 = arith.constant 0 : i32
    return %arg0, %arg1 : i32, i32
  }
}

module attributes {stable_mosaic.version = 11 : i64} {
  func.func @_nystrom_kernel(%arg0: i32, %arg1: memref<1x4x64x4xf32, #tpu.memory_space<vmem>>, %arg2: memref<1x4x64x4xf32, #tpu.memory_space<vmem>>, %arg3: memref<1x4x64x4xf32, #tpu.memory_space<vmem>>, %arg4: memref<1x4x8x4xf32, #tpu.memory_space<vmem>>, %arg5: memref<1x4x8x4xf32, #tpu.memory_space<vmem>>, %arg6: memref<1x4x64x4xf32, #tpu.memory_space<vmem>>) attributes {dimension_semantics = [#tpu.dimension_semantics<parallel>], iteration_bounds = array<i64: 2>, scalar_prefetch = 0 : i64, scratch_operands = 0 : i64, tpu.core_type = #tpu.core_type<tc>, window_params = [{transform_indices = @transform_0, window_bounds = array<i64: 1, 4, 64, 4>}, {transform_indices = @transform_1, window_bounds = array<i64: 1, 4, 64, 4>}, {transform_indices = @transform_2, window_bounds = array<i64: 1, 4, 64, 4>}, {transform_indices = @transform_3, window_bounds = array<i64: 1, 4, 8, 4>}, {transform_indices = @transform_4, window_bounds = array<i64: 1, 4, 8, 4>}, {transform_indices = @transform_5, window_bounds = array<i64: 1, 4, 64, 4>}]} {
    %c0 = arith.constant 0 : index
    %c0_0 = arith.constant 0 : index
    %c0_1 = arith.constant 0 : index
    %c0_2 = arith.constant 0 : index
    %0 = vector.load %arg1[%c0, %c0_0, %c0_1, %c0_2] : memref<1x4x64x4xf32, #tpu.memory_space<vmem>>, vector<1x4x64x4xf32>
    %1 = vector.shape_cast %0 : vector<1x4x64x4xf32> to vector<4x64x4xf32>
    %c0_3 = arith.constant 0 : index
    %c0_4 = arith.constant 0 : index
    %c0_5 = arith.constant 0 : index
    %c0_6 = arith.constant 0 : index
    %2 = vector.load %arg2[%c0_3, %c0_4, %c0_5, %c0_6] : memref<1x4x64x4xf32, #tpu.memory_space<vmem>>, vector<1x4x64x4xf32>
    %3 = vector.shape_cast %2 : vector<1x4x64x4xf32> to vector<4x64x4xf32>
    %c0_7 = arith.constant 0 : index
    %c0_8 = arith.constant 0 : index
    %c0_9 = arith.constant 0 : index
    %c0_10 = arith.constant 0 : index
    %4 = vector.load %arg3[%c0_7, %c0_8, %c0_9, %c0_10] : memref<1x4x64x4xf32, #tpu.memory_space<vmem>>, vector<1x4x64x4xf32>
    %5 = vector.shape_cast %4 : vector<1x4x64x4xf32> to vector<4x64x4xf32>
    %c0_11 = arith.constant 0 : index
    %c0_12 = arith.constant 0 : index
    %c0_13 = arith.constant 0 : index
    %c0_14 = arith.constant 0 : index
    %6 = vector.load %arg4[%c0_11, %c0_12, %c0_13, %c0_14] : memref<1x4x8x4xf32, #tpu.memory_space<vmem>>, vector<1x4x8x4xf32>
    %7 = vector.shape_cast %6 : vector<1x4x8x4xf32> to vector<4x8x4xf32>
    %c0_15 = arith.constant 0 : index
    %c0_16 = arith.constant 0 : index
    %c0_17 = arith.constant 0 : index
    %c0_18 = arith.constant 0 : index
    %8 = vector.load %arg5[%c0_15, %c0_16, %c0_17, %c0_18] : memref<1x4x8x4xf32, #tpu.memory_space<vmem>>, vector<1x4x8x4xf32>
    %9 = vector.shape_cast %8 : vector<1x4x8x4xf32> to vector<4x8x4xf32>
    %10 = arith.truncf %1 : vector<4x64x4xf32> to vector<4x64x4xbf16>
    %11 = arith.truncf %3 : vector<4x64x4xf32> to vector<4x64x4xbf16>
    %12 = arith.truncf %5 : vector<4x64x4xf32> to vector<4x64x4xbf16>
    %13 = arith.truncf %7 : vector<4x8x4xf32> to vector<4x8x4xbf16>
    %14 = arith.truncf %9 : vector<4x8x4xf32> to vector<4x8x4xbf16>
    "tpu.trace_start"() <{level = 10 : i32, message = "hnd,hmd->hnm"}> : () -> ()
    %cst = arith.constant dense<0.000000e+00> : vector<4x64x8xf32>
    %15 = tpu.matmul %10, %14, %cst {dimension_numbers = #tpu.dot_dimension_numbers<[2], [2], [1], [1], [0, 0, 0, 1, 1, 1], [0], [0]>} : vector<4x64x4xbf16>, vector<4x8x4xbf16>, vector<4x64x8xf32> -> vector<4x64x8xf32>
    "tpu.trace_stop"() : () -> ()
    "tpu.trace_start"() <{level = 10 : i32, message = "hmd,hed->hme"}> : () -> ()
    %cst_19 = arith.constant dense<0.000000e+00> : vector<4x8x8xf32>
    %16 = tpu.matmul %13, %14, %cst_19 {dimension_numbers = #tpu.dot_dimension_numbers<[2], [2], [1], [1], [0, 0, 0, 1, 1, 1], [0], [0]>} : vector<4x8x4xbf16>, vector<4x8x4xbf16>, vector<4x8x8xf32> -> vector<4x8x8xf32>
    "tpu.trace_stop"() : () -> ()
    "tpu.trace_start"() <{level = 10 : i32, message = "hmd,hnd->hmn"}> : () -> ()
    %cst_20 = arith.constant dense<0.000000e+00> : vector<4x8x64xf32>
    %17 = tpu.matmul %13, %11, %cst_20 {dimension_numbers = #tpu.dot_dimension_numbers<[2], [2], [1], [1], [0, 0, 0, 1, 1, 1], [0], [0]>} : vector<4x8x4xbf16>, vector<4x64x4xbf16>, vector<4x8x64xf32> -> vector<4x8x64xf32>
    "tpu.trace_stop"() : () -> ()
    %cst_21 = arith.constant dense<0xFF800000> : vector<4x64xf32>
    %18 = vector.multi_reduction <maximumf>, %15, %cst_21 [2] : vector<4x64x8xf32> to vector<4x64xf32>
    %19 = vector.shape_cast %18 : vector<4x64xf32> to vector<4x64x1xf32>
    %20 = vector.broadcast %19 : vector<4x64x1xf32> to vector<4x64x8xf32>
    %21 = arith.subf %15, %20 : vector<4x64x8xf32>
    %22 = math.exp %21 : vector<4x64x8xf32>
    %cst_22 = arith.constant dense<0.000000e+00> : vector<4x64xf32>
    %23 = vector.multi_reduction <add>, %22, %cst_22 [2] : vector<4x64x8xf32> to vector<4x64xf32>
    %24 = vector.shape_cast %23 : vector<4x64xf32> to vector<4x64x1xf32>
    %25 = tpu.reciprocal %24 {approx = true} : vector<4x64x1xf32> -> vector<4x64x1xf32>
    %26 = vector.broadcast %25 : vector<4x64x1xf32> to vector<4x64x8xf32>
    %27 = arith.mulf %22, %26 : vector<4x64x8xf32>
    %cst_23 = arith.constant dense<0xFF800000> : vector<4x8xf32>
    %28 = vector.multi_reduction <maximumf>, %16, %cst_23 [2] : vector<4x8x8xf32> to vector<4x8xf32>
    %29 = vector.shape_cast %28 : vector<4x8xf32> to vector<4x8x1xf32>
    %30 = vector.broadcast %29 : vector<4x8x1xf32> to vector<4x8x8xf32>
    %31 = arith.subf %16, %30 : vector<4x8x8xf32>
    %32 = math.exp %31 : vector<4x8x8xf32>
    %cst_24 = arith.constant dense<0.000000e+00> : vector<4x8xf32>
    %33 = vector.multi_reduction <add>, %32, %cst_24 [2] : vector<4x8x8xf32> to vector<4x8xf32>
    %34 = vector.shape_cast %33 : vector<4x8xf32> to vector<4x8x1xf32>
    %35 = tpu.reciprocal %34 {approx = true} : vector<4x8x1xf32> -> vector<4x8x1xf32>
    %36 = vector.broadcast %35 : vector<4x8x1xf32> to vector<4x8x8xf32>
    %37 = arith.mulf %32, %36 : vector<4x8x8xf32>
    %cst_25 = arith.constant dense<0xFF800000> : vector<4x8xf32>
    %38 = vector.multi_reduction <maximumf>, %17, %cst_25 [2] : vector<4x8x64xf32> to vector<4x8xf32>
    %39 = vector.shape_cast %38 : vector<4x8xf32> to vector<4x8x1xf32>
    %40 = vector.broadcast %39 : vector<4x8x1xf32> to vector<4x8x64xf32>
    %41 = arith.subf %17, %40 : vector<4x8x64xf32>
    %42 = math.exp %41 : vector<4x8x64xf32>
    %cst_26 = arith.constant dense<0.000000e+00> : vector<4x8xf32>
    %43 = vector.multi_reduction <add>, %42, %cst_26 [2] : vector<4x8x64xf32> to vector<4x8xf32>
    %44 = vector.shape_cast %43 : vector<4x8xf32> to vector<4x8x1xf32>
    %45 = tpu.reciprocal %44 {approx = true} : vector<4x8x1xf32> -> vector<4x8x1xf32>
    %46 = vector.broadcast %45 : vector<4x8x1xf32> to vector<4x8x64xf32>
    %47 = arith.mulf %42, %46 : vector<4x8x64xf32>
    %48 = tpu.iota {dimensions = array<i32: 1>} : vector<4x8x8xi32>
    %49 = tpu.iota {dimensions = array<i32: 2>} : vector<4x8x8xi32>
    %50 = arith.cmpi eq, %48, %49 : vector<4x8x8xi32>
    %51 = arith.extui %50 : vector<4x8x8xi1> to vector<4x8x8xi32>
    %52 = arith.sitofp %51 : vector<4x8x8xi32> to vector<4x8x8xf32>
    %53 = math.absf %37 : vector<4x8x8xf32>
    %cst_27 = arith.constant dense<0.000000e+00> : vector<4x8xf32>
    %54 = vector.multi_reduction <add>, %53, %cst_27 [2] : vector<4x8x8xf32> to vector<4x8xf32>
    %55 = vector.shape_cast %54 : vector<4x8xf32> to vector<4x8x1xf32>
    %cst_28 = arith.constant dense<0xFF800000> : vector<4x1xf32>
    %56 = vector.multi_reduction <maximumf>, %55, %cst_28 [1] : vector<4x8x1xf32> to vector<4x1xf32>
    %57 = vector.shape_cast %56 : vector<4x1xf32> to vector<4x1x1xf32>
    %cst_29 = arith.constant dense<0.000000e+00> : vector<4x8xf32>
    %58 = vector.multi_reduction <add>, %53, %cst_29 [1] : vector<4x8x8xf32> to vector<4x8xf32>
    %59 = vector.shape_cast %58 : vector<4x8xf32> to vector<4x1x8xf32>
    %cst_30 = arith.constant dense<0xFF800000> : vector<4x1xf32>
    %60 = vector.multi_reduction <maximumf>, %59, %cst_30 [2] : vector<4x1x8xf32> to vector<4x1xf32>
    %61 = vector.shape_cast %60 : vector<4x1xf32> to vector<4x1x1xf32>
    %62 = tpu.transpose %37, [0, 2, 1] : vector<4x8x8xf32> -> vector<4x8x8xf32>
    %63 = arith.mulf %57, %61 : vector<4x1x1xf32>
    %64 = vector.broadcast %63 : vector<4x1x1xf32> to vector<4x8x8xf32>
    %65 = arith.divf %62, %64 : vector<4x8x8xf32>
    %c0_i32 = arith.constant 0 : i32
    "tpu.trace_start"() <{level = 10 : i32, message = "hij,hjk->hik"}> : () -> ()
    %cst_31 = arith.constant dense<0.000000e+00> : vector<4x8x8xf32>
    %66 = tpu.matmul %37, %65, %cst_31 {dimension_numbers = #tpu.dot_dimension_numbers<[2], [1], [1], [2], [0, 0, 0, 1, 1, 2], [0], [0]>} : vector<4x8x8xf32>, vector<4x8x8xf32>, vector<4x8x8xf32> -> vector<4x8x8xf32>
    "tpu.trace_stop"() : () -> ()
    %cst_32 = arith.constant 7.000000e+00 : f32
    %67 = vector.broadcast %cst_32 : f32 to vector<4x8x8xf32>
    %68 = arith.mulf %67, %52 : vector<4x8x8xf32>
    %69 = arith.subf %68, %66 : vector<4x8x8xf32>
    %cst_33 = arith.constant 1.500000e+01 : f32
    %70 = vector.broadcast %cst_33 : f32 to vector<4x8x8xf32>
    %71 = arith.mulf %70, %52 : vector<4x8x8xf32>
    "tpu.trace_start"() <{level = 10 : i32, message = "hij,hjk->hik"}> : () -> ()
    %cst_34 = arith.constant dense<0.000000e+00> : vector<4x8x8xf32>
    %72 = tpu.matmul %66, %69, %cst_34 {dimension_numbers = #tpu.dot_dimension_numbers<[2], [1], [1], [2], [0, 0, 0, 1, 1, 2], [0], [0]>} : vector<4x8x8xf32>, vector<4x8x8xf32>, vector<4x8x8xf32> -> vector<4x8x8xf32>
    "tpu.trace_stop"() : () -> ()
    %73 = arith.subf %71, %72 : vector<4x8x8xf32>
    %cst_35 = arith.constant 1.300000e+01 : f32
    %74 = vector.broadcast %cst_35 : f32 to vector<4x8x8xf32>
    %75 = arith.mulf %74, %52 : vector<4x8x8xf32>
    "tpu.trace_start"() <{level = 10 : i32, message = "hij,hjk->hik"}> : () -> ()
    %cst_36 = arith.constant dense<0.000000e+00> : vector<4x8x8xf32>
    %76 = tpu.matmul %66, %73, %cst_36 {dimension_numbers = #tpu.dot_dimension_numbers<[2], [1], [1], [2], [0, 0, 0, 1, 1, 2], [0], [0]>} : vector<4x8x8xf32>, vector<4x8x8xf32>, vector<4x8x8xf32> -> vector<4x8x8xf32>
    "tpu.trace_stop"() : () -> ()
    %77 = arith.subf %75, %76 : vector<4x8x8xf32>
    "tpu.trace_start"() <{level = 10 : i32, message = "hij,hjk->hik"}> : () -> ()
    %cst_37 = arith.constant dense<0.000000e+00> : vector<4x8x8xf32>
    %78 = tpu.matmul %65, %77, %cst_37 {dimension_numbers = #tpu.dot_dimension_numbers<[2], [1], [1], [2], [0, 0, 0, 1, 1, 2], [0], [0]>} : vector<4x8x8xf32>, vector<4x8x8xf32>, vector<4x8x8xf32> -> vector<4x8x8xf32>
    "tpu.trace_stop"() : () -> ()
    %cst_38 = arith.constant 2.500000e-01 : f32
    %79 = vector.broadcast %cst_38 : f32 to vector<4x8x8xf32>
    %80 = arith.mulf %79, %78 : vector<4x8x8xf32>
    %c1_i32 = arith.constant 1 : i32
    "tpu.trace_start"() <{level = 10 : i32, message = "hij,hjk->hik"}> : () -> ()
    %cst_39 = arith.constant dense<0.000000e+00> : vector<4x8x8xf32>
    %81 = tpu.matmul %37, %80, %cst_39 {dimension_numbers = #tpu.dot_dimension_numbers<[2], [1], [1], [2], [0, 0, 0, 1, 1, 2], [0], [0]>} : vector<4x8x8xf32>, vector<4x8x8xf32>, vector<4x8x8xf32> -> vector<4x8x8xf32>
    "tpu.trace_stop"() : () -> ()
    %cst_40 = arith.constant 7.000000e+00 : f32
    %82 = vector.broadcast %cst_40 : f32 to vector<4x8x8xf32>
    %83 = arith.mulf %82, %52 : vector<4x8x8xf32>
    %84 = arith.subf %83, %81 : vector<4x8x8xf32>
    %cst_41 = arith.constant 1.500000e+01 : f32
    %85 = vector.broadcast %cst_41 : f32 to vector<4x8x8xf32>
    %86 = arith.mulf %85, %52 : vector<4x8x8xf32>
    "tpu.trace_start"() <{level = 10 : i32, message = "hij,hjk->hik"}> : () -> ()
    %cst_42 = arith.constant dense<0.000000e+00> : vector<4x8x8xf32>
    %87 = tpu.matmul %81, %84, %cst_42 {dimension_numbers = #tpu.dot_dimension_numbers<[2], [1], [1], [2], [0, 0, 0, 1, 1, 2], [0], [0]>} : vector<4x8x8xf32>, vector<4x8x8xf32>, vector<4x8x8xf32> -> vector<4x8x8xf32>
    "tpu.trace_stop"() : () -> ()
    %88 = arith.subf %86, %87 : vector<4x8x8xf32>
    %cst_43 = arith.constant 1.300000e+01 : f32
    %89 = vector.broadcast %cst_43 : f32 to vector<4x8x8xf32>
    %90 = arith.mulf %89, %52 : vector<4x8x8xf32>
    "tpu.trace_start"() <{level = 10 : i32, message = "hij,hjk->hik"}> : () -> ()
    %cst_44 = arith.constant dense<0.000000e+00> : vector<4x8x8xf32>
    %91 = tpu.matmul %81, %88, %cst_44 {dimension_numbers = #tpu.dot_dimension_numbers<[2], [1], [1], [2], [0, 0, 0, 1, 1, 2], [0], [0]>} : vector<4x8x8xf32>, vector<4x8x8xf32>, vector<4x8x8xf32> -> vector<4x8x8xf32>
    "tpu.trace_stop"() : () -> ()
    %92 = arith.subf %90, %91 : vector<4x8x8xf32>
    "tpu.trace_start"() <{level = 10 : i32, message = "hij,hjk->hik"}> : () -> ()
    %cst_45 = arith.constant dense<0.000000e+00> : vector<4x8x8xf32>
    %93 = tpu.matmul %80, %92, %cst_45 {dimension_numbers = #tpu.dot_dimension_numbers<[2], [1], [1], [2], [0, 0, 0, 1, 1, 2], [0], [0]>} : vector<4x8x8xf32>, vector<4x8x8xf32>, vector<4x8x8xf32> -> vector<4x8x8xf32>
    "tpu.trace_stop"() : () -> ()
    %cst_46 = arith.constant 2.500000e-01 : f32
    %94 = vector.broadcast %cst_46 : f32 to vector<4x8x8xf32>
    %95 = arith.mulf %94, %93 : vector<4x8x8xf32>
    %c2_i32 = arith.constant 2 : i32
    "tpu.trace_start"() <{level = 10 : i32, message = "hij,hjk->hik"}> : () -> ()
    %cst_47 = arith.constant dense<0.000000e+00> : vector<4x8x8xf32>
    %96 = tpu.matmul %37, %95, %cst_47 {dimension_numbers = #tpu.dot_dimension_numbers<[2], [1], [1], [2], [0, 0, 0, 1, 1, 2], [0], [0]>} : vector<4x8x8xf32>, vector<4x8x8xf32>, vector<4x8x8xf32> -> vector<4x8x8xf32>
    "tpu.trace_stop"() : () -> ()
    %cst_48 = arith.constant 7.000000e+00 : f32
    %97 = vector.broadcast %cst_48 : f32 to vector<4x8x8xf32>
    %98 = arith.mulf %97, %52 : vector<4x8x8xf32>
    %99 = arith.subf %98, %96 : vector<4x8x8xf32>
    %cst_49 = arith.constant 1.500000e+01 : f32
    %100 = vector.broadcast %cst_49 : f32 to vector<4x8x8xf32>
    %101 = arith.mulf %100, %52 : vector<4x8x8xf32>
    "tpu.trace_start"() <{level = 10 : i32, message = "hij,hjk->hik"}> : () -> ()
    %cst_50 = arith.constant dense<0.000000e+00> : vector<4x8x8xf32>
    %102 = tpu.matmul %96, %99, %cst_50 {dimension_numbers = #tpu.dot_dimension_numbers<[2], [1], [1], [2], [0, 0, 0, 1, 1, 2], [0], [0]>} : vector<4x8x8xf32>, vector<4x8x8xf32>, vector<4x8x8xf32> -> vector<4x8x8xf32>
    "tpu.trace_stop"() : () -> ()
    %103 = arith.subf %101, %102 : vector<4x8x8xf32>
    %cst_51 = arith.constant 1.300000e+01 : f32
    %104 = vector.broadcast %cst_51 : f32 to vector<4x8x8xf32>
    %105 = arith.mulf %104, %52 : vector<4x8x8xf32>
    "tpu.trace_start"() <{level = 10 : i32, message = "hij,hjk->hik"}> : () -> ()
    %cst_52 = arith.constant dense<0.000000e+00> : vector<4x8x8xf32>
    %106 = tpu.matmul %96, %103, %cst_52 {dimension_numbers = #tpu.dot_dimension_numbers<[2], [1], [1], [2], [0, 0, 0, 1, 1, 2], [0], [0]>} : vector<4x8x8xf32>, vector<4x8x8xf32>, vector<4x8x8xf32> -> vector<4x8x8xf32>
    "tpu.trace_stop"() : () -> ()
    %107 = arith.subf %105, %106 : vector<4x8x8xf32>
    "tpu.trace_start"() <{level = 10 : i32, message = "hij,hjk->hik"}> : () -> ()
    %cst_53 = arith.constant dense<0.000000e+00> : vector<4x8x8xf32>
    %108 = tpu.matmul %95, %107, %cst_53 {dimension_numbers = #tpu.dot_dimension_numbers<[2], [1], [1], [2], [0, 0, 0, 1, 1, 2], [0], [0]>} : vector<4x8x8xf32>, vector<4x8x8xf32>, vector<4x8x8xf32> -> vector<4x8x8xf32>
    "tpu.trace_stop"() : () -> ()
    %cst_54 = arith.constant 2.500000e-01 : f32
    %109 = vector.broadcast %cst_54 : f32 to vector<4x8x8xf32>
    %110 = arith.mulf %109, %108 : vector<4x8x8xf32>
    %c3_i32 = arith.constant 3 : i32
    "tpu.trace_start"() <{level = 10 : i32, message = "hij,hjk->hik"}> : () -> ()
    %cst_55 = arith.constant dense<0.000000e+00> : vector<4x8x8xf32>
    %111 = tpu.matmul %37, %110, %cst_55 {dimension_numbers = #tpu.dot_dimension_numbers<[2], [1], [1], [2], [0, 0, 0, 1, 1, 2], [0], [0]>} : vector<4x8x8xf32>, vector<4x8x8xf32>, vector<4x8x8xf32> -> vector<4x8x8xf32>
    "tpu.trace_stop"() : () -> ()
    %cst_56 = arith.constant 7.000000e+00 : f32
    %112 = vector.broadcast %cst_56 : f32 to vector<4x8x8xf32>
    %113 = arith.mulf %112, %52 : vector<4x8x8xf32>
    %114 = arith.subf %113, %111 : vector<4x8x8xf32>
    %cst_57 = arith.constant 1.500000e+01 : f32
    %115 = vector.broadcast %cst_57 : f32 to vector<4x8x8xf32>
    %116 = arith.mulf %115, %52 : vector<4x8x8xf32>
    "tpu.trace_start"() <{level = 10 : i32, message = "hij,hjk->hik"}> : () -> ()
    %cst_58 = arith.constant dense<0.000000e+00> : vector<4x8x8xf32>
    %117 = tpu.matmul %111, %114, %cst_58 {dimension_numbers = #tpu.dot_dimension_numbers<[2], [1], [1], [2], [0, 0, 0, 1, 1, 2], [0], [0]>} : vector<4x8x8xf32>, vector<4x8x8xf32>, vector<4x8x8xf32> -> vector<4x8x8xf32>
    "tpu.trace_stop"() : () -> ()
    %118 = arith.subf %116, %117 : vector<4x8x8xf32>
    %cst_59 = arith.constant 1.300000e+01 : f32
    %119 = vector.broadcast %cst_59 : f32 to vector<4x8x8xf32>
    %120 = arith.mulf %119, %52 : vector<4x8x8xf32>
    "tpu.trace_start"() <{level = 10 : i32, message = "hij,hjk->hik"}> : () -> ()
    %cst_60 = arith.constant dense<0.000000e+00> : vector<4x8x8xf32>
    %121 = tpu.matmul %111, %118, %cst_60 {dimension_numbers = #tpu.dot_dimension_numbers<[2], [1], [1], [2], [0, 0, 0, 1, 1, 2], [0], [0]>} : vector<4x8x8xf32>, vector<4x8x8xf32>, vector<4x8x8xf32> -> vector<4x8x8xf32>
    "tpu.trace_stop"() : () -> ()
    %122 = arith.subf %120, %121 : vector<4x8x8xf32>
    "tpu.trace_start"() <{level = 10 : i32, message = "hij,hjk->hik"}> : () -> ()
    %cst_61 = arith.constant dense<0.000000e+00> : vector<4x8x8xf32>
    %123 = tpu.matmul %110, %122, %cst_61 {dimension_numbers = #tpu.dot_dimension_numbers<[2], [1], [1], [2], [0, 0, 0, 1, 1, 2], [0], [0]>} : vector<4x8x8xf32>, vector<4x8x8xf32>, vector<4x8x8xf32> -> vector<4x8x8xf32>
    "tpu.trace_stop"() : () -> ()
    %cst_62 = arith.constant 2.500000e-01 : f32
    %124 = vector.broadcast %cst_62 : f32 to vector<4x8x8xf32>
    %125 = arith.mulf %124, %123 : vector<4x8x8xf32>
    %c4_i32 = arith.constant 4 : i32
    "tpu.trace_start"() <{level = 10 : i32, message = "hij,hjk->hik"}> : () -> ()
    %cst_63 = arith.constant dense<0.000000e+00> : vector<4x8x8xf32>
    %126 = tpu.matmul %37, %125, %cst_63 {dimension_numbers = #tpu.dot_dimension_numbers<[2], [1], [1], [2], [0, 0, 0, 1, 1, 2], [0], [0]>} : vector<4x8x8xf32>, vector<4x8x8xf32>, vector<4x8x8xf32> -> vector<4x8x8xf32>
    "tpu.trace_stop"() : () -> ()
    %cst_64 = arith.constant 7.000000e+00 : f32
    %127 = vector.broadcast %cst_64 : f32 to vector<4x8x8xf32>
    %128 = arith.mulf %127, %52 : vector<4x8x8xf32>
    %129 = arith.subf %128, %126 : vector<4x8x8xf32>
    %cst_65 = arith.constant 1.500000e+01 : f32
    %130 = vector.broadcast %cst_65 : f32 to vector<4x8x8xf32>
    %131 = arith.mulf %130, %52 : vector<4x8x8xf32>
    "tpu.trace_start"() <{level = 10 : i32, message = "hij,hjk->hik"}> : () -> ()
    %cst_66 = arith.constant dense<0.000000e+00> : vector<4x8x8xf32>
    %132 = tpu.matmul %126, %129, %cst_66 {dimension_numbers = #tpu.dot_dimension_numbers<[2], [1], [1], [2], [0, 0, 0, 1, 1, 2], [0], [0]>} : vector<4x8x8xf32>, vector<4x8x8xf32>, vector<4x8x8xf32> -> vector<4x8x8xf32>
    "tpu.trace_stop"() : () -> ()
    %133 = arith.subf %131, %132 : vector<4x8x8xf32>
    %cst_67 = arith.constant 1.300000e+01 : f32
    %134 = vector.broadcast %cst_67 : f32 to vector<4x8x8xf32>
    %135 = arith.mulf %134, %52 : vector<4x8x8xf32>
    "tpu.trace_start"() <{level = 10 : i32, message = "hij,hjk->hik"}> : () -> ()
    %cst_68 = arith.constant dense<0.000000e+00> : vector<4x8x8xf32>
    %136 = tpu.matmul %126, %133, %cst_68 {dimension_numbers = #tpu.dot_dimension_numbers<[2], [1], [1], [2], [0, 0, 0, 1, 1, 2], [0], [0]>} : vector<4x8x8xf32>, vector<4x8x8xf32>, vector<4x8x8xf32> -> vector<4x8x8xf32>
    "tpu.trace_stop"() : () -> ()
    %137 = arith.subf %135, %136 : vector<4x8x8xf32>
    "tpu.trace_start"() <{level = 10 : i32, message = "hij,hjk->hik"}> : () -> ()
    %cst_69 = arith.constant dense<0.000000e+00> : vector<4x8x8xf32>
    %138 = tpu.matmul %125, %137, %cst_69 {dimension_numbers = #tpu.dot_dimension_numbers<[2], [1], [1], [2], [0, 0, 0, 1, 1, 2], [0], [0]>} : vector<4x8x8xf32>, vector<4x8x8xf32>, vector<4x8x8xf32> -> vector<4x8x8xf32>
    "tpu.trace_stop"() : () -> ()
    %cst_70 = arith.constant 2.500000e-01 : f32
    %139 = vector.broadcast %cst_70 : f32 to vector<4x8x8xf32>
    %140 = arith.mulf %139, %138 : vector<4x8x8xf32>
    %c5_i32 = arith.constant 5 : i32
    "tpu.trace_start"() <{level = 10 : i32, message = "hij,hjk->hik"}> : () -> ()
    %cst_71 = arith.constant dense<0.000000e+00> : vector<4x8x8xf32>
    %141 = tpu.matmul %37, %140, %cst_71 {dimension_numbers = #tpu.dot_dimension_numbers<[2], [1], [1], [2], [0, 0, 0, 1, 1, 2], [0], [0]>} : vector<4x8x8xf32>, vector<4x8x8xf32>, vector<4x8x8xf32> -> vector<4x8x8xf32>
    "tpu.trace_stop"() : () -> ()
    %cst_72 = arith.constant 7.000000e+00 : f32
    %142 = vector.broadcast %cst_72 : f32 to vector<4x8x8xf32>
    %143 = arith.mulf %142, %52 : vector<4x8x8xf32>
    %144 = arith.subf %143, %141 : vector<4x8x8xf32>
    %cst_73 = arith.constant 1.500000e+01 : f32
    %145 = vector.broadcast %cst_73 : f32 to vector<4x8x8xf32>
    %146 = arith.mulf %145, %52 : vector<4x8x8xf32>
    "tpu.trace_start"() <{level = 10 : i32, message = "hij,hjk->hik"}> : () -> ()
    %cst_74 = arith.constant dense<0.000000e+00> : vector<4x8x8xf32>
    %147 = tpu.matmul %141, %144, %cst_74 {dimension_numbers = #tpu.dot_dimension_numbers<[2], [1], [1], [2], [0, 0, 0, 1, 1, 2], [0], [0]>} : vector<4x8x8xf32>, vector<4x8x8xf32>, vector<4x8x8xf32> -> vector<4x8x8xf32>
    "tpu.trace_stop"() : () -> ()
    %148 = arith.subf %146, %147 : vector<4x8x8xf32>
    %cst_75 = arith.constant 1.300000e+01 : f32
    %149 = vector.broadcast %cst_75 : f32 to vector<4x8x8xf32>
    %150 = arith.mulf %149, %52 : vector<4x8x8xf32>
    "tpu.trace_start"() <{level = 10 : i32, message = "hij,hjk->hik"}> : () -> ()
    %cst_76 = arith.constant dense<0.000000e+00> : vector<4x8x8xf32>
    %151 = tpu.matmul %141, %148, %cst_76 {dimension_numbers = #tpu.dot_dimension_numbers<[2], [1], [1], [2], [0, 0, 0, 1, 1, 2], [0], [0]>} : vector<4x8x8xf32>, vector<4x8x8xf32>, vector<4x8x8xf32> -> vector<4x8x8xf32>
    "tpu.trace_stop"() : () -> ()
    %152 = arith.subf %150, %151 : vector<4x8x8xf32>
    "tpu.trace_start"() <{level = 10 : i32, message = "hij,hjk->hik"}> : () -> ()
    %cst_77 = arith.constant dense<0.000000e+00> : vector<4x8x8xf32>
    %153 = tpu.matmul %140, %152, %cst_77 {dimension_numbers = #tpu.dot_dimension_numbers<[2], [1], [1], [2], [0, 0, 0, 1, 1, 2], [0], [0]>} : vector<4x8x8xf32>, vector<4x8x8xf32>, vector<4x8x8xf32> -> vector<4x8x8xf32>
    "tpu.trace_stop"() : () -> ()
    %cst_78 = arith.constant 2.500000e-01 : f32
    %154 = vector.broadcast %cst_78 : f32 to vector<4x8x8xf32>
    %155 = arith.mulf %154, %153 : vector<4x8x8xf32>
    %156 = arith.truncf %47 : vector<4x8x64xf32> to vector<4x8x64xbf16>
    "tpu.trace_start"() <{level = 10 : i32, message = "hmn,hnd->hmd"}> : () -> ()
    %cst_79 = arith.constant dense<0.000000e+00> : vector<4x8x4xf32>
    %157 = tpu.matmul %156, %12, %cst_79 {dimension_numbers = #tpu.dot_dimension_numbers<[2], [1], [1], [2], [0, 0, 0, 1, 1, 2], [0], [0]>} : vector<4x8x64xbf16>, vector<4x64x4xbf16>, vector<4x8x4xf32> -> vector<4x8x4xf32>
    "tpu.trace_stop"() : () -> ()
    "tpu.trace_start"() <{level = 10 : i32, message = "hme,hed->hmd"}> : () -> ()
    %cst_80 = arith.constant dense<0.000000e+00> : vector<4x8x4xf32>
    %158 = tpu.matmul %155, %157, %cst_80 {dimension_numbers = #tpu.dot_dimension_numbers<[2], [1], [1], [2], [0, 0, 0, 1, 1, 2], [0], [0]>} : vector<4x8x8xf32>, vector<4x8x4xf32>, vector<4x8x4xf32> -> vector<4x8x4xf32>
    "tpu.trace_stop"() : () -> ()
    %159 = arith.truncf %27 : vector<4x64x8xf32> to vector<4x64x8xbf16>
    %160 = arith.truncf %158 : vector<4x8x4xf32> to vector<4x8x4xbf16>
    "tpu.trace_start"() <{level = 10 : i32, message = "hnm,hmd->hnd"}> : () -> ()
    %cst_81 = arith.constant dense<0.000000e+00> : vector<4x64x4xf32>
    %161 = tpu.matmul %159, %160, %cst_81 {dimension_numbers = #tpu.dot_dimension_numbers<[2], [1], [1], [2], [0, 0, 0, 1, 1, 2], [0], [0]>} : vector<4x64x8xbf16>, vector<4x8x4xbf16>, vector<4x64x4xf32> -> vector<4x64x4xf32>
    "tpu.trace_stop"() : () -> ()
    %c0_82 = arith.constant 0 : index
    %c0_83 = arith.constant 0 : index
    %c0_84 = arith.constant 0 : index
    %c0_85 = arith.constant 0 : index
    %162 = vector.load %arg6[%c0_82, %c0_83, %c0_84, %c0_85] : memref<1x4x64x4xf32, #tpu.memory_space<vmem>>, vector<1x4x64x4xf32>
    %163 = vector.shape_cast %162 : vector<1x4x64x4xf32> to vector<4x64x4xf32>
    %164 = vector.shape_cast %161 : vector<4x64x4xf32> to vector<1x4x64x4xf32>
    tpu.vector_store %arg6[%c0_82, %c0_83, %c0_84, %c0_85], %164 {strides = array<i32>} : memref<1x4x64x4xf32, #tpu.memory_space<vmem>>, vector<1x4x64x4xf32>,
    return
  }
  func.func @transform_0(%arg0: i32) -> (i32, i32, i32, i32) {
    %c0_i32 = arith.constant 0 : i32
    %c0_i32_0 = arith.constant 0 : i32
    %c0_i32_1 = arith.constant 0 : i32
    %c0_i32_2 = arith.constant 0 : i32
    return %arg0, %c0_i32, %c0_i32_0, %c0_i32_1 : i32, i32, i32, i32
  }
  func.func @transform_1(%arg0: i32) -> (i32, i32, i32, i32) {
    %c0_i32 = arith.constant 0 : i32
    %c0_i32_0 = arith.constant 0 : i32
    %c0_i32_1 = arith.constant 0 : i32
    %c0_i32_2 = arith.constant 0 : i32
    return %arg0, %c0_i32, %c0_i32_0, %c0_i32_1 : i32, i32, i32, i32
  }
  func.func @transform_2(%arg0: i32) -> (i32, i32, i32, i32) {
    %c0_i32 = arith.constant 0 : i32
    %c0_i32_0 = arith.constant 0 : i32
    %c0_i32_1 = arith.constant 0 : i32
    %c0_i32_2 = arith.constant 0 : i32
    return %arg0, %c0_i32, %c0_i32_0, %c0_i32_1 : i32, i32, i32, i32
  }
  func.func @transform_3(%arg0: i32) -> (i32, i32, i32, i32) {
    %c0_i32 = arith.constant 0 : i32
    %c0_i32_0 = arith.constant 0 : i32
    %c0_i32_1 = arith.constant 0 : i32
    %c0_i32_2 = arith.constant 0 : i32
    return %arg0, %c0_i32, %c0_i32_0, %c0_i32_1 : i32, i32, i32, i32
  }
  func.func @transform_4(%arg0: i32) -> (i32, i32, i32, i32) {
    %c0_i32 = arith.constant 0 : i32
    %c0_i32_0 = arith.constant 0 : i32
    %c0_i32_1 = arith.constant 0 : i32
    %c0_i32_2 = arith.constant 0 : i32
    return %arg0, %c0_i32, %c0_i32_0, %c0_i32_1 : i32, i32, i32, i32
  }
  func.func @transform_5(%arg0: i32) -> (i32, i32, i32, i32) {
    %c0_i32 = arith.constant 0 : i32
    %c0_i32_0 = arith.constant 0 : i32
    %c0_i32_1 = arith.constant 0 : i32
    %c0_i32_2 = arith.constant 0 : i32
    return %arg0, %c0_i32, %c0_i32_0, %c0_i32_1 : i32, i32, i32, i32
  }
}

module attributes {stable_mosaic.version = 11 : i64} {
  func.func @_matmul_bias_kernel(%arg0: i32, %arg1: i32, %arg2: memref<128x16xf32, #tpu.memory_space<vmem>>, %arg3: memref<16x128xf32, #tpu.memory_space<vmem>>, %arg4: memref<1x128xf32, #tpu.memory_space<vmem>>, %arg5: memref<128x128xf32, #tpu.memory_space<vmem>>) attributes {dimension_semantics = [#tpu.dimension_semantics<parallel>, #tpu.dimension_semantics<parallel>], iteration_bounds = array<i64: 1, 1>, scalar_prefetch = 0 : i64, scratch_operands = 0 : i64, tpu.core_type = #tpu.core_type<tc>, window_params = [{transform_indices = @transform_0, window_bounds = array<i64: 128, 16>}, {transform_indices = @transform_1, window_bounds = array<i64: 16, 128>}, {transform_indices = @transform_2, window_bounds = array<i64: 1, 128>}, {transform_indices = @transform_3, window_bounds = array<i64: 128, 128>}]} {
    %c0 = arith.constant 0 : index
    %c0_0 = arith.constant 0 : index
    %0 = vector.load %arg2[%c0, %c0_0] : memref<128x16xf32, #tpu.memory_space<vmem>>, vector<128x16xf32>
    %1 = arith.truncf %0 : vector<128x16xf32> to vector<128x16xbf16>
    %c0_1 = arith.constant 0 : index
    %c0_2 = arith.constant 0 : index
    %2 = vector.load %arg3[%c0_1, %c0_2] : memref<16x128xf32, #tpu.memory_space<vmem>>, vector<16x128xf32>
    %3 = arith.truncf %2 : vector<16x128xf32> to vector<16x128xbf16>
    %cst = arith.constant dense<0.000000e+00> : vector<128x128xf32>
    %4 = tpu.matmul %1, %3, %cst {dimension_numbers = #tpu.dot_dimension_numbers<[1], [0], [0], [1], [0, 0, 1, 1], [], []>} : vector<128x16xbf16>, vector<16x128xbf16>, vector<128x128xf32> -> vector<128x128xf32>
    %c0_3 = arith.constant 0 : index
    %c0_4 = arith.constant 0 : index
    %5 = vector.load %arg4[%c0_3, %c0_4] : memref<1x128xf32, #tpu.memory_space<vmem>>, vector<1x128xf32>
    %6 = vector.broadcast %5 : vector<1x128xf32> to vector<128x128xf32>
    %7 = arith.addf %4, %6 : vector<128x128xf32>
    %c0_5 = arith.constant 0 : index
    %c0_6 = arith.constant 0 : index
    %8 = vector.load %arg5[%c0_5, %c0_6] : memref<128x128xf32, #tpu.memory_space<vmem>>, vector<128x128xf32>
    tpu.vector_store %arg5[%c0_5, %c0_6], %7 {strides = array<i32>} : memref<128x128xf32, #tpu.memory_space<vmem>>, vector<128x128xf32>,
    return
  }
  func.func @transform_0(%arg0: i32, %arg1: i32) -> (i32, i32) {
    %c0_i32 = arith.constant 0 : i32
    %c0_i32_0 = arith.constant 0 : i32
    return %arg0, %c0_i32 : i32, i32
  }
  func.func @transform_1(%arg0: i32, %arg1: i32) -> (i32, i32) {
    %c0_i32 = arith.constant 0 : i32
    %c0_i32_0 = arith.constant 0 : i32
    return %c0_i32, %arg1 : i32, i32
  }
  func.func @transform_2(%arg0: i32, %arg1: i32) -> (i32, i32) {
    %c0_i32 = arith.constant 0 : i32
    %c0_i32_0 = arith.constant 0 : i32
    return %c0_i32, %arg1 : i32, i32
  }
  func.func @transform_3(%arg0: i32, %arg1: i32) -> (i32, i32) {
    %c0_i32 = arith.constant 0 : i32
    return %arg0, %arg1 : i32, i32
  }
}

module attributes {stable_mosaic.version = 11 : i64} {
  func.func @_dense_layer_kernel(%arg0: i32, %arg1: memref<1x8x8x8xf32, #tpu.memory_space<vmem>>, %arg2: memref<8x8xf32, #tpu.memory_space<vmem>>, %arg3: memref<1x8xf32, #tpu.memory_space<vmem>>, %arg4: memref<9x8x4xf32, #tpu.memory_space<vmem>>, %arg5: memref<1x4xf32, #tpu.memory_space<vmem>>, %arg6: memref<1x8x8x4xf32, #tpu.memory_space<vmem>>, %arg7: memref<10x10x8xf32, #tpu.memory_space<vmem>>) attributes {dimension_semantics = [#tpu.dimension_semantics<parallel>], iteration_bounds = array<i64: 2>, scalar_prefetch = 0 : i64, scratch_operands = 1 : i64, tpu.core_type = #tpu.core_type<tc>, window_params = [{transform_indices = @transform_0, window_bounds = array<i64: 1, 8, 8, 8>}, {pipeline_mode = #tpu.pipeline_mode<synchronous>, transform_indices = @transform_1, window_bounds = array<i64: 8, 8>}, {pipeline_mode = #tpu.pipeline_mode<synchronous>, transform_indices = @transform_2, window_bounds = array<i64: 1, 8>}, {pipeline_mode = #tpu.pipeline_mode<synchronous>, transform_indices = @transform_3, window_bounds = array<i64: 9, 8, 4>}, {pipeline_mode = #tpu.pipeline_mode<synchronous>, transform_indices = @transform_4, window_bounds = array<i64: 1, 4>}, {transform_indices = @transform_5, window_bounds = array<i64: 1, 8, 8, 4>}]} {
    %c0 = arith.constant 0 : index
    %c0_0 = arith.constant 0 : index
    %c0_1 = arith.constant 0 : index
    %c0_2 = arith.constant 0 : index
    %0 = vector.load %arg1[%c0, %c0_0, %c0_1, %c0_2] : memref<1x8x8x8xf32, #tpu.memory_space<vmem>>, vector<1x8x8x8xf32>
    %1 = vector.shape_cast %0 : vector<1x8x8x8xf32> to vector<8x8x8xf32>
    %2 = vector.shape_cast %1 : vector<8x8x8xf32> to vector<64x8xf32>
    %3 = arith.truncf %2 : vector<64x8xf32> to vector<64x8xbf16>
    %c0_3 = arith.constant 0 : index
    %c0_4 = arith.constant 0 : index
    %4 = vector.load %arg2[%c0_3, %c0_4] : memref<8x8xf32, #tpu.memory_space<vmem>>, vector<8x8xf32>
    %5 = arith.truncf %4 : vector<8x8xf32> to vector<8x8xbf16>
    %cst = arith.constant dense<0.000000e+00> : vector<64x8xf32>
    %6 = tpu.matmul %3, %5, %cst {dimension_numbers = #tpu.dot_dimension_numbers<[1], [0], [0], [1], [0, 0, 1, 1], [], []>} : vector<64x8xbf16>, vector<8x8xbf16>, vector<64x8xf32> -> vector<64x8xf32>
    %c0_5 = arith.constant 0 : index
    %c0_6 = arith.constant 0 : index
    %7 = vector.load %arg3[%c0_5, %c0_6] : memref<1x8xf32, #tpu.memory_space<vmem>>, vector<1x8xf32>
    %8 = vector.broadcast %7 : vector<1x8xf32> to vector<64x8xf32>
    %9 = arith.addf %6, %8 : vector<64x8xf32>
    %cst_7 = arith.constant 0.000000e+00 : f32
    %10 = vector.broadcast %cst_7 : f32 to vector<64x8xf32>
    %11 = arith.maximumf %9, %10 : vector<64x8xf32>
    %cst_8 = arith.constant 0.000000e+00 : f32
    %12 = vector.broadcast %cst_8 : f32 to vector<10x10x8xf32>
    %c0_9 = arith.constant 0 : index
    %c0_10 = arith.constant 0 : index
    %c0_11 = arith.constant 0 : index
    %13 = vector.load %arg7[%c0_9, %c0_10, %c0_11] : memref<10x10x8xf32, #tpu.memory_space<vmem>>, vector<10x10x8xf32>
    tpu.vector_store %arg7[%c0_9, %c0_10, %c0_11], %12 {strides = array<i32>} : memref<10x10x8xf32, #tpu.memory_space<vmem>>, vector<10x10x8xf32>,
    %14 = vector.shape_cast %11 : vector<64x8xf32> to vector<8x8x8xf32>
    %c1 = arith.constant 1 : index
    %c1_12 = arith.constant 1 : index
    %c0_13 = arith.constant 0 : index
    %15 = vector.load %arg7[%c1, %c1_12, %c0_13] : memref<10x10x8xf32, #tpu.memory_space<vmem>>, vector<8x8x8xf32>
    tpu.vector_store %arg7[%c1, %c1_12, %c0_13], %14 {strides = array<i32>} : memref<10x10x8xf32, #tpu.memory_space<vmem>>, vector<8x8x8xf32>,
    %cst_14 = arith.constant 0.000000e+00 : f32
    %16 = vector.broadcast %cst_14 : f32 to vector<64x4xf32>
    %c0_15 = arith.constant 0 : index
    %c0_16 = arith.constant 0 : index
    %c0_17 = arith.constant 0 : index
    %17 = vector.load %arg7[%c0_15, %c0_16, %c0_17] : memref<10x10x8xf32, #tpu.memory_space<vmem>>, vector<8x8x8xf32>
    %18 = vector.shape_cast %17 : vector<8x8x8xf32> to vector<64x8xf32>
    %19 = arith.truncf %18 : vector<64x8xf32> to vector<64x8xbf16>
    %c0_18 = arith.constant 0 : index
    %c0_19 = arith.constant 0 : index
    %c0_20 = arith.constant 0 : index
    %20 = vector.load %arg4[%c0_18, %c0_19, %c0_20] : memref<9x8x4xf32, #tpu.memory_space<vmem>>, vector<1x8x4xf32>
    %21 = vector.shape_cast %20 : vector<1x8x4xf32> to vector<8x4xf32>
    %22 = arith.truncf %21 : vector<8x4xf32> to vector<8x4xbf16>
    %cst_21 = arith.constant dense<0.000000e+00> : vector<64x4xf32>
    %23 = tpu.matmul %19, %22, %cst_21 {dimension_numbers = #tpu.dot_dimension_numbers<[1], [0], [0], [1], [0, 0, 1, 1], [], []>} : vector<64x8xbf16>, vector<8x4xbf16>, vector<64x4xf32> -> vector<64x4xf32>
    %24 = arith.addf %16, %23 : vector<64x4xf32>
    %c0_22 = arith.constant 0 : index
    %c1_23 = arith.constant 1 : index
    %c0_24 = arith.constant 0 : index
    %25 = vector.load %arg7[%c0_22, %c1_23, %c0_24] : memref<10x10x8xf32, #tpu.memory_space<vmem>>, vector<8x8x8xf32>
    %26 = vector.shape_cast %25 : vector<8x8x8xf32> to vector<64x8xf32>
    %27 = arith.truncf %26 : vector<64x8xf32> to vector<64x8xbf16>
    %c1_25 = arith.constant 1 : index
    %c0_26 = arith.constant 0 : index
    %c0_27 = arith.constant 0 : index
    %28 = vector.load %arg4[%c1_25, %c0_26, %c0_27] : memref<9x8x4xf32, #tpu.memory_space<vmem>>, vector<1x8x4xf32>
    %29 = vector.shape_cast %28 : vector<1x8x4xf32> to vector<8x4xf32>
    %30 = arith.truncf %29 : vector<8x4xf32> to vector<8x4xbf16>
    %cst_28 = arith.constant dense<0.000000e+00> : vector<64x4xf32>
    %31 = tpu.matmul %27, %30, %cst_28 {dimension_numbers = #tpu.dot_dimension_numbers<[1], [0], [0], [1], [0, 0, 1, 1], [], []>} : vector<64x8xbf16>, vector<8x4xbf16>, vector<64x4xf32> -> vector<64x4xf32>
    %32 = arith.addf %24, %31 : vector<64x4xf32>
    %c0_29 = arith.constant 0 : index
    %c2 = arith.constant 2 : index
    %c0_30 = arith.constant 0 : index
    %33 = vector.load %arg7[%c0_29, %c2, %c0_30] : memref<10x10x8xf32, #tpu.memory_space<vmem>>, vector<8x8x8xf32>
    %34 = vector.shape_cast %33 : vector<8x8x8xf32> to vector<64x8xf32>
    %35 = arith.truncf %34 : vector<64x8xf32> to vector<64x8xbf16>
    %c2_31 = arith.constant 2 : index
    %c0_32 = arith.constant 0 : index
    %c0_33 = arith.constant 0 : index
    %36 = vector.load %arg4[%c2_31, %c0_32, %c0_33] : memref<9x8x4xf32, #tpu.memory_space<vmem>>, vector<1x8x4xf32>
    %37 = vector.shape_cast %36 : vector<1x8x4xf32> to vector<8x4xf32>
    %38 = arith.truncf %37 : vector<8x4xf32> to vector<8x4xbf16>
    %cst_34 = arith.constant dense<0.000000e+00> : vector<64x4xf32>
    %39 = tpu.matmul %35, %38, %cst_34 {dimension_numbers = #tpu.dot_dimension_numbers<[1], [0], [0], [1], [0, 0, 1, 1], [], []>} : vector<64x8xbf16>, vector<8x4xbf16>, vector<64x4xf32> -> vector<64x4xf32>
    %40 = arith.addf %32, %39 : vector<64x4xf32>
    %c1_35 = arith.constant 1 : index
    %c0_36 = arith.constant 0 : index
    %c0_37 = arith.constant 0 : index
    %41 = vector.load %arg7[%c1_35, %c0_36, %c0_37] : memref<10x10x8xf32, #tpu.memory_space<vmem>>, vector<8x8x8xf32>
    %42 = vector.shape_cast %41 : vector<8x8x8xf32> to vector<64x8xf32>
    %43 = arith.truncf %42 : vector<64x8xf32> to vector<64x8xbf16>
    %c3 = arith.constant 3 : index
    %c0_38 = arith.constant 0 : index
    %c0_39 = arith.constant 0 : index
    %44 = vector.load %arg4[%c3, %c0_38, %c0_39] : memref<9x8x4xf32, #tpu.memory_space<vmem>>, vector<1x8x4xf32>
    %45 = vector.shape_cast %44 : vector<1x8x4xf32> to vector<8x4xf32>
    %46 = arith.truncf %45 : vector<8x4xf32> to vector<8x4xbf16>
    %cst_40 = arith.constant dense<0.000000e+00> : vector<64x4xf32>
    %47 = tpu.matmul %43, %46, %cst_40 {dimension_numbers = #tpu.dot_dimension_numbers<[1], [0], [0], [1], [0, 0, 1, 1], [], []>} : vector<64x8xbf16>, vector<8x4xbf16>, vector<64x4xf32> -> vector<64x4xf32>
    %48 = arith.addf %40, %47 : vector<64x4xf32>
    %c1_41 = arith.constant 1 : index
    %c1_42 = arith.constant 1 : index
    %c0_43 = arith.constant 0 : index
    %49 = vector.load %arg7[%c1_41, %c1_42, %c0_43] : memref<10x10x8xf32, #tpu.memory_space<vmem>>, vector<8x8x8xf32>
    %50 = vector.shape_cast %49 : vector<8x8x8xf32> to vector<64x8xf32>
    %51 = arith.truncf %50 : vector<64x8xf32> to vector<64x8xbf16>
    %c4 = arith.constant 4 : index
    %c0_44 = arith.constant 0 : index
    %c0_45 = arith.constant 0 : index
    %52 = vector.load %arg4[%c4, %c0_44, %c0_45] : memref<9x8x4xf32, #tpu.memory_space<vmem>>, vector<1x8x4xf32>
    %53 = vector.shape_cast %52 : vector<1x8x4xf32> to vector<8x4xf32>
    %54 = arith.truncf %53 : vector<8x4xf32> to vector<8x4xbf16>
    %cst_46 = arith.constant dense<0.000000e+00> : vector<64x4xf32>
    %55 = tpu.matmul %51, %54, %cst_46 {dimension_numbers = #tpu.dot_dimension_numbers<[1], [0], [0], [1], [0, 0, 1, 1], [], []>} : vector<64x8xbf16>, vector<8x4xbf16>, vector<64x4xf32> -> vector<64x4xf32>
    %56 = arith.addf %48, %55 : vector<64x4xf32>
    %c1_47 = arith.constant 1 : index
    %c2_48 = arith.constant 2 : index
    %c0_49 = arith.constant 0 : index
    %57 = vector.load %arg7[%c1_47, %c2_48, %c0_49] : memref<10x10x8xf32, #tpu.memory_space<vmem>>, vector<8x8x8xf32>
    %58 = vector.shape_cast %57 : vector<8x8x8xf32> to vector<64x8xf32>
    %59 = arith.truncf %58 : vector<64x8xf32> to vector<64x8xbf16>
    %c5 = arith.constant 5 : index
    %c0_50 = arith.constant 0 : index
    %c0_51 = arith.constant 0 : index
    %60 = vector.load %arg4[%c5, %c0_50, %c0_51] : memref<9x8x4xf32, #tpu.memory_space<vmem>>, vector<1x8x4xf32>
    %61 = vector.shape_cast %60 : vector<1x8x4xf32> to vector<8x4xf32>
    %62 = arith.truncf %61 : vector<8x4xf32> to vector<8x4xbf16>
    %cst_52 = arith.constant dense<0.000000e+00> : vector<64x4xf32>
    %63 = tpu.matmul %59, %62, %cst_52 {dimension_numbers = #tpu.dot_dimension_numbers<[1], [0], [0], [1], [0, 0, 1, 1], [], []>} : vector<64x8xbf16>, vector<8x4xbf16>, vector<64x4xf32> -> vector<64x4xf32>
    %64 = arith.addf %56, %63 : vector<64x4xf32>
    %c2_53 = arith.constant 2 : index
    %c0_54 = arith.constant 0 : index
    %c0_55 = arith.constant 0 : index
    %65 = vector.load %arg7[%c2_53, %c0_54, %c0_55] : memref<10x10x8xf32, #tpu.memory_space<vmem>>, vector<8x8x8xf32>
    %66 = vector.shape_cast %65 : vector<8x8x8xf32> to vector<64x8xf32>
    %67 = arith.truncf %66 : vector<64x8xf32> to vector<64x8xbf16>
    %c6 = arith.constant 6 : index
    %c0_56 = arith.constant 0 : index
    %c0_57 = arith.constant 0 : index
    %68 = vector.load %arg4[%c6, %c0_56, %c0_57] : memref<9x8x4xf32, #tpu.memory_space<vmem>>, vector<1x8x4xf32>
    %69 = vector.shape_cast %68 : vector<1x8x4xf32> to vector<8x4xf32>
    %70 = arith.truncf %69 : vector<8x4xf32> to vector<8x4xbf16>
    %cst_58 = arith.constant dense<0.000000e+00> : vector<64x4xf32>
    %71 = tpu.matmul %67, %70, %cst_58 {dimension_numbers = #tpu.dot_dimension_numbers<[1], [0], [0], [1], [0, 0, 1, 1], [], []>} : vector<64x8xbf16>, vector<8x4xbf16>, vector<64x4xf32> -> vector<64x4xf32>
    %72 = arith.addf %64, %71 : vector<64x4xf32>
    %c2_59 = arith.constant 2 : index
    %c1_60 = arith.constant 1 : index
    %c0_61 = arith.constant 0 : index
    %73 = vector.load %arg7[%c2_59, %c1_60, %c0_61] : memref<10x10x8xf32, #tpu.memory_space<vmem>>, vector<8x8x8xf32>
    %74 = vector.shape_cast %73 : vector<8x8x8xf32> to vector<64x8xf32>
    %75 = arith.truncf %74 : vector<64x8xf32> to vector<64x8xbf16>
    %c7 = arith.constant 7 : index
    %c0_62 = arith.constant 0 : index
    %c0_63 = arith.constant 0 : index
    %76 = vector.load %arg4[%c7, %c0_62, %c0_63] : memref<9x8x4xf32, #tpu.memory_space<vmem>>, vector<1x8x4xf32>
    %77 = vector.shape_cast %76 : vector<1x8x4xf32> to vector<8x4xf32>
    %78 = arith.truncf %77 : vector<8x4xf32> to vector<8x4xbf16>
    %cst_64 = arith.constant dense<0.000000e+00> : vector<64x4xf32>
    %79 = tpu.matmul %75, %78, %cst_64 {dimension_numbers = #tpu.dot_dimension_numbers<[1], [0], [0], [1], [0, 0, 1, 1], [], []>} : vector<64x8xbf16>, vector<8x4xbf16>, vector<64x4xf32> -> vector<64x4xf32>
    %80 = arith.addf %72, %79 : vector<64x4xf32>
    %c2_65 = arith.constant 2 : index
    %c2_66 = arith.constant 2 : index
    %c0_67 = arith.constant 0 : index
    %81 = vector.load %arg7[%c2_65, %c2_66, %c0_67] : memref<10x10x8xf32, #tpu.memory_space<vmem>>, vector<8x8x8xf32>
    %82 = vector.shape_cast %81 : vector<8x8x8xf32> to vector<64x8xf32>
    %83 = arith.truncf %82 : vector<64x8xf32> to vector<64x8xbf16>
    %c8 = arith.constant 8 : index
    %c0_68 = arith.constant 0 : index
    %c0_69 = arith.constant 0 : index
    %84 = vector.load %arg4[%c8, %c0_68, %c0_69] : memref<9x8x4xf32, #tpu.memory_space<vmem>>, vector<1x8x4xf32>
    %85 = vector.shape_cast %84 : vector<1x8x4xf32> to vector<8x4xf32>
    %86 = arith.truncf %85 : vector<8x4xf32> to vector<8x4xbf16>
    %cst_70 = arith.constant dense<0.000000e+00> : vector<64x4xf32>
    %87 = tpu.matmul %83, %86, %cst_70 {dimension_numbers = #tpu.dot_dimension_numbers<[1], [0], [0], [1], [0, 0, 1, 1], [], []>} : vector<64x8xbf16>, vector<8x4xbf16>, vector<64x4xf32> -> vector<64x4xf32>
    %88 = arith.addf %80, %87 : vector<64x4xf32>
    %c0_71 = arith.constant 0 : index
    %c0_72 = arith.constant 0 : index
    %89 = vector.load %arg5[%c0_71, %c0_72] : memref<1x4xf32, #tpu.memory_space<vmem>>, vector<1x4xf32>
    %90 = vector.broadcast %89 : vector<1x4xf32> to vector<64x4xf32>
    %91 = arith.addf %88, %90 : vector<64x4xf32>
    %cst_73 = arith.constant 0.000000e+00 : f32
    %92 = vector.broadcast %cst_73 : f32 to vector<64x4xf32>
    %93 = arith.maximumf %91, %92 : vector<64x4xf32>
    %94 = vector.shape_cast %93 : vector<64x4xf32> to vector<8x8x4xf32>
    %c0_74 = arith.constant 0 : index
    %c0_75 = arith.constant 0 : index
    %c0_76 = arith.constant 0 : index
    %c0_77 = arith.constant 0 : index
    %95 = vector.load %arg6[%c0_74, %c0_75, %c0_76, %c0_77] : memref<1x8x8x4xf32, #tpu.memory_space<vmem>>, vector<1x8x8x4xf32>
    %96 = vector.shape_cast %95 : vector<1x8x8x4xf32> to vector<8x8x4xf32>
    %97 = vector.shape_cast %94 : vector<8x8x4xf32> to vector<1x8x8x4xf32>
    tpu.vector_store %arg6[%c0_74, %c0_75, %c0_76, %c0_77], %97 {strides = array<i32>} : memref<1x8x8x4xf32, #tpu.memory_space<vmem>>, vector<1x8x8x4xf32>,
    return
  }
  func.func @transform_0(%arg0: i32) -> (i32, i32, i32, i32) {
    %c0_i32 = arith.constant 0 : i32
    %c0_i32_0 = arith.constant 0 : i32
    %c0_i32_1 = arith.constant 0 : i32
    %c0_i32_2 = arith.constant 0 : i32
    return %arg0, %c0_i32, %c0_i32_0, %c0_i32_1 : i32, i32, i32, i32
  }
  func.func @transform_1(%arg0: i32) -> (i32, i32) {
    %c0_i32 = arith.constant 0 : i32
    %c0_i32_0 = arith.constant 0 : i32
    %c0_i32_1 = arith.constant 0 : i32
    return %c0_i32, %c0_i32_0 : i32, i32
  }
  func.func @transform_2(%arg0: i32) -> (i32, i32) {
    %c0_i32 = arith.constant 0 : i32
    %c0_i32_0 = arith.constant 0 : i32
    %c0_i32_1 = arith.constant 0 : i32
    return %c0_i32, %c0_i32_0 : i32, i32
  }
  func.func @transform_3(%arg0: i32) -> (i32, i32, i32) {
    %c0_i32 = arith.constant 0 : i32
    %c0_i32_0 = arith.constant 0 : i32
    %c0_i32_1 = arith.constant 0 : i32
    %c0_i32_2 = arith.constant 0 : i32
    return %c0_i32, %c0_i32_0, %c0_i32_1 : i32, i32, i32
  }
  func.func @transform_4(%arg0: i32) -> (i32, i32) {
    %c0_i32 = arith.constant 0 : i32
    %c0_i32_0 = arith.constant 0 : i32
    %c0_i32_1 = arith.constant 0 : i32
    return %c0_i32, %c0_i32_0 : i32, i32
  }
  func.func @transform_5(%arg0: i32) -> (i32, i32, i32, i32) {
    %c0_i32 = arith.constant 0 : i32
    %c0_i32_0 = arith.constant 0 : i32
    %c0_i32_1 = arith.constant 0 : i32
    %c0_i32_2 = arith.constant 0 : i32
    return %arg0, %c0_i32, %c0_i32_0, %c0_i32_1 : i32, i32, i32, i32
  }
}

module attributes {stable_mosaic.version = 11 : i64} {
  func.func @_dense_layer_kernel(%arg0: i32, %arg1: memref<1x8x8x12xf32, #tpu.memory_space<vmem>>, %arg2: memref<12x12xf32, #tpu.memory_space<vmem>>, %arg3: memref<1x12xf32, #tpu.memory_space<vmem>>, %arg4: memref<9x12x4xf32, #tpu.memory_space<vmem>>, %arg5: memref<1x4xf32, #tpu.memory_space<vmem>>, %arg6: memref<1x8x8x4xf32, #tpu.memory_space<vmem>>, %arg7: memref<10x10x12xf32, #tpu.memory_space<vmem>>) attributes {dimension_semantics = [#tpu.dimension_semantics<parallel>], iteration_bounds = array<i64: 2>, scalar_prefetch = 0 : i64, scratch_operands = 1 : i64, tpu.core_type = #tpu.core_type<tc>, window_params = [{transform_indices = @transform_0, window_bounds = array<i64: 1, 8, 8, 12>}, {pipeline_mode = #tpu.pipeline_mode<synchronous>, transform_indices = @transform_1, window_bounds = array<i64: 12, 12>}, {pipeline_mode = #tpu.pipeline_mode<synchronous>, transform_indices = @transform_2, window_bounds = array<i64: 1, 12>}, {pipeline_mode = #tpu.pipeline_mode<synchronous>, transform_indices = @transform_3, window_bounds = array<i64: 9, 12, 4>}, {pipeline_mode = #tpu.pipeline_mode<synchronous>, transform_indices = @transform_4, window_bounds = array<i64: 1, 4>}, {transform_indices = @transform_5, window_bounds = array<i64: 1, 8, 8, 4>}]} {
    %c0 = arith.constant 0 : index
    %c0_0 = arith.constant 0 : index
    %c0_1 = arith.constant 0 : index
    %c0_2 = arith.constant 0 : index
    %0 = vector.load %arg1[%c0, %c0_0, %c0_1, %c0_2] : memref<1x8x8x12xf32, #tpu.memory_space<vmem>>, vector<1x8x8x12xf32>
    %1 = vector.shape_cast %0 : vector<1x8x8x12xf32> to vector<8x8x12xf32>
    %2 = vector.shape_cast %1 : vector<8x8x12xf32> to vector<64x12xf32>
    %3 = arith.truncf %2 : vector<64x12xf32> to vector<64x12xbf16>
    %c0_3 = arith.constant 0 : index
    %c0_4 = arith.constant 0 : index
    %4 = vector.load %arg2[%c0_3, %c0_4] : memref<12x12xf32, #tpu.memory_space<vmem>>, vector<12x12xf32>
    %5 = arith.truncf %4 : vector<12x12xf32> to vector<12x12xbf16>
    %cst = arith.constant dense<0.000000e+00> : vector<64x12xf32>
    %6 = tpu.matmul %3, %5, %cst {dimension_numbers = #tpu.dot_dimension_numbers<[1], [0], [0], [1], [0, 0, 1, 1], [], []>} : vector<64x12xbf16>, vector<12x12xbf16>, vector<64x12xf32> -> vector<64x12xf32>
    %c0_5 = arith.constant 0 : index
    %c0_6 = arith.constant 0 : index
    %7 = vector.load %arg3[%c0_5, %c0_6] : memref<1x12xf32, #tpu.memory_space<vmem>>, vector<1x12xf32>
    %8 = vector.broadcast %7 : vector<1x12xf32> to vector<64x12xf32>
    %9 = arith.addf %6, %8 : vector<64x12xf32>
    %cst_7 = arith.constant 0.000000e+00 : f32
    %10 = vector.broadcast %cst_7 : f32 to vector<64x12xf32>
    %11 = arith.maximumf %9, %10 : vector<64x12xf32>
    %cst_8 = arith.constant 0.000000e+00 : f32
    %12 = vector.broadcast %cst_8 : f32 to vector<10x10x12xf32>
    %c0_9 = arith.constant 0 : index
    %c0_10 = arith.constant 0 : index
    %c0_11 = arith.constant 0 : index
    %13 = vector.load %arg7[%c0_9, %c0_10, %c0_11] : memref<10x10x12xf32, #tpu.memory_space<vmem>>, vector<10x10x12xf32>
    tpu.vector_store %arg7[%c0_9, %c0_10, %c0_11], %12 {strides = array<i32>} : memref<10x10x12xf32, #tpu.memory_space<vmem>>, vector<10x10x12xf32>,
    %14 = vector.shape_cast %11 : vector<64x12xf32> to vector<8x8x12xf32>
    %c1 = arith.constant 1 : index
    %c1_12 = arith.constant 1 : index
    %c0_13 = arith.constant 0 : index
    %15 = vector.load %arg7[%c1, %c1_12, %c0_13] : memref<10x10x12xf32, #tpu.memory_space<vmem>>, vector<8x8x12xf32>
    tpu.vector_store %arg7[%c1, %c1_12, %c0_13], %14 {strides = array<i32>} : memref<10x10x12xf32, #tpu.memory_space<vmem>>, vector<8x8x12xf32>,
    %cst_14 = arith.constant 0.000000e+00 : f32
    %16 = vector.broadcast %cst_14 : f32 to vector<64x4xf32>
    %c0_15 = arith.constant 0 : index
    %c0_16 = arith.constant 0 : index
    %c0_17 = arith.constant 0 : index
    %17 = vector.load %arg7[%c0_15, %c0_16, %c0_17] : memref<10x10x12xf32, #tpu.memory_space<vmem>>, vector<8x8x12xf32>
    %18 = vector.shape_cast %17 : vector<8x8x12xf32> to vector<64x12xf32>
    %19 = arith.truncf %18 : vector<64x12xf32> to vector<64x12xbf16>
    %c0_18 = arith.constant 0 : index
    %c0_19 = arith.constant 0 : index
    %c0_20 = arith.constant 0 : index
    %20 = vector.load %arg4[%c0_18, %c0_19, %c0_20] : memref<9x12x4xf32, #tpu.memory_space<vmem>>, vector<1x12x4xf32>
    %21 = vector.shape_cast %20 : vector<1x12x4xf32> to vector<12x4xf32>
    %22 = arith.truncf %21 : vector<12x4xf32> to vector<12x4xbf16>
    %cst_21 = arith.constant dense<0.000000e+00> : vector<64x4xf32>
    %23 = tpu.matmul %19, %22, %cst_21 {dimension_numbers = #tpu.dot_dimension_numbers<[1], [0], [0], [1], [0, 0, 1, 1], [], []>} : vector<64x12xbf16>, vector<12x4xbf16>, vector<64x4xf32> -> vector<64x4xf32>
    %24 = arith.addf %16, %23 : vector<64x4xf32>
    %c0_22 = arith.constant 0 : index
    %c1_23 = arith.constant 1 : index
    %c0_24 = arith.constant 0 : index
    %25 = vector.load %arg7[%c0_22, %c1_23, %c0_24] : memref<10x10x12xf32, #tpu.memory_space<vmem>>, vector<8x8x12xf32>
    %26 = vector.shape_cast %25 : vector<8x8x12xf32> to vector<64x12xf32>
    %27 = arith.truncf %26 : vector<64x12xf32> to vector<64x12xbf16>
    %c1_25 = arith.constant 1 : index
    %c0_26 = arith.constant 0 : index
    %c0_27 = arith.constant 0 : index
    %28 = vector.load %arg4[%c1_25, %c0_26, %c0_27] : memref<9x12x4xf32, #tpu.memory_space<vmem>>, vector<1x12x4xf32>
    %29 = vector.shape_cast %28 : vector<1x12x4xf32> to vector<12x4xf32>
    %30 = arith.truncf %29 : vector<12x4xf32> to vector<12x4xbf16>
    %cst_28 = arith.constant dense<0.000000e+00> : vector<64x4xf32>
    %31 = tpu.matmul %27, %30, %cst_28 {dimension_numbers = #tpu.dot_dimension_numbers<[1], [0], [0], [1], [0, 0, 1, 1], [], []>} : vector<64x12xbf16>, vector<12x4xbf16>, vector<64x4xf32> -> vector<64x4xf32>
    %32 = arith.addf %24, %31 : vector<64x4xf32>
    %c0_29 = arith.constant 0 : index
    %c2 = arith.constant 2 : index
    %c0_30 = arith.constant 0 : index
    %33 = vector.load %arg7[%c0_29, %c2, %c0_30] : memref<10x10x12xf32, #tpu.memory_space<vmem>>, vector<8x8x12xf32>
    %34 = vector.shape_cast %33 : vector<8x8x12xf32> to vector<64x12xf32>
    %35 = arith.truncf %34 : vector<64x12xf32> to vector<64x12xbf16>
    %c2_31 = arith.constant 2 : index
    %c0_32 = arith.constant 0 : index
    %c0_33 = arith.constant 0 : index
    %36 = vector.load %arg4[%c2_31, %c0_32, %c0_33] : memref<9x12x4xf32, #tpu.memory_space<vmem>>, vector<1x12x4xf32>
    %37 = vector.shape_cast %36 : vector<1x12x4xf32> to vector<12x4xf32>
    %38 = arith.truncf %37 : vector<12x4xf32> to vector<12x4xbf16>
    %cst_34 = arith.constant dense<0.000000e+00> : vector<64x4xf32>
    %39 = tpu.matmul %35, %38, %cst_34 {dimension_numbers = #tpu.dot_dimension_numbers<[1], [0], [0], [1], [0, 0, 1, 1], [], []>} : vector<64x12xbf16>, vector<12x4xbf16>, vector<64x4xf32> -> vector<64x4xf32>
    %40 = arith.addf %32, %39 : vector<64x4xf32>
    %c1_35 = arith.constant 1 : index
    %c0_36 = arith.constant 0 : index
    %c0_37 = arith.constant 0 : index
    %41 = vector.load %arg7[%c1_35, %c0_36, %c0_37] : memref<10x10x12xf32, #tpu.memory_space<vmem>>, vector<8x8x12xf32>
    %42 = vector.shape_cast %41 : vector<8x8x12xf32> to vector<64x12xf32>
    %43 = arith.truncf %42 : vector<64x12xf32> to vector<64x12xbf16>
    %c3 = arith.constant 3 : index
    %c0_38 = arith.constant 0 : index
    %c0_39 = arith.constant 0 : index
    %44 = vector.load %arg4[%c3, %c0_38, %c0_39] : memref<9x12x4xf32, #tpu.memory_space<vmem>>, vector<1x12x4xf32>
    %45 = vector.shape_cast %44 : vector<1x12x4xf32> to vector<12x4xf32>
    %46 = arith.truncf %45 : vector<12x4xf32> to vector<12x4xbf16>
    %cst_40 = arith.constant dense<0.000000e+00> : vector<64x4xf32>
    %47 = tpu.matmul %43, %46, %cst_40 {dimension_numbers = #tpu.dot_dimension_numbers<[1], [0], [0], [1], [0, 0, 1, 1], [], []>} : vector<64x12xbf16>, vector<12x4xbf16>, vector<64x4xf32> -> vector<64x4xf32>
    %48 = arith.addf %40, %47 : vector<64x4xf32>
    %c1_41 = arith.constant 1 : index
    %c1_42 = arith.constant 1 : index
    %c0_43 = arith.constant 0 : index
    %49 = vector.load %arg7[%c1_41, %c1_42, %c0_43] : memref<10x10x12xf32, #tpu.memory_space<vmem>>, vector<8x8x12xf32>
    %50 = vector.shape_cast %49 : vector<8x8x12xf32> to vector<64x12xf32>
    %51 = arith.truncf %50 : vector<64x12xf32> to vector<64x12xbf16>
    %c4 = arith.constant 4 : index
    %c0_44 = arith.constant 0 : index
    %c0_45 = arith.constant 0 : index
    %52 = vector.load %arg4[%c4, %c0_44, %c0_45] : memref<9x12x4xf32, #tpu.memory_space<vmem>>, vector<1x12x4xf32>
    %53 = vector.shape_cast %52 : vector<1x12x4xf32> to vector<12x4xf32>
    %54 = arith.truncf %53 : vector<12x4xf32> to vector<12x4xbf16>
    %cst_46 = arith.constant dense<0.000000e+00> : vector<64x4xf32>
    %55 = tpu.matmul %51, %54, %cst_46 {dimension_numbers = #tpu.dot_dimension_numbers<[1], [0], [0], [1], [0, 0, 1, 1], [], []>} : vector<64x12xbf16>, vector<12x4xbf16>, vector<64x4xf32> -> vector<64x4xf32>
    %56 = arith.addf %48, %55 : vector<64x4xf32>
    %c1_47 = arith.constant 1 : index
    %c2_48 = arith.constant 2 : index
    %c0_49 = arith.constant 0 : index
    %57 = vector.load %arg7[%c1_47, %c2_48, %c0_49] : memref<10x10x12xf32, #tpu.memory_space<vmem>>, vector<8x8x12xf32>
    %58 = vector.shape_cast %57 : vector<8x8x12xf32> to vector<64x12xf32>
    %59 = arith.truncf %58 : vector<64x12xf32> to vector<64x12xbf16>
    %c5 = arith.constant 5 : index
    %c0_50 = arith.constant 0 : index
    %c0_51 = arith.constant 0 : index
    %60 = vector.load %arg4[%c5, %c0_50, %c0_51] : memref<9x12x4xf32, #tpu.memory_space<vmem>>, vector<1x12x4xf32>
    %61 = vector.shape_cast %60 : vector<1x12x4xf32> to vector<12x4xf32>
    %62 = arith.truncf %61 : vector<12x4xf32> to vector<12x4xbf16>
    %cst_52 = arith.constant dense<0.000000e+00> : vector<64x4xf32>
    %63 = tpu.matmul %59, %62, %cst_52 {dimension_numbers = #tpu.dot_dimension_numbers<[1], [0], [0], [1], [0, 0, 1, 1], [], []>} : vector<64x12xbf16>, vector<12x4xbf16>, vector<64x4xf32> -> vector<64x4xf32>
    %64 = arith.addf %56, %63 : vector<64x4xf32>
    %c2_53 = arith.constant 2 : index
    %c0_54 = arith.constant 0 : index
    %c0_55 = arith.constant 0 : index
    %65 = vector.load %arg7[%c2_53, %c0_54, %c0_55] : memref<10x10x12xf32, #tpu.memory_space<vmem>>, vector<8x8x12xf32>
    %66 = vector.shape_cast %65 : vector<8x8x12xf32> to vector<64x12xf32>
    %67 = arith.truncf %66 : vector<64x12xf32> to vector<64x12xbf16>
    %c6 = arith.constant 6 : index
    %c0_56 = arith.constant 0 : index
    %c0_57 = arith.constant 0 : index
    %68 = vector.load %arg4[%c6, %c0_56, %c0_57] : memref<9x12x4xf32, #tpu.memory_space<vmem>>, vector<1x12x4xf32>
    %69 = vector.shape_cast %68 : vector<1x12x4xf32> to vector<12x4xf32>
    %70 = arith.truncf %69 : vector<12x4xf32> to vector<12x4xbf16>
    %cst_58 = arith.constant dense<0.000000e+00> : vector<64x4xf32>
    %71 = tpu.matmul %67, %70, %cst_58 {dimension_numbers = #tpu.dot_dimension_numbers<[1], [0], [0], [1], [0, 0, 1, 1], [], []>} : vector<64x12xbf16>, vector<12x4xbf16>, vector<64x4xf32> -> vector<64x4xf32>
    %72 = arith.addf %64, %71 : vector<64x4xf32>
    %c2_59 = arith.constant 2 : index
    %c1_60 = arith.constant 1 : index
    %c0_61 = arith.constant 0 : index
    %73 = vector.load %arg7[%c2_59, %c1_60, %c0_61] : memref<10x10x12xf32, #tpu.memory_space<vmem>>, vector<8x8x12xf32>
    %74 = vector.shape_cast %73 : vector<8x8x12xf32> to vector<64x12xf32>
    %75 = arith.truncf %74 : vector<64x12xf32> to vector<64x12xbf16>
    %c7 = arith.constant 7 : index
    %c0_62 = arith.constant 0 : index
    %c0_63 = arith.constant 0 : index
    %76 = vector.load %arg4[%c7, %c0_62, %c0_63] : memref<9x12x4xf32, #tpu.memory_space<vmem>>, vector<1x12x4xf32>
    %77 = vector.shape_cast %76 : vector<1x12x4xf32> to vector<12x4xf32>
    %78 = arith.truncf %77 : vector<12x4xf32> to vector<12x4xbf16>
    %cst_64 = arith.constant dense<0.000000e+00> : vector<64x4xf32>
    %79 = tpu.matmul %75, %78, %cst_64 {dimension_numbers = #tpu.dot_dimension_numbers<[1], [0], [0], [1], [0, 0, 1, 1], [], []>} : vector<64x12xbf16>, vector<12x4xbf16>, vector<64x4xf32> -> vector<64x4xf32>
    %80 = arith.addf %72, %79 : vector<64x4xf32>
    %c2_65 = arith.constant 2 : index
    %c2_66 = arith.constant 2 : index
    %c0_67 = arith.constant 0 : index
    %81 = vector.load %arg7[%c2_65, %c2_66, %c0_67] : memref<10x10x12xf32, #tpu.memory_space<vmem>>, vector<8x8x12xf32>
    %82 = vector.shape_cast %81 : vector<8x8x12xf32> to vector<64x12xf32>
    %83 = arith.truncf %82 : vector<64x12xf32> to vector<64x12xbf16>
    %c8 = arith.constant 8 : index
    %c0_68 = arith.constant 0 : index
    %c0_69 = arith.constant 0 : index
    %84 = vector.load %arg4[%c8, %c0_68, %c0_69] : memref<9x12x4xf32, #tpu.memory_space<vmem>>, vector<1x12x4xf32>
    %85 = vector.shape_cast %84 : vector<1x12x4xf32> to vector<12x4xf32>
    %86 = arith.truncf %85 : vector<12x4xf32> to vector<12x4xbf16>
    %cst_70 = arith.constant dense<0.000000e+00> : vector<64x4xf32>
    %87 = tpu.matmul %83, %86, %cst_70 {dimension_numbers = #tpu.dot_dimension_numbers<[1], [0], [0], [1], [0, 0, 1, 1], [], []>} : vector<64x12xbf16>, vector<12x4xbf16>, vector<64x4xf32> -> vector<64x4xf32>
    %88 = arith.addf %80, %87 : vector<64x4xf32>
    %c0_71 = arith.constant 0 : index
    %c0_72 = arith.constant 0 : index
    %89 = vector.load %arg5[%c0_71, %c0_72] : memref<1x4xf32, #tpu.memory_space<vmem>>, vector<1x4xf32>
    %90 = vector.broadcast %89 : vector<1x4xf32> to vector<64x4xf32>
    %91 = arith.addf %88, %90 : vector<64x4xf32>
    %cst_73 = arith.constant 0.000000e+00 : f32
    %92 = vector.broadcast %cst_73 : f32 to vector<64x4xf32>
    %93 = arith.maximumf %91, %92 : vector<64x4xf32>
    %94 = vector.shape_cast %93 : vector<64x4xf32> to vector<8x8x4xf32>
    %c0_74 = arith.constant 0 : index
    %c0_75 = arith.constant 0 : index
    %c0_76 = arith.constant 0 : index
    %c0_77 = arith.constant 0 : index
    %95 = vector.load %arg6[%c0_74, %c0_75, %c0_76, %c0_77] : memref<1x8x8x4xf32, #tpu.memory_space<vmem>>, vector<1x8x8x4xf32>
    %96 = vector.shape_cast %95 : vector<1x8x8x4xf32> to vector<8x8x4xf32>
    %97 = vector.shape_cast %94 : vector<8x8x4xf32> to vector<1x8x8x4xf32>
    tpu.vector_store %arg6[%c0_74, %c0_75, %c0_76, %c0_77], %97 {strides = array<i32>} : memref<1x8x8x4xf32, #tpu.memory_space<vmem>>, vector<1x8x8x4xf32>,
    return
  }
  func.func @transform_0(%arg0: i32) -> (i32, i32, i32, i32) {
    %c0_i32 = arith.constant 0 : i32
    %c0_i32_0 = arith.constant 0 : i32
    %c0_i32_1 = arith.constant 0 : i32
    %c0_i32_2 = arith.constant 0 : i32
    return %arg0, %c0_i32, %c0_i32_0, %c0_i32_1 : i32, i32, i32, i32
  }
  func.func @transform_1(%arg0: i32) -> (i32, i32) {
    %c0_i32 = arith.constant 0 : i32
    %c0_i32_0 = arith.constant 0 : i32
    %c0_i32_1 = arith.constant 0 : i32
    return %c0_i32, %c0_i32_0 : i32, i32
  }
  func.func @transform_2(%arg0: i32) -> (i32, i32) {
    %c0_i32 = arith.constant 0 : i32
    %c0_i32_0 = arith.constant 0 : i32
    %c0_i32_1 = arith.constant 0 : i32
    return %c0_i32, %c0_i32_0 : i32, i32
  }
  func.func @transform_3(%arg0: i32) -> (i32, i32, i32) {
    %c0_i32 = arith.constant 0 : i32
    %c0_i32_0 = arith.constant 0 : i32
    %c0_i32_1 = arith.constant 0 : i32
    %c0_i32_2 = arith.constant 0 : i32
    return %c0_i32, %c0_i32_0, %c0_i32_1 : i32, i32, i32
  }
  func.func @transform_4(%arg0: i32) -> (i32, i32) {
    %c0_i32 = arith.constant 0 : i32
    %c0_i32_0 = arith.constant 0 : i32
    %c0_i32_1 = arith.constant 0 : i32
    return %c0_i32, %c0_i32_0 : i32, i32
  }
  func.func @transform_5(%arg0: i32) -> (i32, i32, i32, i32) {
    %c0_i32 = arith.constant 0 : i32
    %c0_i32_0 = arith.constant 0 : i32
    %c0_i32_1 = arith.constant 0 : i32
    %c0_i32_2 = arith.constant 0 : i32
    return %arg0, %c0_i32, %c0_i32_0, %c0_i32_1 : i32, i32, i32, i32
  }
}

module attributes {stable_mosaic.version = 11 : i64} {
  func.func @_bn_relu_matmul_kernel(%arg0: i32, %arg1: memref<128x16xf32, #tpu.memory_space<vmem>>, %arg2: memref<1x16xf32, #tpu.memory_space<vmem>>, %arg3: memref<1x16xf32, #tpu.memory_space<vmem>>, %arg4: memref<16x8xf32, #tpu.memory_space<vmem>>, %arg5: memref<128x8xf32, #tpu.memory_space<vmem>>) attributes {dimension_semantics = [#tpu.dimension_semantics<parallel>], iteration_bounds = array<i64: 1>, scalar_prefetch = 0 : i64, scratch_operands = 0 : i64, tpu.core_type = #tpu.core_type<tc>, window_params = [{transform_indices = @transform_0, window_bounds = array<i64: 128, 16>}, {pipeline_mode = #tpu.pipeline_mode<synchronous>, transform_indices = @transform_1, window_bounds = array<i64: 1, 16>}, {pipeline_mode = #tpu.pipeline_mode<synchronous>, transform_indices = @transform_2, window_bounds = array<i64: 1, 16>}, {pipeline_mode = #tpu.pipeline_mode<synchronous>, transform_indices = @transform_3, window_bounds = array<i64: 16, 8>}, {transform_indices = @transform_4, window_bounds = array<i64: 128, 8>}]} {
    %c0 = arith.constant 0 : index
    %c0_0 = arith.constant 0 : index
    %0 = vector.load %arg1[%c0, %c0_0] : memref<128x16xf32, #tpu.memory_space<vmem>>, vector<128x16xf32>
    %c0_1 = arith.constant 0 : index
    %c0_2 = arith.constant 0 : index
    %1 = vector.load %arg2[%c0_1, %c0_2] : memref<1x16xf32, #tpu.memory_space<vmem>>, vector<1x16xf32>
    %2 = vector.broadcast %1 : vector<1x16xf32> to vector<128x16xf32>
    %3 = arith.mulf %0, %2 : vector<128x16xf32>
    %c0_3 = arith.constant 0 : index
    %c0_4 = arith.constant 0 : index
    %4 = vector.load %arg3[%c0_3, %c0_4] : memref<1x16xf32, #tpu.memory_space<vmem>>, vector<1x16xf32>
    %5 = vector.broadcast %4 : vector<1x16xf32> to vector<128x16xf32>
    %6 = arith.addf %3, %5 : vector<128x16xf32>
    %cst = arith.constant 0.000000e+00 : f32
    %7 = vector.broadcast %cst : f32 to vector<128x16xf32>
    %8 = arith.maximumf %6, %7 : vector<128x16xf32>
    %9 = arith.truncf %8 : vector<128x16xf32> to vector<128x16xbf16>
    %c0_5 = arith.constant 0 : index
    %c0_6 = arith.constant 0 : index
    %10 = vector.load %arg4[%c0_5, %c0_6] : memref<16x8xf32, #tpu.memory_space<vmem>>, vector<16x8xf32>
    %11 = arith.truncf %10 : vector<16x8xf32> to vector<16x8xbf16>
    %cst_7 = arith.constant dense<0.000000e+00> : vector<128x8xf32>
    %12 = tpu.matmul %9, %11, %cst_7 {dimension_numbers = #tpu.dot_dimension_numbers<[1], [0], [0], [1], [0, 0, 1, 1], [], []>} : vector<128x16xbf16>, vector<16x8xbf16>, vector<128x8xf32> -> vector<128x8xf32>
    %c0_8 = arith.constant 0 : index
    %c0_9 = arith.constant 0 : index
    %13 = vector.load %arg5[%c0_8, %c0_9] : memref<128x8xf32, #tpu.memory_space<vmem>>, vector<128x8xf32>
    tpu.vector_store %arg5[%c0_8, %c0_9], %12 {strides = array<i32>} : memref<128x8xf32, #tpu.memory_space<vmem>>, vector<128x8xf32>,
    return
  }
  func.func @transform_0(%arg0: i32) -> (i32, i32) {
    %c0_i32 = arith.constant 0 : i32
    %c0_i32_0 = arith.constant 0 : i32
    return %arg0, %c0_i32 : i32, i32
  }
  func.func @transform_1(%arg0: i32) -> (i32, i32) {
    %c0_i32 = arith.constant 0 : i32
    %c0_i32_0 = arith.constant 0 : i32
    %c0_i32_1 = arith.constant 0 : i32
    return %c0_i32, %c0_i32_0 : i32, i32
  }
  func.func @transform_2(%arg0: i32) -> (i32, i32) {
    %c0_i32 = arith.constant 0 : i32
    %c0_i32_0 = arith.constant 0 : i32
    %c0_i32_1 = arith.constant 0 : i32
    return %c0_i32, %c0_i32_0 : i32, i32
  }
  func.func @transform_3(%arg0: i32) -> (i32, i32) {
    %c0_i32 = arith.constant 0 : i32
    %c0_i32_0 = arith.constant 0 : i32
    %c0_i32_1 = arith.constant 0 : i32
    return %c0_i32, %c0_i32_0 : i32, i32
  }
  func.func @transform_4(%arg0: i32) -> (i32, i32) {
    %c0_i32 = arith.constant 0 : i32
    %c0_i32_0 = arith.constant 0 : i32
    return %arg0, %c0_i32 : i32, i32
  }
}

</mosaic_0001>

<bundles_post_ra>
// kernel: multihead_dense_block.7
= control target key start
LH: loop header
LB: loop body
LE: loop exit
PB: predicated region body
PF: predicated region fallthrough
CT: control target
= control target key end

     0   :  { %vm73_vm0 = vcmask 1043456   ;;  %vm48_vm1 = vcmask 64512   ;;  %s364_s1 = inlined_call_operand.vmem [shape: f32[8,128], index: 1, kind: input, shape index: {}]   ;;  %s365_s0 = inlined_call_operand.vmem [shape: f32[128,8], index: 0, kind: input, shape index: {}]   ;;  %s366_s2 = inlined_call_operand.vmem [shape: f32[1,128], index: 2, kind: input, shape index: {}]   ;;  %s367_s3 = inlined_call_operand.vmem [shape: f32[128,128], index: 3, kind: output, shape index: {}]  }
   0x1   :  { %v39_v0 = vld [vmem:[%s364_s1] sm:$0xff]  ;;  %v16_v2 = vld [vmem:[%s365_s0 + $0x8] sm:$0xff]  ;;  %v17_v7 = vld [vmem:[%s365_s0 + $0x10] sm:$0xff] }
   0x2   :  { %v15_v1 = vld [vmem:[%s365_s0] sm:$0xff]  ;;  %v40_v3 = vpack.c.bf16 %v39_v0, %v39_v0  ;;  %v24_v6 = vld [vmem:[%s365_s0 + $0x48] sm:$0xff]  ;;  %v18_v9 = vld [vmem:[%s365_s0 + $0x18] sm:$0xff] }
   0x3   :  { %v31_v4 = vpack.c.bf16 %v16_v2, %v15_v1  ;;  %v23_v5 = vld [vmem:[%s365_s0 + $0x40] sm:$0xff]  ;;  %v25_v10 = vld [vmem:[%s365_s0 + $0x50] sm:$0xff]  ;;  %v26_v11 = vld [vmem:[%s365_s0 + $0x58] sm:$0xff]  ;;  %v32_v13 = vpack.c.bf16 %v18_v9, %v17_v7 }
   0x4   :  { %v35_v8 = vpack.c.bf16 %v24_v6, %v23_v5  ;;  %232 = vmatprep.subr.msk.bf16.mxu0 %vm73_vm0, %v40_v3  ;;  %233 = vmatprep.subr.msk.bf16.mxu1 %vm73_vm0, %v40_v3  ;;  %v75_v12 = vsel %vm73_vm0, %v40_v3, 0  ;;  %v36_v14 = vpack.c.bf16 %v26_v11, %v25_v10  ;;  %v19_v15 = vld [vmem:[%s365_s0 + $0x20] sm:$0xff]  ;;  %v20_v16 = vld [vmem:[%s365_s0 + $0x28] sm:$0xff]  ;;  %v21_v21 = vld [vmem:[%s365_s0 + $0x30] sm:$0xff] }
   0x5   :  { %v27_v17 = vld [vmem:[%s365_s0 + $0x60] sm:$0xff]  ;;  %213 = vmatpush3.bf16.msra.mxu0 %v75_v12  ;;  %231 = vmatpush3.bf16.msra.mxu1 %v75_v12  ;;  %v33_v18 = vpack.c.bf16 %v20_v16, %v19_v15  ;;  %v28_v19 = vld [vmem:[%s365_s0 + $0x68] sm:$0xff]  ;;  %v22_v22 = vld [vmem:[%s365_s0 + $0x38] sm:$0xff] }
   0x6   :  { %214 = vmatprep.mubr.msk.bf16.mxu0 %vm48_vm1, %v31_v4  ;;  %222 = vmatprep.mubr.msk.bf16.mxu1 %vm48_vm1, %v35_v8  ;;  %v37_v20 = vpack.c.bf16 %v28_v19, %v27_v17  ;;  %v29_v23 = vld [vmem:[%s365_s0 + $0x70] sm:$0xff]  ;;  %v30_v24 = vld [vmem:[%s365_s0 + $0x78] sm:$0xff]  ;;  %v34_v25 = vpack.c.bf16 %v22_v22, %v21_v21  ;;  %v194_v27 = vld [vmem:[%s366_s2] ss:$0 sm:$0xff] }
   0x7   :  { %v38_v26 = vpack.c.bf16 %v30_v24, %v29_v23 }
   0x8   :  { %215 = vmatmul.mubr.msk.bf16.vlgmr.msra.gmra.mxu0 %vm48_vm1, %v32_v13  ;;  %223 = vmatmul.mubr.msk.bf16.vlgmr.msra.gmra.mxu1 %vm48_vm1, %v36_v14 }
   0x9   :  { %218 = vmatprep.mubr.msk.bf16.mxu0 %vm48_vm1, %v33_v18  ;;  %226 = vmatprep.mubr.msk.bf16.mxu1 %vm48_vm1, %v37_v20 }
  0x10   :  { %219 = vmatmul.mubr.msk.bf16.gmra.mxu0 %vm48_vm1, %v34_v25  ;;  %227 = vmatmul.mubr.msk.bf16.gmra.mxu1 %vm48_vm1, %v38_v26 }
  0xc8   :  { %v216_v28 = vpop.f32.mrf.mxu0  ;;  %v224_v29 = vpop.f32.mrf.mxu1 }
  0xc9   :  { %v120_v30 = vadd.f32 %v216_v28, %v194_v27  ;;  %v152_v31 = vadd.f32 %v224_v29, %v194_v27 }
  0xca   :  { %v111_v32 = vpop.f32.mrf.mxu0  ;;  %v143_v33 = vpop.f32.mrf.mxu1 }
  0xcb   :  { %176 = vst [vmem:[%s367_s3 + $0x10] sm:$0xff] %v120_v30  ;;  %184 = vst [vmem:[%s367_s3 + $0x50] sm:$0xff] %v152_v31  ;;  %v112_v34 = vadd.f32 %v194_v27, %v111_v32  ;;  %v144_v35 = vadd.f32 %v194_v27, %v143_v33 }
  0xcc   :  { %v217_v36 = vpop.f32.mrf.mxu0  ;;  %v225_v37 = vpop.f32.mrf.mxu1 }
  0xcd   :  { %174 = vst [vmem:[%s367_s3] sm:$0xff] %v112_v34  ;;  %182 = vst [vmem:[%s367_s3 + $0x40] sm:$0xff] %v144_v35  ;;  %v123_v38 = vadd.f32 %v217_v36, %v194_v27  ;;  %v155_v39 = vadd.f32 %v225_v37, %v194_v27 }
  0xce   :  { %v114_v40 = vpop.f32.mrf.mxu0  ;;  %v146_v41 = vpop.f32.mrf.mxu1 }
  0xcf   :  { %177 = vst [vmem:[%s367_s3 + $0x18] sm:$0xff] %v123_v38  ;;  %185 = vst [vmem:[%s367_s3 + $0x58] sm:$0xff] %v155_v39  ;;  %v115_v42 = vadd.f32 %v194_v27, %v114_v40  ;;  %v147_v43 = vadd.f32 %v194_v27, %v146_v41 }
  0xd0   :  { %v220_v44 = vpop.f32.mrf.mxu0  ;;  %v228_v45 = vpop.f32.mrf.mxu1 }
  0xd1   :  { %175 = vst [vmem:[%s367_s3 + $0x8] sm:$0xff] %v115_v42  ;;  %183 = vst [vmem:[%s367_s3 + $0x48] sm:$0xff] %v147_v43  ;;  %v136_v46 = vadd.f32 %v220_v44, %v194_v27  ;;  %v168_v47 = vadd.f32 %v228_v45, %v194_v27 }
  0xd2   :  { %v127_v48 = vpop.f32.mrf.mxu0  ;;  %v159_v49 = vpop.f32.mrf.mxu1 }
  0xd3   :  { %180 = vst [vmem:[%s367_s3 + $0x30] sm:$0xff] %v136_v46  ;;  %188 = vst [vmem:[%s367_s3 + $0x70] sm:$0xff] %v168_v47  ;;  %v128_v50 = vadd.f32 %v194_v27, %v127_v48  ;;  %v160_v51 = vadd.f32 %v194_v27, %v159_v49 }
  0xd4   :  { %v221_v52 = vpop.f32.mrf.mxu0  ;;  %v229_v53 = vpop.f32.mrf.mxu1 }
  0xd5   :  { %178 = vst [vmem:[%s367_s3 + $0x20] sm:$0xff] %v128_v50  ;;  %186 = vst [vmem:[%s367_s3 + $0x60] sm:$0xff] %v160_v51  ;;  %v139_v54 = vadd.f32 %v221_v52, %v194_v27  ;;  %v171_v55 = vadd.f32 %v229_v53, %v194_v27 }
  0xd6   :  { %v130_v56 = vpop.f32.mrf.mxu0  ;;  %v162_v57 = vpop.f32.mrf.mxu1 }
  0xd7   :  { %181 = vst [vmem:[%s367_s3 + $0x38] sm:$0xff] %v139_v54  ;;  %189 = vst [vmem:[%s367_s3 + $0x78] sm:$0xff] %v171_v55  ;;  %v131_v58 = vadd.f32 %v194_v27, %v130_v56  ;;  %v163_v59 = vadd.f32 %v194_v27, %v162_v57 }
  0xd9   :  { %179 = vst [vmem:[%s367_s3 + $0x28] sm:$0xff] %v131_v58  ;;  %187 = vst [vmem:[%s367_s3 + $0x68] sm:$0xff] %v163_v59 }

// kernel: multihead_dense_block.9
= control target key start
LH: loop header
LB: loop body
LE: loop exit
PB: predicated region body
PF: predicated region fallthrough
CT: control target
= control target key end

     0   :  { %vm49_vm0 = vcmask 130048   ;;  %s362_s1 = inlined_call_operand.vmem [shape: f32[16,128], index: 1, kind: input, shape index: {}]   ;;  %s363_s0 = inlined_call_operand.vmem [shape: f32[128,16], index: 0, kind: input, shape index: {}]   ;;  %s364_s2 = inlined_call_operand.vmem [shape: f32[1,128], index: 2, kind: input, shape index: {}]   ;;  %s365_s3 = inlined_call_operand.vmem [shape: f32[128,128], index: 3, kind: output, shape index: {}]  }
   0x1   :  { %v39_v0 = vld [vmem:[%s362_s1] sm:$0xff]  ;;  %v40_v1 = vld [vmem:[%s362_s1 + $0x8] sm:$0xff]  ;;  %v17_v9 = vld [vmem:[%s363_s0 + $0x10] sm:$0xff] }
   0x2   :  { %v15_v2 = vld [vmem:[%s363_s0] sm:$0xff]  ;;  %v41_v3 = vpack.c.bf16 %v40_v1, %v39_v0  ;;  %v16_v4 = vld [vmem:[%s363_s0 + $0x8] sm:$0xff]  ;;  %v18_v10 = vld [vmem:[%s363_s0 + $0x18] sm:$0xff] }
   0x3   :  { %v23_v5 = vld [vmem:[%s363_s0 + $0x40] sm:$0xff]  ;;  %v24_v6 = vld [vmem:[%s363_s0 + $0x48] sm:$0xff]  ;;  %v31_v7 = vpack.c.bf16 %v16_v4, %v15_v2  ;;  %v25_v11 = vld [vmem:[%s363_s0 + $0x50] sm:$0xff]  ;;  %v32_v12 = vpack.c.bf16 %v18_v10, %v17_v9 }
   0x4   :  { %v35_v8 = vpack.c.bf16 %v24_v6, %v23_v5  ;;  %209 = vmatprep.subr.bf16.mxu0 %v41_v3  ;;  %227 = vmatprep.subr.bf16.mxu1 %v41_v3  ;;  %v26_v13 = vld [vmem:[%s363_s0 + $0x58] sm:$0xff]  ;;  %v19_v14 = vld [vmem:[%s363_s0 + $0x20] sm:$0xff]  ;;  %v20_v15 = vld [vmem:[%s363_s0 + $0x28] sm:$0xff] }
   0x5   :  { %210 = vmatpush3.bf16.msra.mxu0 %v41_v3  ;;  %228 = vmatpush3.bf16.msra.mxu1 %v41_v3  ;;  %v36_v16 = vpack.c.bf16 %v26_v13, %v25_v11  ;;  %v33_v17 = vpack.c.bf16 %v20_v15, %v19_v14  ;;  %v27_v18 = vld [vmem:[%s363_s0 + $0x60] sm:$0xff]  ;;  %v28_v19 = vld [vmem:[%s363_s0 + $0x68] sm:$0xff]  ;;  %v21_v21 = vld [vmem:[%s363_s0 + $0x30] sm:$0xff] }
   0x6   :  { %211 = vmatprep.mubr.msk.bf16.mxu0 %vm49_vm0, %v31_v7  ;;  %219 = vmatprep.mubr.msk.bf16.mxu1 %vm49_vm0, %v35_v8  ;;  %v37_v20 = vpack.c.bf16 %v28_v19, %v27_v18  ;;  %v22_v22 = vld [vmem:[%s363_s0 + $0x38] sm:$0xff]  ;;  %v29_v23 = vld [vmem:[%s363_s0 + $0x70] sm:$0xff]  ;;  %v191_v27 = vld [vmem:[%s364_s2] ss:$0 sm:$0xff] }
   0x7   :  { %v30_v24 = vld [vmem:[%s363_s0 + $0x78] sm:$0xff]  ;;  %v34_v25 = vpack.c.bf16 %v22_v22, %v21_v21 }
   0x8   :  { %212 = vmatmul.mubr.msk.bf16.vlgmr.msra.gmra.mxu0 %vm49_vm0, %v32_v12  ;;  %220 = vmatmul.mubr.msk.bf16.vlgmr.msra.gmra.mxu1 %vm49_vm0, %v36_v16  ;;  %v38_v26 = vpack.c.bf16 %v30_v24, %v29_v23 }
   0x9   :  { %215 = vmatprep.mubr.msk.bf16.mxu0 %vm49_vm0, %v33_v17  ;;  %223 = vmatprep.mubr.msk.bf16.mxu1 %vm49_vm0, %v37_v20 }
  0x10   :  { %216 = vmatmul.mubr.msk.bf16.gmra.mxu0 %vm49_vm0, %v34_v25  ;;  %224 = vmatmul.mubr.msk.bf16.gmra.mxu1 %vm49_vm0, %v38_v26 }
  0xc8   :  { %v213_v28 = vpop.f32.mrf.mxu0  ;;  %v221_v29 = vpop.f32.mrf.mxu1 }
  0xc9   :  { %v117_v30 = vadd.f32 %v213_v28, %v191_v27  ;;  %v149_v31 = vadd.f32 %v221_v29, %v191_v27 }
  0xca   :  { %v108_v32 = vpop.f32.mrf.mxu0  ;;  %v140_v33 = vpop.f32.mrf.mxu1 }
  0xcb   :  { %173 = vst [vmem:[%s365_s3 + $0x10] sm:$0xff] %v117_v30  ;;  %181 = vst [vmem:[%s365_s3 + $0x50] sm:$0xff] %v149_v31  ;;  %v109_v34 = vadd.f32 %v191_v27, %v108_v32  ;;  %v141_v35 = vadd.f32 %v191_v27, %v140_v33 }
  0xcc   :  { %v214_v36 = vpop.f32.mrf.mxu0  ;;  %v222_v37 = vpop.f32.mrf.mxu1 }
  0xcd   :  { %171 = vst [vmem:[%s365_s3] sm:$0xff] %v109_v34  ;;  %179 = vst [vmem:[%s365_s3 + $0x40] sm:$0xff] %v141_v35  ;;  %v120_v38 = vadd.f32 %v214_v36, %v191_v27  ;;  %v152_v39 = vadd.f32 %v222_v37, %v191_v27 }
  0xce   :  { %v111_v40 = vpop.f32.mrf.mxu0  ;;  %v143_v41 = vpop.f32.mrf.mxu1 }
  0xcf   :  { %174 = vst [vmem:[%s365_s3 + $0x18] sm:$0xff] %v120_v38  ;;  %182 = vst [vmem:[%s365_s3 + $0x58] sm:$0xff] %v152_v39  ;;  %v112_v42 = vadd.f32 %v191_v27, %v111_v40  ;;  %v144_v43 = vadd.f32 %v191_v27, %v143_v41 }
  0xd0   :  { %v217_v44 = vpop.f32.mrf.mxu0  ;;  %v225_v45 = vpop.f32.mrf.mxu1 }
  0xd1   :  { %172 = vst [vmem:[%s365_s3 + $0x8] sm:$0xff] %v112_v42  ;;  %180 = vst [vmem:[%s365_s3 + $0x48] sm:$0xff] %v144_v43  ;;  %v133_v46 = vadd.f32 %v217_v44, %v191_v27  ;;  %v165_v47 = vadd.f32 %v225_v45, %v191_v27 }
  0xd2   :  { %v124_v48 = vpop.f32.mrf.mxu0  ;;  %v156_v49 = vpop.f32.mrf.mxu1 }
  0xd3   :  { %177 = vst [vmem:[%s365_s3 + $0x30] sm:$0xff] %v133_v46  ;;  %185 = vst [vmem:[%s365_s3 + $0x70] sm:$0xff] %v165_v47  ;;  %v125_v50 = vadd.f32 %v191_v27, %v124_v48  ;;  %v157_v51 = vadd.f32 %v191_v27, %v156_v49 }
  0xd4   :  { %v218_v52 = vpop.f32.mrf.mxu0  ;;  %v226_v53 = vpop.f32.mrf.mxu1 }
  0xd5   :  { %175 = vst [vmem:[%s365_s3 + $0x20] sm:$0xff] %v125_v50  ;;  %183 = vst [vmem:[%s365_s3 + $0x60] sm:$0xff] %v157_v51  ;;  %v136_v54 = vadd.f32 %v218_v52, %v191_v27  ;;  %v168_v55 = vadd.f32 %v226_v53, %v191_v27 }
  0xd6   :  { %v127_v56 = vpop.f32.mrf.mxu0  ;;  %v159_v57 = vpop.f32.mrf.mxu1 }
  0xd7   :  { %178 = vst [vmem:[%s365_s3 + $0x38] sm:$0xff] %v136_v54  ;;  %186 = vst [vmem:[%s365_s3 + $0x78] sm:$0xff] %v168_v55  ;;  %v128_v58 = vadd.f32 %v191_v27, %v127_v56  ;;  %v160_v59 = vadd.f32 %v191_v27, %v159_v57 }
  0xd9   :  { %176 = vst [vmem:[%s365_s3 + $0x28] sm:$0xff] %v128_v58  ;;  %184 = vst [vmem:[%s365_s3 + $0x68] sm:$0xff] %v160_v59 }

// kernel: multihead_dense_block.10
= control target key start
LH: loop header
LB: loop body
LE: loop exit
PB: predicated region body
PF: predicated region fallthrough
CT: control target
= control target key end

     0   :  { %s1636_s18 = smov 0   ;;  %s1869_s0 = inlined_call_operand.vmem [shape: f32[2,8,8,8], index: 0, kind: input, shape index: {}]   ;;  %s1870_s1 = inlined_call_operand.vmem [shape: f32[8,8], index: 1, kind: input, shape index: {}]   ;;  %s1871_s2 = inlined_call_operand.vmem [shape: f32[1,8], index: 2, kind: input, shape index: {}]   ;;  %s1872_s3 = inlined_call_operand.vmem [shape: f32[9,8,4], index: 3, kind: input, shape index: {}]   ;;  %s1873_s4 = inlined_call_operand.vmem [shape: f32[1,4], index: 4, kind: input, shape index: {}]   ;;  %s1874_s5 = inlined_call_operand.vmem [shape: f32[2,8,8,4], index: 5, kind: output, shape index: {}]  }
   0x1 LB: > { %s1365_s19 = sadd.s32 4294967295, %s1603_s18   ;;  %p1369_p0 = scmp.ge.s32.totalorder %s1603_s18, 1  ;;  %s1603_s18 = sphi %s1636_s18, %s15_s18  }
   0x2   : > { %p187_p1 = scmp.lt.s32.totalorder %s1603_s18, 3 }
   0x4   : > { %p188_p2 = pnand %p1369_p0, %p187_p1 }
   0x6   : > { %191 = sbr.rel (%p188_p2) target bundleno = 511 (0x1ff), region = 40 }
   0xb   : > { %v238_v0 = vld [vmem:[%s1870_s1] sm:$0xff]  ;;  %vm260_vm0 = vcmask 1043456   ;;  %p215_p3 = scmp.lt.s32.totalorder %s1365_s19, 1  ;;  %vm247_vm1 = vcmask 64512   ;;  %vm338_vm2 = vcmask 58368   ;;  %v1605_v15 = vmov 0.0  }
   0xc   : > { %v239_v1 = vpack.c.bf16 %v238_v0, %v238_v0  ;;  %344 = vst.msk [vmem:[#allocation2 + $0x30] sm:$0xff] %vm247_vm1, %v1605_v15  ;;  %337 = vst.msk [vmem:[#allocation2] sm:$0xff] %vm247_vm1, %v1605_v15  ;;  %v1379_v16 = vld [vmem:[%s1872_s3 + $0x8] sm:$0xff]  ;;  %v379_v17 = vld [vmem:[%s1872_s3] sm:$0xff]  ;;  %vm1301_vm3 = vcmask 31744  }
   0xd   : > { %s1882_s19 = smov (!%p215_p3, %s1365_s19), 1  ;;  %345 = vst.msk [vmem:[#allocation2 + $0x38] sm:$0x3] %vm338_vm2, %v1605_v15  ;;  %339 = vst.msk [vmem:[#allocation2 + $0x8] sm:$0x3] %vm338_vm2, %v1605_v15  ;;  %v395_v18 = vpack.c.bf16 %v1379_v16, %v1379_v16  ;;  %v380_v19 = vpack.c.bf16 %v379_v17, %v379_v17  ;;  %v1388_v22 = vld [vmem:[%s1872_s3 + $0x10] sm:$0xff] }
   0xe   : > { %1578 = vmatprep.subr.msk.bf16.mxu0 %vm260_vm0, %v239_v1  ;;  %v262_v2 = vsel %vm260_vm0, %v239_v1, 0  ;;  %s1426_s22 = sshll.u32 %s1882_s19, 6  ;;  %340 = vst.msk [vmem:[#allocation2 + $0x10] sm:$0xff] %vm247_vm1, %v1605_v15  ;;  %342 = vst.msk [vmem:[#allocation2 + $0x20] sm:$0xff] %vm247_vm1, %v1605_v15  ;;  %v570_v23 = vpack.c.bf16 %v1388_v22, %v1388_v22  ;;  %v1393_v24 = vld [vmem:[%s1872_s3 + $0x18] sm:$0xff]  ;;  %v1398_v56 = vld [vmem:[%s1872_s3 + $0x20] sm:$0xff] }
   0xf   : > { %1479 = vmatpush3.bf16.msra.mxu0 %v262_v2  ;;  %s219_s25 = scalar_lea.vmem %s1869_s0, %s1426_s22  ;;  %341 = vst.msk [vmem:[#allocation2 + $0x18] sm:$0x3] %vm338_vm2, %v1605_v15  ;;  %343 = vst.msk [vmem:[#allocation2 + $0x28] sm:$0x3] %vm338_vm2, %v1605_v15  ;;  %1579 = vmatprep.subr.msk.bf16.mxu1 %vm260_vm0, %v395_v18  ;;  %v409_v20 = vsel %vm260_vm0, %v395_v18, 0  ;;  %v489_v21 = vsel %vm260_vm0, %v380_v19, 0  ;;  %v673_v25 = vpack.c.bf16 %v1393_v24, %v1393_v24  ;;  %s1846_s28 = scalar_lea.vmem %s1874_s5, %s1426_s22 }
  0x10   : > { %v226_v3 = vld [vmem:[%s219_s25] sm:$0xff]  ;;  %v227_v4 = vld [vmem:[%s219_s25 + $0x8] sm:$0xff]  ;;  %v228_v5 = vld [vmem:[%s219_s25 + $0x10] sm:$0xff]  ;;  %346 = vst.msk [vmem:[#allocation2 + $0x40] sm:$0xff] %vm247_vm1, %v1605_v15  ;;  %1580 = vmatprep.subr.msk.bf16.mxu0 %vm260_vm0, %v380_v19  ;;  %1489 = vmatpush3.bf16.msra.mxu1 %v409_v20  ;;  %v584_v63 = vsel %vm260_vm0, %v570_v23, 0  ;;  %v776_v0 = vpack.c.bf16 %v1398_v56, %v1398_v56 }
  0x11   : > { %v234_v6 = vpack.c.bf16 %v227_v4, %v226_v3  ;;  %v229_v7 = vld [vmem:[%s219_s25 + $0x18] sm:$0xff]  ;;  %v230_v8 = vld [vmem:[%s219_s25 + $0x20] sm:$0xff]  ;;  %v231_v9 = vld [vmem:[%s219_s25 + $0x28] sm:$0xff]  ;;  %347 = vst.msk [vmem:[#allocation2 + $0x48] sm:$0x3] %vm338_vm2, %v1605_v15  ;;  %1581 = vmatprep.subr.msk.bf16.mxu1 %vm260_vm0, %v570_v23  ;;  %v687_v3 = vsel %vm260_vm0, %v673_v25, 0 }
  0x12   : > { %v235_v10 = vpack.c.bf16 %v229_v7, %v228_v5  ;;  %v236_v11 = vpack.c.bf16 %v231_v9, %v230_v8  ;;  %v232_v12 = vld [vmem:[%s219_s25 + $0x30] sm:$0xff]  ;;  %v233_v13 = vld [vmem:[%s219_s25 + $0x38] sm:$0xff]  ;;  %348 = vst.msk [vmem:[#allocation2 + $0x50] sm:$0xff] %vm247_vm1, %v1605_v15  ;;  %350 = vst.msk [vmem:[#allocation2 + $0x60] sm:$0xff] %vm247_vm1, %v1605_v15 }
  0x13   : > { %1480 = vmatprep.mubr.msk.bf16.mxu0 %vm247_vm1, %v234_v6  ;;  %v237_v14 = vpack.c.bf16 %v233_v13, %v232_v12  ;;  %349 = vst.msk [vmem:[#allocation2 + $0x58] sm:$0x3] %vm338_vm2, %v1605_v15  ;;  %351 = vst.msk [vmem:[#allocation2 + $0x68] sm:$0x3] %vm338_vm2, %v1605_v15  ;;  %v1374_v26 = vld [vmem:[%s1871_s2] ss:$0 sm:$0xff] }
  0x14   : > { %1481 = vmatmul.mubr.msk.bf16.vlgmr.msra.gmra.mxu0 %vm247_vm1, %v235_v10  ;;  %352 = vst.msk [vmem:[#allocation2 + $0x70] sm:$0xff] %vm247_vm1, %v1605_v15  ;;  %354 = vst.msk [vmem:[#allocation2 + $0x80] sm:$0xff] %vm247_vm1, %v1605_v15  ;;  %v381_v45 = vld [vmem:[#allocation2 + $0x1] sm:$0xff]  ;;  %v1408_v23 = vld [vmem:[%s1872_s3 + $0x30] sm:$0xff] }
  0x15   : > { %1484 = vmatprep.mubr.msk.bf16.mxu0 %vm247_vm1, %v236_v11  ;;  %353 = vst.msk [vmem:[#allocation2 + $0x78] sm:$0x3] %vm338_vm2, %v1605_v15  ;;  %355 = vst.msk [vmem:[#allocation2 + $0x88] sm:$0x3] %vm338_vm2, %v1605_v15  ;;  %1499 = vmatpush3.bf16.msra.mxu0 %v489_v21  ;;  %v367_v46 = vld [vmem:[#allocation2] sm:$0xff]  ;;  %v1403_v57 = vld [vmem:[%s1872_s3 + $0x28] sm:$0xff] }
  0x16   : > { %356 = vst.msk [vmem:[#allocation2 + $0x90] sm:$0xff] %vm247_vm1, %v1605_v15  ;;  %1582 = vmatprep.subr.msk.bf16.mxu0 %vm260_vm0, %v673_v25  ;;  %v879_v4 = vpack.c.bf16 %v1403_v57, %v1403_v57  ;;  %v556_v12 = vld [vmem:[#allocation2 + $0x2] sm:$0xff]  ;;  %v1413_v24 = vld [vmem:[%s1872_s3 + $0x38] sm:$0xff] }
  0x17   : > { %357 = vst.msk [vmem:[#allocation2 + $0x98] sm:$0x3] %vm338_vm2, %v1605_v15 }
  0x1c   : > { %1485 = vmatmul.mubr.msk.bf16.gmra.mxu0 %vm247_vm1, %v237_v14 }
  0x1e   : > { %v1079_v56 = vld [vmem:[#allocation2 + $0x91] sm:$0xff] }
  0xd4   : > { %v1482_v27 = vpop.f32.mrf.mxu0 }
  0xd5   : > { %v307_v28 = vadd.f32 %v1482_v27, %v1374_v26 }
  0xd6   : > { %v298_v29 = vpop.f32.mrf.mxu0 }
  0xd7   : > { %v331_v30 = vmax.f32 %v307_v28, 0.0  ;;  %v299_v31 = vadd.f32 %v1374_v26, %v298_v29  ;;  %v790_v28 = vsel %vm260_vm0, %v776_v0, 0 }
  0xd8   : > { %v1483_v32 = vpop.f32.mrf.mxu0 }
  0xd9   : > { %361 = vst.msk [vmem:[#allocation2 + $0x31] sm:$0xff] %vm247_vm1, %v331_v30  ;;  %v329_v33 = vmax.f32 %v299_v31, 0.0  ;;  %v310_v34 = vadd.f32 %v1483_v32, %v1374_v26  ;;  %v893_v31 = vsel %vm260_vm0, %v879_v4, 0  ;;  %v983_v32 = vpack.c.bf16 %v1408_v23, %v1408_v23 }
  0xda   : > { %v301_v35 = vpop.f32.mrf.mxu0 }
  0xdb   : > { %359 = vst.msk [vmem:[#allocation2 + $0x11] sm:$0xff] %vm247_vm1, %v329_v33  ;;  %v332_v36 = vmax.f32 %v310_v34, 0.0  ;;  %v302_v37 = vadd.f32 %v1374_v26, %v301_v35  ;;  %v1086_v33 = vpack.c.bf16 %v1413_v24, %v1413_v24 }
  0xdc   : > { %v1486_v38 = vpop.f32.mrf.mxu0 }
  0xdd   : > { %362 = vst.msk [vmem:[#allocation2 + $0x41] sm:$0xff] %vm247_vm1, %v332_v36  ;;  %v330_v39 = vmax.f32 %v302_v37, 0.0  ;;  %v323_v40 = vadd.f32 %v1486_v38, %v1374_v26 }
  0xde   : > { %v314_v41 = vpop.f32.mrf.mxu0 }
  0xdf   : > { %360 = vst.msk [vmem:[#allocation2 + $0x21] sm:$0xff] %vm247_vm1, %v330_v39  ;;  %v335_v42 = vmax.f32 %v323_v40, 0.0  ;;  %v315_v43 = vadd.f32 %v1374_v26, %v314_v41 }
  0xe0   : > { %v1487_v44 = vpop.f32.mrf.mxu0  ;;  %v1720_v59 = vld [vmem:[#allocation2 + $0x31] sm:$0xff] }
  0xe1   : > { %365 = vst.msk [vmem:[#allocation2 + $0x71] sm:$0xff] %vm247_vm1, %v335_v42  ;;  %v333_v47 = vmax.f32 %v315_v43, 0.0  ;;  %v326_v48 = vadd.f32 %v1487_v44, %v1374_v26  ;;  %v370_v62 = vld [vmem:[#allocation2 + $0x30] sm:$0xff]  ;;  %v1418_v42 = vld [vmem:[%s1872_s3 + $0x40] sm:$0xff] }
  0xe2   : > { %v317_v49 = vpop.f32.mrf.mxu0  ;;  %v1707_v50 = vld [vmem:[#allocation2 + $0x11] sm:$0xff] }
  0xe3   : > { %v368_v51 = vld [vmem:[#allocation2 + $0x10] sm:$0xff]  ;;  %363 = vst.msk [vmem:[#allocation2 + $0x51] sm:$0xff] %vm247_vm1, %v333_v47  ;;  %v336_v52 = vmax.f32 %v326_v48, 0.0  ;;  %v318_v53 = vadd.f32 %v1374_v26, %v317_v49  ;;  %v389_v54 = vpack.c.bf16 %v1707_v50, %v381_v45  ;;  %v997_v45 = vsel %vm260_vm0, %v983_v32, 0 }
  0xe4   : > { %v375_v55 = vpack.c.bf16 %v368_v51, %v367_v46  ;;  %v1737_v5 = vld [vmem:[#allocation2 + $0x41] sm:$0xff]  ;;  %v557_v13 = vld [vmem:[#allocation2 + $0x12] sm:$0xff]  ;;  %v1100_v47 = vsel %vm260_vm0, %v1086_v33, 0  ;;  %v1189_v48 = vpack.c.bf16 %v1418_v42, %v1418_v42 }
  0xe5   : > { %366 = vst.msk [vmem:[#allocation2 + $0x81] sm:$0xff] %vm247_vm1, %v336_v52  ;;  %v334_v58 = vmax.f32 %v318_v53, 0.0  ;;  %1490 = vmatprep.mubr.msk.bf16.mxu1 %vm247_vm1, %v389_v54  ;;  %v371_v7 = vld [vmem:[#allocation2 + $0x40] sm:$0xff]  ;;  %v564_v19 = vpack.c.bf16 %v557_v13, %v556_v12  ;;  %v559_v25 = vld [vmem:[#allocation2 + $0x32] sm:$0xff]  ;;  %v771_v43 = vpack.c.bf16 %v1737_v5, %v1720_v59 }
  0xe6   : > { %1500 = vmatprep.mubr.msk.bf16.mxu0 %vm247_vm1, %v375_v55  ;;  %v1722_v60 = vld [vmem:[#allocation2 + $0x21] sm:$0xff]  ;;  %v668_v27 = vpack.c.bf16 %v371_v7, %v370_v62  ;;  %v1203_v54 = vsel %vm260_vm0, %v1189_v48, 0  ;;  %v976_v55 = vld [vmem:[#allocation2 + $0x90] sm:$0xff] }
  0xe7   : > { %v369_v61 = vld [vmem:[#allocation2 + $0x20] sm:$0xff]  ;;  %364 = vst.msk [vmem:[#allocation2 + $0x61] sm:$0xff] %vm247_vm1, %v334_v58  ;;  %v1728_v1 = vpack.c.bf16 %v1720_v59, %v1722_v60  ;;  %v770_v40 = vpack.c.bf16 %v1722_v60, %v1707_v50  ;;  %v1182_v59 = vld [vmem:[#allocation2 + $0x92] sm:$0xff] }
  0xe8   : > { %v1730_v2 = vpack.c.bf16 %v370_v62, %v369_v61  ;;  %v1753_v11 = vld [vmem:[#allocation2 + $0x71] sm:$0xff]  ;;  %v667_v20 = vpack.c.bf16 %v369_v61, %v368_v51  ;;  %v558_v21 = vld [vmem:[#allocation2 + $0x22] sm:$0xff] }
  0xe9   : > { %1491 = vmatmul.mubr.msk.bf16.vlgmr.msra.gmra.mxu1 %vm247_vm1, %v1728_v1  ;;  %v374_v16 = vld [vmem:[#allocation2 + $0x70] sm:$0xff]  ;;  %v1772_v26 = vpack.c.bf16 %v559_v25, %v558_v21  ;;  %v560_v29 = vld [vmem:[#allocation2 + $0x42] sm:$0xff]  ;;  %v873_v41 = vpack.c.bf16 %v558_v21, %v557_v13 }
  0xea   : > { %1501 = vmatmul.mubr.msk.bf16.vlgmr.msra.gmra.mxu0 %vm247_vm1, %v1730_v2  ;;  %1509 = vmatpush3.bf16.msra.mxu1 %v584_v63  ;;  %v1739_v6 = vld [vmem:[#allocation2 + $0x51] sm:$0xff]  ;;  %v874_v44 = vpack.c.bf16 %v560_v29, %v559_v25 }
  0xeb   : > { %v372_v8 = vld [vmem:[#allocation2 + $0x50] sm:$0xff]  ;;  %1519 = vmatpush3.bf16.msra.mxu0 %v687_v3  ;;  %v1743_v9 = vpack.c.bf16 %v1739_v6, %v1737_v5  ;;  %1583 = vmatprep.subr.msk.bf16.mxu1 %vm260_vm0, %v776_v0 }
  0xec   : > { %v1745_v10 = vpack.c.bf16 %v372_v8, %v371_v7  ;;  %1584 = vmatprep.subr.msk.bf16.mxu0 %vm260_vm0, %v879_v4  ;;  %v561_v22 = vld [vmem:[#allocation2 + $0x52] sm:$0xff]  ;;  %v666_v36 = vld [vmem:[#allocation2 + $0x80] sm:$0xff] }
  0xed   : > { %1494 = vmatprep.mubr.msk.bf16.mxu1 %vm247_vm1, %v1743_v9  ;;  %v566_v30 = vpack.c.bf16 %v561_v22, %v560_v29  ;;  %v563_v37 = vld [vmem:[#allocation2 + $0x72] sm:$0xff]  ;;  %v670_v39 = vpack.c.bf16 %v666_v36, %v374_v16  ;;  %v769_v50 = vld [vmem:[#allocation2 + $0x81] sm:$0xff]  ;;  %v980_v57 = vpack.c.bf16 %v976_v55, %v666_v36 }
  0xee   : > { %1504 = vmatprep.mubr.msk.bf16.mxu0 %vm247_vm1, %v1745_v10  ;;  %v387_v14 = vld [vmem:[#allocation2 + $0x61] sm:$0xff]  ;;  %v773_v52 = vpack.c.bf16 %v769_v50, %v1753_v11  ;;  %v1083_v58 = vpack.c.bf16 %v1079_v56, %v769_v50 }
  0xef   : > { %v373_v15 = vld [vmem:[#allocation2 + $0x60] sm:$0xff]  ;;  %v1756_v17 = vpack.c.bf16 %v1753_v11, %v387_v14  ;;  %v772_v46 = vpack.c.bf16 %v387_v14, %v1739_v6 }
  0xf0   : > { %v1758_v18 = vpack.c.bf16 %v374_v16, %v373_v15  ;;  %v669_v34 = vpack.c.bf16 %v373_v15, %v372_v8  ;;  %v562_v35 = vld [vmem:[#allocation2 + $0x62] sm:$0xff] }
  0xf1   : > { %1495 = vmatmul.mubr.msk.bf16.gmra.mxu1 %vm247_vm1, %v1756_v17  ;;  %v567_v38 = vpack.c.bf16 %v563_v37, %v562_v35  ;;  %v875_v49 = vpack.c.bf16 %v562_v35, %v561_v22  ;;  %v872_v51 = vld [vmem:[#allocation2 + $0x82] sm:$0xff] }
  0xf2   : > { %1505 = vmatmul.mubr.msk.bf16.gmra.mxu0 %vm247_vm1, %v1758_v18  ;;  %1510 = vmatprep.mubr.msk.bf16.mxu1 %vm247_vm1, %v564_v19  ;;  %v876_v53 = vpack.c.bf16 %v872_v51, %v563_v37  ;;  %v1186_v60 = vpack.c.bf16 %v1182_v59, %v872_v51 }
  0xf3   : > { %1520 = vmatprep.mubr.msk.bf16.mxu0 %vm247_vm1, %v667_v20 }
  0xf9   : > { %1511 = vmatmul.mubr.msk.bf16.vlgmr.msra.gmra.mxu1 %vm247_vm1, %v1772_v26 }
  0xfa   : > { %1521 = vmatmul.mubr.msk.bf16.vlgmr.msra.gmra.mxu0 %vm247_vm1, %v668_v27  ;;  %1529 = vmatpush3.bf16.msra.mxu1 %v790_v28 }
  0xfb   : > { %1514 = vmatprep.mubr.msk.bf16.mxu1 %vm247_vm1, %v566_v30  ;;  %1524 = vmatprep.mubr.msk.bf16.mxu0 %vm247_vm1, %v669_v34 }
  0xfc   : > { %1539 = vmatpush3.bf16.msra.mxu0 %v893_v31  ;;  %1585 = vmatprep.subr.msk.bf16.mxu1 %vm260_vm0, %v983_v32 }
  0xfd   : > { %1586 = vmatprep.subr.msk.bf16.mxu0 %vm260_vm0, %v1086_v33 }
 0x101   : > { %1515 = vmatmul.mubr.msk.bf16.gmra.mxu1 %vm247_vm1, %v567_v38 }
 0x102   : > { %1525 = vmatmul.mubr.msk.bf16.gmra.mxu0 %vm247_vm1, %v670_v39  ;;  %1530 = vmatprep.mubr.msk.bf16.mxu1 %vm247_vm1, %v770_v40 }
 0x103   : > { %1540 = vmatprep.mubr.msk.bf16.mxu0 %vm247_vm1, %v873_v41 }
 0x109   : > { %1531 = vmatmul.mubr.msk.bf16.vlgmr.msra.gmra.mxu1 %vm247_vm1, %v771_v43 }
 0x10a   : > { %1541 = vmatmul.mubr.msk.bf16.vlgmr.msra.gmra.mxu0 %vm247_vm1, %v874_v44  ;;  %1549 = vmatpush3.bf16.msra.mxu1 %v997_v45 }
 0x10b   : > { %1534 = vmatprep.mubr.msk.bf16.mxu1 %vm247_vm1, %v772_v46  ;;  %1544 = vmatprep.mubr.msk.bf16.mxu0 %vm247_vm1, %v875_v49 }
 0x10c   : > { %1559 = vmatpush3.bf16.msra.mxu0 %v1100_v47  ;;  %1587 = vmatprep.subr.msk.bf16.mxu1 %vm260_vm0, %v1189_v48 }
 0x111   : > { %1535 = vmatmul.mubr.msk.bf16.gmra.mxu1 %vm247_vm1, %v773_v52 }
 0x112   : > { %1545 = vmatmul.mubr.msk.bf16.gmra.mxu0 %vm247_vm1, %v876_v53  ;;  %1550 = vmatprep.mubr.msk.bf16.mxu1 %vm247_vm1, %v1730_v2 }
 0x113   : > { %1560 = vmatprep.mubr.msk.bf16.mxu0 %vm247_vm1, %v1728_v1 }
 0x119   : > { %1551 = vmatmul.mubr.msk.bf16.vlgmr.msra.gmra.mxu1 %vm247_vm1, %v1745_v10 }
 0x11a   : > { %1561 = vmatmul.mubr.msk.bf16.vlgmr.msra.gmra.mxu0 %vm247_vm1, %v1743_v9  ;;  %1569 = vmatpush3.bf16.msra.mxu1 %v1203_v54 }
 0x11b   : > { %1554 = vmatprep.mubr.msk.bf16.mxu1 %vm247_vm1, %v1758_v18  ;;  %1564 = vmatprep.mubr.msk.bf16.mxu0 %vm247_vm1, %v1756_v17 }
 0x121   : > { %1555 = vmatmul.mubr.msk.bf16.gmra.mxu1 %vm247_vm1, %v980_v57 }
 0x122   : > { %1565 = vmatmul.mubr.msk.bf16.gmra.mxu0 %vm247_vm1, %v1083_v58  ;;  %1570 = vmatprep.mubr.msk.bf16.mxu1 %vm247_vm1, %v1772_v26 }
 0x129   : > { %1571 = vmatmul.mubr.msk.bf16.vlgmr.msra.gmra.mxu1 %vm247_vm1, %v566_v30 }
 0x12a   : > { %1574 = vmatprep.mubr.msk.bf16.mxu1 %vm247_vm1, %v567_v38 }
 0x131   : > { %1575 = vmatmul.mubr.msk.bf16.gmra.mxu1 %vm247_vm1, %v1186_v60 }
 0x1a9   : > { %v1492_v61 = vpop.f32.mrf.mxu1 }
 0x1aa   : > { %v1502_v62 = vpop.f32.mrf.mxu0 }
 0x1ab   : > { %v445_v63 = vpop.f32.mrf.mxu1  ;;  %v534_v43 = vadd.f32 %v1502_v62, %v1492_v61 }
 0x1ac   : > { %v525_v0 = vpop.f32.mrf.mxu0 }
 0x1ad   : > { %v1493_v1 = vpop.f32.mrf.mxu1  ;;  %v526_v46 = vadd.f32 %v525_v0, %v445_v63 }
 0x1ae   : > { %v1503_v2 = vpop.f32.mrf.mxu0 }
 0x1af   : > { %v448_v3 = vpop.f32.mrf.mxu1  ;;  %v537_v50 = vadd.f32 %v1503_v2, %v1493_v1 }
 0x1b0   : > { %v528_v4 = vpop.f32.mrf.mxu0 }
 0x1b1   : > { %v1496_v5 = vpop.f32.mrf.mxu1  ;;  %v529_v53 = vadd.f32 %v528_v4, %v448_v3 }
 0x1b2   : > { %v1506_v6 = vpop.f32.mrf.mxu0 }
 0x1b3   : > { %v461_v7 = vpop.f32.mrf.mxu1  ;;  %v550_v56 = vadd.f32 %v1506_v6, %v1496_v5 }
 0x1b4   : > { %v541_v8 = vpop.f32.mrf.mxu0 }
 0x1b5   : > { %v1497_v9 = vpop.f32.mrf.mxu1  ;;  %v542_v61 = vadd.f32 %v541_v8, %v461_v7 }
 0x1b6   : > { %v1507_v10 = vpop.f32.mrf.mxu0 }
 0x1b7   : > { %v1825_v11 = vpop.f32.mrf.mxu1  ;;  %v553_v0 = vadd.f32 %v1507_v10, %v1497_v9 }
 0x1b8   : > { %v544_v12 = vpop.f32.mrf.mxu0 }
 0x1b9   : > { %v1512_v13 = vpop.f32.mrf.mxu1  ;;  %v545_v4 = vadd.f32 %v544_v12, %v1825_v11 }
 0x1ba   : > { %v1522_v14 = vpop.f32.mrf.mxu0  ;;  %v653_v47 = vadd.f32 %v1512_v13, %v534_v43 }
 0x1bb   : > { %v620_v15 = vpop.f32.mrf.mxu1 }
 0x1bc   : > { %v723_v16 = vpop.f32.mrf.mxu0  ;;  %v651_v51 = vadd.f32 %v620_v15, %v526_v46  ;;  %v756_v54 = vadd.f32 %v1522_v14, %v653_v47 }
 0x1bd   : > { %v1513_v17 = vpop.f32.mrf.mxu1 }
 0x1be   : > { %v1523_v18 = vpop.f32.mrf.mxu0  ;;  %v654_v55 = vadd.f32 %v1513_v17, %v537_v50  ;;  %v754_v59 = vadd.f32 %v723_v16, %v651_v51 }
 0x1bf   : > { %v623_v19 = vpop.f32.mrf.mxu1 }
 0x1c0   : > { %v726_v20 = vpop.f32.mrf.mxu0  ;;  %v652_v60 = vadd.f32 %v623_v19, %v529_v53 }
 0x1c1   : > { %v1516_v21 = vpop.f32.mrf.mxu1 }
 0x1c2   : > { %v1526_v22 = vpop.f32.mrf.mxu0  ;;  %v657_v62 = vadd.f32 %v1516_v21, %v550_v56  ;;  %v755_v2 = vadd.f32 %v726_v20, %v652_v60 }
 0x1c3   : > { %v636_v23 = vpop.f32.mrf.mxu1 }
 0x1c4   : > { %v739_v24 = vpop.f32.mrf.mxu0  ;;  %v655_v13 = vadd.f32 %v636_v23, %v542_v61  ;;  %v760_v5 = vadd.f32 %v1526_v22, %v657_v62 }
 0x1c5   : > { %v1517_v25 = vpop.f32.mrf.mxu1 }
 0x1c6   : > { %v1527_v26 = vpop.f32.mrf.mxu0  ;;  %v658_v6 = vadd.f32 %v1517_v25, %v553_v0  ;;  %v758_v7 = vadd.f32 %v739_v24, %v655_v13  ;;  %v1423_v24 = vld [vmem:[%s1873_s4] ss:$0 sm:$0xff] }
 0x1c7   : > { %v639_v27 = vpop.f32.mrf.mxu1 }
 0x1c8   : > { %v1827_v28 = vpop.f32.mrf.mxu0  ;;  %v656_v8 = vadd.f32 %v639_v27, %v545_v4  ;;  %v761_v23 = vadd.f32 %v1527_v26, %v658_v6 }
 0x1c9   : > { %v1532_v29 = vpop.f32.mrf.mxu1 }
 0x1ca   : > { %v1542_v30 = vpop.f32.mrf.mxu0  ;;  %v759_v11 = vadd.f32 %v1827_v28, %v656_v8 }
 0x1cb   : > { %v826_v31 = vpop.f32.mrf.mxu1 }
 0x1cc   : > { %v929_v32 = vpop.f32.mrf.mxu0  ;;  %v857_v63 = vadd.f32 %v826_v31, %v754_v59 }
 0x1cd   : > { %v1533_v33 = vpop.f32.mrf.mxu1 }
 0x1ce   : > { %v1543_v34 = vpop.f32.mrf.mxu0  ;;  %v960_v16 = vadd.f32 %v929_v32, %v857_v63 }
 0x1cf   : > { %v829_v35 = vpop.f32.mrf.mxu1 }
 0x1d0   : > { %v932_v36 = vpop.f32.mrf.mxu0  ;;  %v858_v17 = vadd.f32 %v829_v35, %v755_v2 }
 0x1d1   : > { %v1536_v37 = vpop.f32.mrf.mxu1 }
 0x1d2   : > { %v1546_v38 = vpop.f32.mrf.mxu0  ;;  %v863_v21 = vadd.f32 %v1536_v37, %v760_v5 }
 0x1d3   : > { %v842_v39 = vpop.f32.mrf.mxu1 }
 0x1d4   : > { %v1829_v40 = vpop.f32.mrf.mxu0  ;;  %v861_v31 = vadd.f32 %v842_v39, %v758_v7  ;;  %v966_v12 = vadd.f32 %v1546_v38, %v863_v21 }
 0x1d5   : > { %1875 = vst [vmem:[#allocation3_spill] sm:$0xff] %v1829_v40  ;;  %v1537_v41 = vpop.f32.mrf.mxu1 }
 0x1d6   : > { %v1831_v42 = vpop.f32.mrf.mxu0  ;;  %v864_v22 = vadd.f32 %v1537_v41, %v761_v23 }
 0x1d7   : > { %1876 = vst [vmem:[#allocation4_spill] sm:$0xff] %v1831_v42  ;;  %v845_v44 = vpop.f32.mrf.mxu1  ;;  %v859_v42 = vadd.f32 %v1532_v29, %v756_v54 }
 0x1d8   : > { %v1833_v45 = vpop.f32.mrf.mxu0  ;;  %v862_v39 = vadd.f32 %v845_v44, %v759_v11 }
 0x1d9   : > { %1877 = vst [vmem:[#allocation5_spill] sm:$0xff] %v1833_v45  ;;  %v1552_v48 = vpop.f32.mrf.mxu1  ;;  %v757_v45 = vadd.f32 %v1523_v18, %v654_v55  ;;  %v962_v15 = vadd.f32 %v1542_v30, %v859_v42  ;;  %v961_v30 = vadd.f32 %v932_v36, %v858_v17 }
 0x1da   : > { %v1562_v49 = vpop.f32.mrf.mxu0 }
 0x1db   : > { %v1033_v52 = vpop.f32.mrf.mxu1  ;;  %v860_v3 = vadd.f32 %v1533_v33, %v757_v45  ;;  %v1066_v19 = vadd.f32 %v1552_v48, %v962_v15 }
 0x1dc   : > { %v1136_v57 = vpop.f32.mrf.mxu0  ;;  %v1064_v10 = vadd.f32 %v1033_v52, %v960_v16  ;;  %v1878_v26 = vld [vmem:[#allocation3_spill] sm:$0xff] }
 0x1dd   : > { %v1553_v58 = vpop.f32.mrf.mxu1  ;;  %v963_v9 = vadd.f32 %v1543_v34, %v860_v3  ;;  %v1169_v33 = vadd.f32 %v1562_v49, %v1066_v19  ;;  %v964_v37 = vadd.f32 %v1878_v26, %v861_v31 }
 0x1de   : > { %v1563_v43 = vpop.f32.mrf.mxu0  ;;  %v1167_v27 = vadd.f32 %v1136_v57, %v1064_v10  ;;  %v1879_v38 = vld [vmem:[#allocation4_spill] sm:$0xff] }
 0x1df   : > { %v1036_v40 = vpop.f32.mrf.mxu1  ;;  %v1067_v42 = vadd.f32 %v1553_v58, %v963_v9  ;;  %v967_v41 = vadd.f32 %v1879_v38, %v864_v22 }
 0x1e0   : > { %v1139_v18 = vpop.f32.mrf.mxu0  ;;  %v1065_v34 = vadd.f32 %v1036_v40, %v961_v30  ;;  %v1880_v53 = vld [vmem:[#allocation5_spill] sm:$0xff] }
 0x1e1   : > { %v1556_v1 = vpop.f32.mrf.mxu1  ;;  %v1170_v46 = vadd.f32 %v1563_v43, %v1067_v42  ;;  %v965_v54 = vadd.f32 %v1880_v53, %v862_v39 }
 0x1e2   : > { %v1566_v25 = vpop.f32.mrf.mxu0  ;;  %v1070_v36 = vadd.f32 %v1556_v1, %v966_v12  ;;  %v1168_v50 = vadd.f32 %v1139_v18, %v1065_v34 }
 0x1e3   : > { %v1049_v14 = vpop.f32.mrf.mxu1 }
 0x1e4   : > { %v1068_v48 = vadd.f32 %v1049_v14, %v964_v37  ;;  %v1152_v40 = vpop.f32.mrf.mxu0  ;;  %v1173_v55 = vadd.f32 %v1566_v25, %v1070_v36 }
 0x1e5   : > { %v1557_v29 = vpop.f32.mrf.mxu1 }
 0x1e6   : > { %v1071_v57 = vadd.f32 %v1557_v29, %v967_v41  ;;  %v1171_v61 = vadd.f32 %v1152_v40, %v1068_v48  ;;  %v1567_v62 = vpop.f32.mrf.mxu0 }
 0x1e7   : > { %v1052_v20 = vpop.f32.mrf.mxu1 }
 0x1e8   : > { %v1069_v0 = vadd.f32 %v1052_v20, %v965_v54  ;;  %v1174_v15 = vadd.f32 %v1567_v62, %v1071_v57  ;;  %v1155_v6 = vpop.f32.mrf.mxu0 }
 0x1e9   : > { %v1572_v32 = vpop.f32.mrf.mxu1 }
 0x1ea   : > { %v1272_v35 = vadd.f32 %v1572_v32, %v1169_v33  ;;  %v1172_v16 = vadd.f32 %v1155_v6, %v1069_v0 }
 0x1eb   : > { %v1239_v45 = vpop.f32.mrf.mxu1 }
 0x1ec   : > { %v1287_v47 = vadd.f32 %v1423_v24, %v1272_v35  ;;  %v1270_v28 = vadd.f32 %v1239_v45, %v1167_v27 }
 0x1ed   : > { %v1573_v49 = vpop.f32.mrf.mxu1 }
 0x1ee   : > { %v1295_v44 = vmax.f32 %v1287_v47, 0.0  ;;  %v1285_v51 = vadd.f32 %v1423_v24, %v1270_v28  ;;  %v1273_v52 = vadd.f32 %v1573_v49, %v1170_v46 }
 0x1ef   : > { %v1242_v56 = vpop.f32.mrf.mxu1 }
 0x1f0   : > { %1304 = vst.msk [vmem:[%s1846_s28 + $0x10] sm:$0xff] %vm1301_vm3, %v1295_v44  ;;  %v1293_v58 = vmax.f32 %v1285_v51, 0.0  ;;  %v1288_v59 = vadd.f32 %v1423_v24, %v1273_v52  ;;  %v1271_v60 = vadd.f32 %v1242_v56, %v1168_v50 }
 0x1f1   : > { %v1576_v63 = vpop.f32.mrf.mxu1 }
 0x1f2   : > { %1302 = vst.msk [vmem:[%s1846_s28] sm:$0xff] %vm1301_vm3, %v1293_v58  ;;  %v1296_v13 = vmax.f32 %v1288_v59, 0.0  ;;  %v1286_v43 = vadd.f32 %v1423_v24, %v1271_v60  ;;  %v1276_v1 = vadd.f32 %v1576_v63, %v1173_v55 }
 0x1f3   : > { %v1255_v2 = vpop.f32.mrf.mxu1 }
 0x1f4   : > { %1305 = vst.msk [vmem:[%s1846_s28 + $0x18] sm:$0xff] %vm1301_vm3, %v1296_v13  ;;  %v1294_v3 = vmax.f32 %v1286_v43, 0.0  ;;  %v1291_v4 = vadd.f32 %v1423_v24, %v1276_v1  ;;  %v1274_v5 = vadd.f32 %v1255_v2, %v1171_v61 }
 0x1f5   : > { %v1577_v14 = vpop.f32.mrf.mxu1 }
 0x1f6   : > { %1303 = vst.msk [vmem:[%s1846_s28 + $0x8] sm:$0xff] %vm1301_vm3, %v1294_v3  ;;  %v1299_v17 = vmax.f32 %v1291_v4, 0.0  ;;  %v1289_v19 = vadd.f32 %v1423_v24, %v1274_v5  ;;  %v1277_v7 = vadd.f32 %v1577_v14, %v1174_v15 }
 0x1f7   : > { %v1258_v8 = vpop.f32.mrf.mxu1 }
 0x1f8   : > { %1308 = vst.msk [vmem:[%s1846_s28 + $0x30] sm:$0xff] %vm1301_vm3, %v1299_v17  ;;  %v1297_v21 = vmax.f32 %v1289_v19, 0.0  ;;  %v1292_v18 = vadd.f32 %v1423_v24, %v1277_v7  ;;  %v1275_v29 = vadd.f32 %v1258_v8, %v1172_v16 }
 0x1fa   : > { %1306 = vst.msk [vmem:[%s1846_s28 + $0x20] sm:$0xff] %vm1301_vm3, %v1297_v21  ;;  %v1300_v9 = vmax.f32 %v1292_v18, 0.0  ;;  %v1290_v10 = vadd.f32 %v1423_v24, %v1275_v29 }
 0x1fc   : > { %1309 = vst.msk [vmem:[%s1846_s28 + $0x38] sm:$0xff] %vm1301_vm3, %v1300_v9  ;;  %v1298_v23 = vmax.f32 %v1290_v10, 0.0 }
 0x1fe   : > { %1307 = vst.msk [vmem:[%s1846_s28 + $0x28] sm:$0xff] %vm1301_vm3, %v1298_v23 }
 0x1ff PF: > { %s15_s18 = sadd.s32 1, %s1603_s18  }
 0x200   : > { %p12_p4 = scmp.ge.s32.totalorder %s15_s18, 4  }
 0x202   :  { %14 = sbr.rel (!%p12_p4) target bundleno = 1 (0x1), region = 80 }

// kernel: multihead_dense_block.11
= control target key start
LH: loop header
LB: loop body
LE: loop exit
PB: predicated region body
PF: predicated region fallthrough
CT: control target
= control target key end

     0   :  { %s1654_s18 = smov 0   ;;  %s1917_s0 = inlined_call_operand.vmem [shape: f32[2,8,8,12], index: 0, kind: input, shape index: {}]   ;;  %s1918_s1 = inlined_call_operand.vmem [shape: f32[12,12], index: 1, kind: input, shape index: {}]   ;;  %s1919_s2 = inlined_call_operand.vmem [shape: f32[1,12], index: 2, kind: input, shape index: {}]   ;;  %s1920_s3 = inlined_call_operand.vmem [shape: f32[9,12,4], index: 3, kind: input, shape index: {}]   ;;  %s1921_s4 = inlined_call_operand.vmem [shape: f32[1,4], index: 4, kind: input, shape index: {}]   ;;  %s1922_s5 = inlined_call_operand.vmem [shape: f32[2,8,8,4], index: 5, kind: output, shape index: {}]  }
   0x1 LB: > { %s1375_s19 = sadd.s32 4294967295, %s1621_s18   ;;  %p1379_p0 = scmp.ge.s32.totalorder %s1621_s18, 1  ;;  %s1621_s18 = sphi %s1654_s18, %s15_s18  }
   0x2   : > { %p187_p1 = scmp.lt.s32.totalorder %s1621_s18, 3 }
   0x4   : > { %p188_p2 = pnand %p1379_p0, %p187_p1 }
   0x6   : > { %191 = sbr.rel (%p188_p2) target bundleno = 511 (0x1ff), region = 40 }
   0xb   : > { %v238_v0 = vld [vmem:[%s1918_s1] sm:$0xff]  ;;  %v239_v1 = vld [vmem:[%s1918_s1 + $0x8] sm:$0xf]  ;;  %vm261_vm0 = vcmask 1045504   ;;  %p215_p3 = scmp.lt.s32.totalorder %s1375_s19, 1  ;;  %vm248_vm1 = vcmask 97280  }
   0xc   : > { %v240_v2 = vpack.c.bf16 %v239_v1, %v238_v0  ;;  %vm339_vm2 = vcmask 91136   ;;  %v1623_v16 = vmov 0.0   ;;  %v1389_v17 = vld [vmem:[%s1920_s3 + $0x10] sm:$0xff]  ;;  %v1390_v18 = vld [vmem:[%s1920_s3 + $0x18] sm:$0xf]  ;;  %v380_v20 = vld [vmem:[%s1920_s3] sm:$0xff] }
   0xd   : > { %s1930_s19 = smov (!%p215_p3, %s1375_s19), 1  ;;  %345 = vst.msk [vmem:[#allocation2 + $0x30] sm:$0xff] %vm248_vm1, %v1623_v16  ;;  %338 = vst.msk [vmem:[#allocation2] sm:$0xff] %vm248_vm1, %v1623_v16  ;;  %v398_v19 = vpack.c.bf16 %v1390_v18, %v1389_v17  ;;  %v381_v21 = vld [vmem:[%s1920_s3 + $0x8] sm:$0xf]  ;;  %v1399_v25 = vld [vmem:[%s1920_s3 + $0x20] sm:$0xff] }
   0xe   : > { %1596 = vmatprep.subr.msk.bf16.mxu0 %vm261_vm0, %v240_v2  ;;  %v263_v3 = vsel %vm261_vm0, %v240_v2, 0  ;;  %s1444_s24 = sshll.u32 %s1930_s19, 6  ;;  %346 = vst.msk [vmem:[#allocation2 + $0x38] sm:$0x3] %vm339_vm2, %v1623_v16  ;;  %340 = vst.msk [vmem:[#allocation2 + $0x8] sm:$0x3] %vm339_vm2, %v1623_v16  ;;  %v382_v22 = vpack.c.bf16 %v381_v21, %v380_v20 }
   0xf   : > { %1497 = vmatpush3.bf16.msra.mxu0 %v263_v3  ;;  %s219_s27 = scalar_lea.vmem %s1917_s0, %s1444_s24  ;;  %341 = vst.msk [vmem:[#allocation2 + $0x10] sm:$0xff] %vm248_vm1, %v1623_v16  ;;  %343 = vst.msk [vmem:[#allocation2 + $0x20] sm:$0xff] %vm248_vm1, %v1623_v16  ;;  %1597 = vmatprep.subr.msk.bf16.mxu1 %vm261_vm0, %v398_v19  ;;  %v412_v23 = vsel %vm261_vm0, %v398_v19, 0  ;;  %v1400_v26 = vld [vmem:[%s1920_s3 + $0x28] sm:$0xf]  ;;  %v1405_v28 = vld [vmem:[%s1920_s3 + $0x30] sm:$0xff]  ;;  %s1894_s26 = scalar_lea.vmem %s1922_s5, %s1444_s24 }
  0x10   : > { %v226_v4 = vld [vmem:[%s219_s27] sm:$0xff]  ;;  %v227_v5 = vld [vmem:[%s219_s27 + $0x8] sm:$0xff]  ;;  %v228_v6 = vld [vmem:[%s219_s27 + $0x10] sm:$0xff]  ;;  %342 = vst.msk [vmem:[#allocation2 + $0x18] sm:$0x3] %vm339_vm2, %v1623_v16  ;;  %1507 = vmatpush3.bf16.msra.mxu1 %v412_v23  ;;  %1598 = vmatprep.subr.msk.bf16.mxu0 %vm261_vm0, %v382_v22  ;;  %v492_v24 = vsel %vm261_vm0, %v382_v22, 0  ;;  %v574_v27 = vpack.c.bf16 %v1400_v26, %v1399_v25 }
  0x11   : > { %v234_v7 = vpack.c.bf16 %v227_v5, %v226_v4  ;;  %v229_v8 = vld [vmem:[%s219_s27 + $0x18] sm:$0xff]  ;;  %v230_v9 = vld [vmem:[%s219_s27 + $0x20] sm:$0xff]  ;;  %v231_v10 = vld [vmem:[%s219_s27 + $0x28] sm:$0xff]  ;;  %344 = vst.msk [vmem:[#allocation2 + $0x28] sm:$0x3] %vm339_vm2, %v1623_v16  ;;  %vm1311_vm3 = vcmask 31744  }
  0x12   : > { %v235_v11 = vpack.c.bf16 %v229_v8, %v228_v6  ;;  %v236_v12 = vpack.c.bf16 %v231_v10, %v230_v9  ;;  %v232_v13 = vld [vmem:[%s219_s27 + $0x30] sm:$0xff]  ;;  %v233_v14 = vld [vmem:[%s219_s27 + $0x38] sm:$0xff]  ;;  %347 = vst.msk [vmem:[#allocation2 + $0x40] sm:$0xff] %vm248_vm1, %v1623_v16  ;;  %349 = vst.msk [vmem:[#allocation2 + $0x50] sm:$0xff] %vm248_vm1, %v1623_v16  ;;  %1599 = vmatprep.subr.msk.bf16.mxu1 %vm261_vm0, %v574_v27  ;;  %v588_v6 = vsel %vm261_vm0, %v574_v27, 0 }
  0x13   : > { %1498 = vmatprep.mubr.msk.bf16.mxu0 %vm248_vm1, %v234_v7  ;;  %v237_v15 = vpack.c.bf16 %v233_v14, %v232_v13  ;;  %348 = vst.msk [vmem:[#allocation2 + $0x48] sm:$0x3] %vm339_vm2, %v1623_v16  ;;  %350 = vst.msk [vmem:[#allocation2 + $0x58] sm:$0x3] %vm339_vm2, %v1623_v16  ;;  %v1406_v29 = vld [vmem:[%s1920_s3 + $0x38] sm:$0xf] }
  0x14   : > { %1499 = vmatmul.mubr.msk.bf16.vlgmr.msra.gmra.mxu0 %vm248_vm1, %v235_v11  ;;  %351 = vst.msk [vmem:[#allocation2 + $0x60] sm:$0xff] %vm248_vm1, %v1623_v16  ;;  %353 = vst.msk [vmem:[#allocation2 + $0x70] sm:$0xff] %vm248_vm1, %v1623_v16  ;;  %v678_v30 = vpack.c.bf16 %v1406_v29, %v1405_v28  ;;  %v1384_v31 = vld [vmem:[%s1919_s2] ss:$0 sm:$0xff]  ;;  %v1412_v62 = vld [vmem:[%s1920_s3 + $0x48] sm:$0xf] }
  0x15   : > { %1502 = vmatprep.mubr.msk.bf16.mxu0 %vm248_vm1, %v236_v12  ;;  %352 = vst.msk [vmem:[#allocation2 + $0x68] sm:$0x3] %vm339_vm2, %v1623_v16  ;;  %354 = vst.msk [vmem:[#allocation2 + $0x78] sm:$0x3] %vm339_vm2, %v1623_v16  ;;  %1517 = vmatpush3.bf16.msra.mxu0 %v492_v24  ;;  %v383_v50 = vld [vmem:[#allocation2 + $0x1] sm:$0xff]  ;;  %v1417_v63 = vld [vmem:[%s1920_s3 + $0x50] sm:$0xff] }
  0x16   : > { %355 = vst.msk [vmem:[#allocation2 + $0x80] sm:$0xff] %vm248_vm1, %v1623_v16  ;;  %357 = vst.msk [vmem:[#allocation2 + $0x90] sm:$0xff] %vm248_vm1, %v1623_v16  ;;  %1600 = vmatprep.subr.msk.bf16.mxu0 %vm261_vm0, %v678_v30  ;;  %v368_v51 = vld [vmem:[#allocation2] sm:$0xff]  ;;  %v1418_v0 = vld [vmem:[%s1920_s3 + $0x58] sm:$0xf]  ;;  %v692_v10 = vsel %vm261_vm0, %v678_v30, 0 }
  0x17   : > { %356 = vst.msk [vmem:[#allocation2 + $0x88] sm:$0x3] %vm339_vm2, %v1623_v16  ;;  %358 = vst.msk [vmem:[#allocation2 + $0x98] sm:$0x3] %vm339_vm2, %v1623_v16  ;;  %v1411_v61 = vld [vmem:[%s1920_s3 + $0x40] sm:$0xff]  ;;  %v886_v11 = vpack.c.bf16 %v1418_v0, %v1417_v63 }
  0x18   : > { %v782_v7 = vpack.c.bf16 %v1412_v62, %v1411_v61  ;;  %v559_v19 = vld [vmem:[#allocation2 + $0x2] sm:$0xff] }
  0x19   : > { %v1423_v29 = vld [vmem:[%s1920_s3 + $0x60] sm:$0xff]  ;;  %v1424_v30 = vld [vmem:[%s1920_s3 + $0x68] sm:$0xf] }
  0x1c   : > { %1503 = vmatmul.mubr.msk.bf16.gmra.mxu0 %vm248_vm1, %v237_v15 }
  0xd4   : > { %v1500_v32 = vpop.f32.mrf.mxu0 }
  0xd5   : > { %v308_v33 = vadd.f32 %v1500_v32, %v1384_v31  ;;  %v1429_v32 = vld [vmem:[%s1920_s3 + $0x70] sm:$0xff] }
  0xd6   : > { %v299_v34 = vpop.f32.mrf.mxu0 }
  0xd7   : > { %v332_v35 = vmax.f32 %v308_v33, 0.0  ;;  %v300_v36 = vadd.f32 %v1384_v31, %v299_v34  ;;  %v1430_v33 = vld [vmem:[%s1920_s3 + $0x78] sm:$0xf] }
  0xd8   : > { %v1501_v37 = vpop.f32.mrf.mxu0 }
  0xd9   : > { %362 = vst.msk [vmem:[#allocation2 + $0x31] sm:$0xff] %vm248_vm1, %v332_v35  ;;  %v330_v38 = vmax.f32 %v300_v36, 0.0  ;;  %v311_v39 = vadd.f32 %v1501_v37, %v1384_v31  ;;  %v796_v37 = vsel %vm261_vm0, %v782_v7, 0 }
  0xda   : > { %v302_v40 = vpop.f32.mrf.mxu0 }
  0xdb   : > { %360 = vst.msk [vmem:[#allocation2 + $0x11] sm:$0xff] %vm248_vm1, %v330_v38  ;;  %v333_v41 = vmax.f32 %v311_v39, 0.0  ;;  %v303_v42 = vadd.f32 %v1384_v31, %v302_v40  ;;  %v900_v40 = vsel %vm261_vm0, %v886_v11, 0 }
  0xdc   : > { %v1504_v43 = vpop.f32.mrf.mxu0 }
  0xdd   : > { %363 = vst.msk [vmem:[#allocation2 + $0x41] sm:$0xff] %vm248_vm1, %v333_v41  ;;  %v331_v44 = vmax.f32 %v303_v42, 0.0  ;;  %v324_v45 = vadd.f32 %v1504_v43, %v1384_v31  ;;  %v991_v41 = vpack.c.bf16 %v1424_v30, %v1423_v29  ;;  %v1095_v42 = vpack.c.bf16 %v1430_v33, %v1429_v32 }
  0xde   : > { %v315_v46 = vpop.f32.mrf.mxu0 }
  0xdf   : > { %361 = vst.msk [vmem:[#allocation2 + $0x21] sm:$0xff] %vm248_vm1, %v331_v44  ;;  %v336_v47 = vmax.f32 %v324_v45, 0.0  ;;  %v316_v48 = vadd.f32 %v1384_v31, %v315_v46 }
  0xe0   : > { %v1505_v49 = vpop.f32.mrf.mxu0  ;;  %v1759_v2 = vld [vmem:[#allocation2 + $0x31] sm:$0xff] }
  0xe1   : > { %366 = vst.msk [vmem:[#allocation2 + $0x71] sm:$0xff] %vm248_vm1, %v336_v47  ;;  %v334_v52 = vmax.f32 %v316_v48, 0.0  ;;  %v327_v53 = vadd.f32 %v1505_v49, %v1384_v31  ;;  %v371_v5 = vld [vmem:[#allocation2 + $0x30] sm:$0xff] }
  0xe2   : > { %v318_v54 = vpop.f32.mrf.mxu0  ;;  %v1740_v55 = vld [vmem:[#allocation2 + $0x11] sm:$0xff] }
  0xe3   : > { %v369_v56 = vld [vmem:[#allocation2 + $0x10] sm:$0xff]  ;;  %364 = vst.msk [vmem:[#allocation2 + $0x51] sm:$0xff] %vm248_vm1, %v334_v52  ;;  %v337_v57 = vmax.f32 %v327_v53, 0.0  ;;  %v319_v58 = vadd.f32 %v1384_v31, %v318_v54  ;;  %v391_v59 = vpack.c.bf16 %v1740_v55, %v383_v50  ;;  %v1436_v52 = vld [vmem:[%s1920_s3 + $0x88] sm:$0xf] }
  0xe4   : > { %v376_v60 = vpack.c.bf16 %v369_v56, %v368_v51  ;;  %v1776_v12 = vld [vmem:[#allocation2 + $0x41] sm:$0xff]  ;;  %v560_v20 = vld [vmem:[#allocation2 + $0x12] sm:$0xff] }
  0xe5   : > { %367 = vst.msk [vmem:[#allocation2 + $0x81] sm:$0xff] %vm248_vm1, %v337_v57  ;;  %v335_v1 = vmax.f32 %v319_v58, 0.0  ;;  %1508 = vmatprep.mubr.msk.bf16.mxu1 %vm248_vm1, %v391_v59  ;;  %v372_v14 = vld [vmem:[#allocation2 + $0x40] sm:$0xff]  ;;  %v567_v26 = vpack.c.bf16 %v560_v20, %v559_v19  ;;  %v562_v34 = vld [vmem:[#allocation2 + $0x32] sm:$0xff]  ;;  %v776_v53 = vpack.c.bf16 %v1776_v12, %v1759_v2  ;;  %v1109_v57 = vsel %vm261_vm0, %v1095_v42, 0 }
  0xe6   : > { %1518 = vmatprep.mubr.msk.bf16.mxu0 %vm248_vm1, %v376_v60  ;;  %v1761_v3 = vld [vmem:[#allocation2 + $0x21] sm:$0xff]  ;;  %v672_v36 = vpack.c.bf16 %v372_v14, %v371_v5 }
  0xe7   : > { %v370_v4 = vld [vmem:[#allocation2 + $0x20] sm:$0xff]  ;;  %365 = vst.msk [vmem:[#allocation2 + $0x61] sm:$0xff] %vm248_vm1, %v335_v1  ;;  %v1767_v8 = vpack.c.bf16 %v1759_v2, %v1761_v3  ;;  %v775_v49 = vpack.c.bf16 %v1761_v3, %v1740_v55  ;;  %v1005_v55 = vsel %vm261_vm0, %v991_v41, 0  ;;  %v983_v1 = vld [vmem:[#allocation2 + $0x90] sm:$0xff] }
  0xe8   : > { %v1769_v9 = vpack.c.bf16 %v371_v5, %v370_v4  ;;  %v1792_v18 = vld [vmem:[#allocation2 + $0x71] sm:$0xff]  ;;  %v671_v27 = vpack.c.bf16 %v370_v4, %v369_v56  ;;  %v561_v28 = vld [vmem:[#allocation2 + $0x22] sm:$0xff] }
  0xe9   : > { %1509 = vmatmul.mubr.msk.bf16.vlgmr.msra.gmra.mxu1 %vm248_vm1, %v1767_v8  ;;  %v375_v23 = vld [vmem:[#allocation2 + $0x70] sm:$0xff]  ;;  %v1817_v35 = vpack.c.bf16 %v562_v34, %v561_v28  ;;  %v563_v38 = vld [vmem:[#allocation2 + $0x42] sm:$0xff]  ;;  %v879_v50 = vpack.c.bf16 %v561_v28, %v560_v20 }
  0xea   : > { %1519 = vmatmul.mubr.msk.bf16.vlgmr.msra.gmra.mxu0 %vm248_vm1, %v1769_v9  ;;  %1527 = vmatpush3.bf16.msra.mxu1 %v588_v6  ;;  %v1778_v13 = vld [vmem:[#allocation2 + $0x51] sm:$0xff]  ;;  %v1435_v51 = vld [vmem:[%s1920_s3 + $0x80] sm:$0xff]  ;;  %v880_v54 = vpack.c.bf16 %v563_v38, %v562_v34 }
  0xeb   : > { %v373_v15 = vld [vmem:[#allocation2 + $0x50] sm:$0xff]  ;;  %1537 = vmatpush3.bf16.msra.mxu0 %v692_v10  ;;  %v1782_v16 = vpack.c.bf16 %v1778_v13, %v1776_v12  ;;  %1601 = vmatprep.subr.msk.bf16.mxu1 %vm261_vm0, %v782_v7  ;;  %v1199_v58 = vpack.c.bf16 %v1436_v52, %v1435_v51 }
  0xec   : > { %v1784_v17 = vpack.c.bf16 %v373_v15, %v372_v14  ;;  %1602 = vmatprep.subr.msk.bf16.mxu0 %vm261_vm0, %v886_v11  ;;  %v564_v31 = vld [vmem:[#allocation2 + $0x52] sm:$0xff]  ;;  %v670_v45 = vld [vmem:[#allocation2 + $0x80] sm:$0xff] }
  0xed   : > { %1512 = vmatprep.mubr.msk.bf16.mxu1 %vm248_vm1, %v1782_v16  ;;  %v569_v39 = vpack.c.bf16 %v564_v31, %v563_v38  ;;  %v566_v46 = vld [vmem:[#allocation2 + $0x72] sm:$0xff]  ;;  %v674_v48 = vpack.c.bf16 %v670_v45, %v375_v23  ;;  %v774_v60 = vld [vmem:[#allocation2 + $0x81] sm:$0xff]  ;;  %v1213_v0 = vsel %vm261_vm0, %v1199_v58, 0  ;;  %v987_v3 = vpack.c.bf16 %v983_v1, %v670_v45 }
  0xee   : > { %1522 = vmatprep.mubr.msk.bf16.mxu0 %vm248_vm1, %v1784_v17  ;;  %v389_v21 = vld [vmem:[#allocation2 + $0x61] sm:$0xff]  ;;  %v778_v62 = vpack.c.bf16 %v774_v60, %v1792_v18  ;;  %v1087_v2 = vld [vmem:[#allocation2 + $0x91] sm:$0xff] }
  0xef   : > { %v374_v22 = vld [vmem:[#allocation2 + $0x60] sm:$0xff]  ;;  %v1795_v24 = vpack.c.bf16 %v1792_v18, %v389_v21  ;;  %v777_v56 = vpack.c.bf16 %v389_v21, %v1778_v13  ;;  %v1091_v4 = vpack.c.bf16 %v1087_v2, %v774_v60  ;;  %v1191_v5 = vld [vmem:[#allocation2 + $0x92] sm:$0xff] }
  0xf0   : > { %v1797_v25 = vpack.c.bf16 %v375_v23, %v374_v22  ;;  %v673_v43 = vpack.c.bf16 %v374_v22, %v373_v15  ;;  %v565_v44 = vld [vmem:[#allocation2 + $0x62] sm:$0xff] }
  0xf1   : > { %1513 = vmatmul.mubr.msk.bf16.gmra.mxu1 %vm248_vm1, %v1795_v24  ;;  %v570_v47 = vpack.c.bf16 %v566_v46, %v565_v44  ;;  %v881_v59 = vpack.c.bf16 %v565_v44, %v564_v31  ;;  %v878_v61 = vld [vmem:[#allocation2 + $0x82] sm:$0xff] }
  0xf2   : > { %1523 = vmatmul.mubr.msk.bf16.gmra.mxu0 %vm248_vm1, %v1797_v25  ;;  %1528 = vmatprep.mubr.msk.bf16.mxu1 %vm248_vm1, %v567_v26  ;;  %v882_v63 = vpack.c.bf16 %v878_v61, %v566_v46  ;;  %v1195_v6 = vpack.c.bf16 %v1191_v5, %v878_v61 }
  0xf3   : > { %1538 = vmatprep.mubr.msk.bf16.mxu0 %vm248_vm1, %v671_v27 }
  0xf9   : > { %1529 = vmatmul.mubr.msk.bf16.vlgmr.msra.gmra.mxu1 %vm248_vm1, %v1817_v35 }
  0xfa   : > { %1539 = vmatmul.mubr.msk.bf16.vlgmr.msra.gmra.mxu0 %vm248_vm1, %v672_v36  ;;  %1547 = vmatpush3.bf16.msra.mxu1 %v796_v37 }
  0xfb   : > { %1532 = vmatprep.mubr.msk.bf16.mxu1 %vm248_vm1, %v569_v39  ;;  %1542 = vmatprep.mubr.msk.bf16.mxu0 %vm248_vm1, %v673_v43 }
  0xfc   : > { %1557 = vmatpush3.bf16.msra.mxu0 %v900_v40  ;;  %1603 = vmatprep.subr.msk.bf16.mxu1 %vm261_vm0, %v991_v41 }
  0xfd   : > { %1604 = vmatprep.subr.msk.bf16.mxu0 %vm261_vm0, %v1095_v42 }
 0x101   : > { %1533 = vmatmul.mubr.msk.bf16.gmra.mxu1 %vm248_vm1, %v570_v47 }
 0x102   : > { %1543 = vmatmul.mubr.msk.bf16.gmra.mxu0 %vm248_vm1, %v674_v48  ;;  %1548 = vmatprep.mubr.msk.bf16.mxu1 %vm248_vm1, %v775_v49 }
 0x103   : > { %1558 = vmatprep.mubr.msk.bf16.mxu0 %vm248_vm1, %v879_v50 }
 0x109   : > { %1549 = vmatmul.mubr.msk.bf16.vlgmr.msra.gmra.mxu1 %vm248_vm1, %v776_v53 }
 0x10a   : > { %1559 = vmatmul.mubr.msk.bf16.vlgmr.msra.gmra.mxu0 %vm248_vm1, %v880_v54  ;;  %1567 = vmatpush3.bf16.msra.mxu1 %v1005_v55 }
 0x10b   : > { %1552 = vmatprep.mubr.msk.bf16.mxu1 %vm248_vm1, %v777_v56  ;;  %1562 = vmatprep.mubr.msk.bf16.mxu0 %vm248_vm1, %v881_v59 }
 0x10c   : > { %1577 = vmatpush3.bf16.msra.mxu0 %v1109_v57  ;;  %1605 = vmatprep.subr.msk.bf16.mxu1 %vm261_vm0, %v1199_v58 }
 0x111   : > { %1553 = vmatmul.mubr.msk.bf16.gmra.mxu1 %vm248_vm1, %v778_v62 }
 0x112   : > { %1563 = vmatmul.mubr.msk.bf16.gmra.mxu0 %vm248_vm1, %v882_v63  ;;  %1568 = vmatprep.mubr.msk.bf16.mxu1 %vm248_vm1, %v1769_v9 }
 0x113   : > { %1578 = vmatprep.mubr.msk.bf16.mxu0 %vm248_vm1, %v1767_v8 }
 0x119   : > { %1569 = vmatmul.mubr.msk.bf16.vlgmr.msra.gmra.mxu1 %vm248_vm1, %v1784_v17 }
 0x11a   : > { %1579 = vmatmul.mubr.msk.bf16.vlgmr.msra.gmra.mxu0 %vm248_vm1, %v1782_v16  ;;  %1587 = vmatpush3.bf16.msra.mxu1 %v1213_v0 }
 0x11b   : > { %1572 = vmatprep.mubr.msk.bf16.mxu1 %vm248_vm1, %v1797_v25  ;;  %1582 = vmatprep.mubr.msk.bf16.mxu0 %vm248_vm1, %v1795_v24 }
 0x121   : > { %1573 = vmatmul.mubr.msk.bf16.gmra.mxu1 %vm248_vm1, %v987_v3 }
 0x122   : > { %1583 = vmatmul.mubr.msk.bf16.gmra.mxu0 %vm248_vm1, %v1091_v4  ;;  %1588 = vmatprep.mubr.msk.bf16.mxu1 %vm248_vm1, %v1817_v35 }
 0x129   : > { %1589 = vmatmul.mubr.msk.bf16.vlgmr.msra.gmra.mxu1 %vm248_vm1, %v569_v39 }
 0x12a   : > { %1592 = vmatprep.mubr.msk.bf16.mxu1 %vm248_vm1, %v570_v47 }
 0x131   : > { %1593 = vmatmul.mubr.msk.bf16.gmra.mxu1 %vm248_vm1, %v1195_v6 }
 0x1a9   : > { %v1510_v7 = vpop.f32.mrf.mxu1 }
 0x1aa   : > { %v1520_v8 = vpop.f32.mrf.mxu0 }
 0x1ab   : > { %v448_v9 = vpop.f32.mrf.mxu1  ;;  %v537_v53 = vadd.f32 %v1520_v8, %v1510_v7 }
 0x1ac   : > { %v528_v10 = vpop.f32.mrf.mxu0 }
 0x1ad   : > { %v1511_v11 = vpop.f32.mrf.mxu1  ;;  %v529_v56 = vadd.f32 %v528_v10, %v448_v9 }
 0x1ae   : > { %v1521_v12 = vpop.f32.mrf.mxu0 }
 0x1af   : > { %v451_v13 = vpop.f32.mrf.mxu1  ;;  %v540_v60 = vadd.f32 %v1521_v12, %v1511_v11 }
 0x1b0   : > { %v531_v14 = vpop.f32.mrf.mxu0 }
 0x1b1   : > { %v1514_v15 = vpop.f32.mrf.mxu1  ;;  %v532_v63 = vadd.f32 %v531_v14, %v451_v13 }
 0x1b2   : > { %v1524_v16 = vpop.f32.mrf.mxu0 }
 0x1b3   : > { %v464_v17 = vpop.f32.mrf.mxu1  ;;  %v553_v2 = vadd.f32 %v1524_v16, %v1514_v15 }
 0x1b4   : > { %v544_v18 = vpop.f32.mrf.mxu0 }
 0x1b5   : > { %v1515_v19 = vpop.f32.mrf.mxu1  ;;  %v545_v7 = vadd.f32 %v544_v18, %v464_v17 }
 0x1b6   : > { %v1525_v20 = vpop.f32.mrf.mxu0 }
 0x1b7   : > { %v1873_v21 = vpop.f32.mrf.mxu1  ;;  %v556_v10 = vadd.f32 %v1525_v20, %v1515_v19 }
 0x1b8   : > { %v547_v22 = vpop.f32.mrf.mxu0 }
 0x1b9   : > { %v1530_v23 = vpop.f32.mrf.mxu1  ;;  %v548_v14 = vadd.f32 %v547_v22, %v1873_v21 }
 0x1ba   : > { %v1540_v24 = vpop.f32.mrf.mxu0  ;;  %v657_v57 = vadd.f32 %v1530_v23, %v537_v53 }
 0x1bb   : > { %v624_v25 = vpop.f32.mrf.mxu1 }
 0x1bc   : > { %v728_v26 = vpop.f32.mrf.mxu0  ;;  %v655_v61 = vadd.f32 %v624_v25, %v529_v56  ;;  %v761_v0 = vadd.f32 %v1540_v24, %v657_v57 }
 0x1bd   : > { %v1531_v27 = vpop.f32.mrf.mxu1 }
 0x1be   : > { %v1541_v28 = vpop.f32.mrf.mxu0  ;;  %v658_v1 = vadd.f32 %v1531_v27, %v540_v60  ;;  %v759_v5 = vadd.f32 %v728_v26, %v655_v61 }
 0x1bf   : > { %v627_v29 = vpop.f32.mrf.mxu1 }
 0x1c0   : > { %v731_v30 = vpop.f32.mrf.mxu0  ;;  %v656_v6 = vadd.f32 %v627_v29, %v532_v63 }
 0x1c1   : > { %v1534_v31 = vpop.f32.mrf.mxu1 }
 0x1c2   : > { %v1544_v32 = vpop.f32.mrf.mxu0  ;;  %v661_v8 = vadd.f32 %v1534_v31, %v553_v2  ;;  %v760_v12 = vadd.f32 %v731_v30, %v656_v6 }
 0x1c3   : > { %v640_v33 = vpop.f32.mrf.mxu1 }
 0x1c4   : > { %v744_v34 = vpop.f32.mrf.mxu0  ;;  %v659_v23 = vadd.f32 %v640_v33, %v545_v7  ;;  %v765_v15 = vadd.f32 %v1544_v32, %v661_v8 }
 0x1c5   : > { %v1535_v35 = vpop.f32.mrf.mxu1 }
 0x1c6   : > { %v1545_v36 = vpop.f32.mrf.mxu0  ;;  %v662_v16 = vadd.f32 %v1535_v35, %v556_v10  ;;  %v763_v17 = vadd.f32 %v744_v34, %v659_v23  ;;  %v1441_v34 = vld [vmem:[%s1921_s4] ss:$0 sm:$0xff] }
 0x1c7   : > { %v643_v37 = vpop.f32.mrf.mxu1 }
 0x1c8   : > { %v1875_v38 = vpop.f32.mrf.mxu0  ;;  %v660_v18 = vadd.f32 %v643_v37, %v548_v14  ;;  %v766_v33 = vadd.f32 %v1545_v36, %v662_v16 }
 0x1c9   : > { %v1550_v39 = vpop.f32.mrf.mxu1 }
 0x1ca   : > { %v1560_v40 = vpop.f32.mrf.mxu0  ;;  %v764_v21 = vadd.f32 %v1875_v38, %v660_v18 }
 0x1cb   : > { %v832_v41 = vpop.f32.mrf.mxu1 }
 0x1cc   : > { %v936_v42 = vpop.f32.mrf.mxu0  ;;  %v863_v9 = vadd.f32 %v832_v41, %v759_v5 }
 0x1cd   : > { %v1551_v43 = vpop.f32.mrf.mxu1 }
 0x1ce   : > { %v1561_v44 = vpop.f32.mrf.mxu0  ;;  %v967_v26 = vadd.f32 %v936_v42, %v863_v9 }
 0x1cf   : > { %v835_v45 = vpop.f32.mrf.mxu1 }
 0x1d0   : > { %v939_v46 = vpop.f32.mrf.mxu0  ;;  %v864_v27 = vadd.f32 %v835_v45, %v760_v12 }
 0x1d1   : > { %v1554_v47 = vpop.f32.mrf.mxu1 }
 0x1d2   : > { %v1564_v48 = vpop.f32.mrf.mxu0  ;;  %v869_v31 = vadd.f32 %v1554_v47, %v765_v15 }
 0x1d3   : > { %v848_v49 = vpop.f32.mrf.mxu1 }
 0x1d4   : > { %v1877_v50 = vpop.f32.mrf.mxu0  ;;  %v867_v41 = vadd.f32 %v848_v49, %v763_v17  ;;  %v973_v22 = vadd.f32 %v1564_v48, %v869_v31 }
 0x1d5   : > { %1923 = vst [vmem:[#allocation3_spill] sm:$0xff] %v1877_v50  ;;  %v1555_v51 = vpop.f32.mrf.mxu1 }
 0x1d6   : > { %v1879_v52 = vpop.f32.mrf.mxu0  ;;  %v870_v32 = vadd.f32 %v1555_v51, %v766_v33 }
 0x1d7   : > { %1924 = vst [vmem:[#allocation4_spill] sm:$0xff] %v1879_v52  ;;  %v851_v54 = vpop.f32.mrf.mxu1  ;;  %v865_v52 = vadd.f32 %v1550_v39, %v761_v0 }
 0x1d8   : > { %v1881_v55 = vpop.f32.mrf.mxu0  ;;  %v868_v49 = vadd.f32 %v851_v54, %v764_v21 }
 0x1d9   : > { %1925 = vst [vmem:[#allocation5_spill] sm:$0xff] %v1881_v55  ;;  %v1570_v58 = vpop.f32.mrf.mxu1  ;;  %v762_v55 = vadd.f32 %v1541_v28, %v658_v1  ;;  %v969_v25 = vadd.f32 %v1560_v40, %v865_v52  ;;  %v968_v40 = vadd.f32 %v939_v46, %v864_v27 }
 0x1da   : > { %v1580_v59 = vpop.f32.mrf.mxu0 }
 0x1db   : > { %v1041_v62 = vpop.f32.mrf.mxu1  ;;  %v866_v13 = vadd.f32 %v1551_v43, %v762_v55  ;;  %v1074_v29 = vadd.f32 %v1570_v58, %v969_v25 }
 0x1dc   : > { %v1145_v3 = vpop.f32.mrf.mxu0  ;;  %v1072_v20 = vadd.f32 %v1041_v62, %v967_v26  ;;  %v1926_v36 = vld [vmem:[#allocation3_spill] sm:$0xff] }
 0x1dd   : > { %v1571_v4 = vpop.f32.mrf.mxu1  ;;  %v970_v19 = vadd.f32 %v1561_v44, %v866_v13  ;;  %v1178_v43 = vadd.f32 %v1580_v59, %v1074_v29  ;;  %v971_v47 = vadd.f32 %v1926_v36, %v867_v41 }
 0x1de   : > { %v1581_v53 = vpop.f32.mrf.mxu0  ;;  %v1176_v37 = vadd.f32 %v1145_v3, %v1072_v20  ;;  %v1927_v48 = vld [vmem:[#allocation4_spill] sm:$0xff] }
 0x1df   : > { %v1044_v50 = vpop.f32.mrf.mxu1  ;;  %v1075_v52 = vadd.f32 %v1571_v4, %v970_v19  ;;  %v974_v51 = vadd.f32 %v1927_v48, %v870_v32 }
 0x1e0   : > { %v1148_v28 = vpop.f32.mrf.mxu0  ;;  %v1073_v44 = vadd.f32 %v1044_v50, %v968_v40  ;;  %v1928_v63 = vld [vmem:[#allocation5_spill] sm:$0xff] }
 0x1e1   : > { %v1574_v11 = vpop.f32.mrf.mxu1  ;;  %v1179_v56 = vadd.f32 %v1581_v53, %v1075_v52  ;;  %v972_v0 = vadd.f32 %v1928_v63, %v868_v49 }
 0x1e2   : > { %v1584_v35 = vpop.f32.mrf.mxu0  ;;  %v1078_v46 = vadd.f32 %v1574_v11, %v973_v22  ;;  %v1177_v60 = vadd.f32 %v1148_v28, %v1073_v44 }
 0x1e3   : > { %v1057_v24 = vpop.f32.mrf.mxu1 }
 0x1e4   : > { %v1076_v58 = vadd.f32 %v1057_v24, %v971_v47  ;;  %v1161_v50 = vpop.f32.mrf.mxu0  ;;  %v1182_v1 = vadd.f32 %v1584_v35, %v1078_v46 }
 0x1e5   : > { %v1575_v39 = vpop.f32.mrf.mxu1 }
 0x1e6   : > { %v1079_v3 = vadd.f32 %v1575_v39, %v974_v51  ;;  %v1180_v7 = vadd.f32 %v1161_v50, %v1076_v58  ;;  %v1585_v8 = vpop.f32.mrf.mxu0 }
 0x1e7   : > { %v1060_v30 = vpop.f32.mrf.mxu1 }
 0x1e8   : > { %v1077_v10 = vadd.f32 %v1060_v30, %v972_v0  ;;  %v1183_v25 = vadd.f32 %v1585_v8, %v1079_v3  ;;  %v1164_v16 = vpop.f32.mrf.mxu0 }
 0x1e9   : > { %v1590_v42 = vpop.f32.mrf.mxu1 }
 0x1ea   : > { %v1282_v45 = vadd.f32 %v1590_v42, %v1178_v43  ;;  %v1181_v26 = vadd.f32 %v1164_v16, %v1077_v10 }
 0x1eb   : > { %v1249_v55 = vpop.f32.mrf.mxu1 }
 0x1ec   : > { %v1297_v57 = vadd.f32 %v1441_v34, %v1282_v45  ;;  %v1280_v38 = vadd.f32 %v1249_v55, %v1176_v37 }
 0x1ed   : > { %v1591_v59 = vpop.f32.mrf.mxu1 }
 0x1ee   : > { %v1305_v54 = vmax.f32 %v1297_v57, 0.0  ;;  %v1295_v61 = vadd.f32 %v1441_v34, %v1280_v38  ;;  %v1283_v62 = vadd.f32 %v1591_v59, %v1179_v56 }
 0x1ef   : > { %v1252_v2 = vpop.f32.mrf.mxu1 }
 0x1f0   : > { %1314 = vst.msk [vmem:[%s1894_s26 + $0x10] sm:$0xff] %vm1311_vm3, %v1305_v54  ;;  %v1303_v4 = vmax.f32 %v1295_v61, 0.0  ;;  %v1298_v5 = vadd.f32 %v1441_v34, %v1283_v62  ;;  %v1281_v6 = vadd.f32 %v1252_v2, %v1177_v60 }
 0x1f1   : > { %v1594_v9 = vpop.f32.mrf.mxu1 }
 0x1f2   : > { %1312 = vst.msk [vmem:[%s1894_s26] sm:$0xff] %vm1311_vm3, %v1303_v4  ;;  %v1306_v23 = vmax.f32 %v1298_v5, 0.0  ;;  %v1296_v53 = vadd.f32 %v1441_v34, %v1281_v6  ;;  %v1286_v11 = vadd.f32 %v1594_v9, %v1182_v1 }
 0x1f3   : > { %v1265_v12 = vpop.f32.mrf.mxu1 }
 0x1f4   : > { %1315 = vst.msk [vmem:[%s1894_s26 + $0x18] sm:$0xff] %vm1311_vm3, %v1306_v23  ;;  %v1304_v13 = vmax.f32 %v1296_v53, 0.0  ;;  %v1301_v14 = vadd.f32 %v1441_v34, %v1286_v11  ;;  %v1284_v15 = vadd.f32 %v1265_v12, %v1180_v7 }
 0x1f5   : > { %v1595_v24 = vpop.f32.mrf.mxu1 }
 0x1f6   : > { %1313 = vst.msk [vmem:[%s1894_s26 + $0x8] sm:$0xff] %vm1311_vm3, %v1304_v13  ;;  %v1309_v27 = vmax.f32 %v1301_v14, 0.0  ;;  %v1299_v29 = vadd.f32 %v1441_v34, %v1284_v15  ;;  %v1287_v17 = vadd.f32 %v1595_v24, %v1183_v25 }
 0x1f7   : > { %v1268_v18 = vpop.f32.mrf.mxu1 }
 0x1f8   : > { %1318 = vst.msk [vmem:[%s1894_s26 + $0x30] sm:$0xff] %vm1311_vm3, %v1309_v27  ;;  %v1307_v31 = vmax.f32 %v1299_v29, 0.0  ;;  %v1302_v28 = vadd.f32 %v1441_v34, %v1287_v17  ;;  %v1285_v39 = vadd.f32 %v1268_v18, %v1181_v26 }
 0x1fa   : > { %1316 = vst.msk [vmem:[%s1894_s26 + $0x20] sm:$0xff] %vm1311_vm3, %v1307_v31  ;;  %v1310_v19 = vmax.f32 %v1302_v28, 0.0  ;;  %v1300_v20 = vadd.f32 %v1441_v34, %v1285_v39 }
 0x1fc   : > { %1319 = vst.msk [vmem:[%s1894_s26 + $0x38] sm:$0xff] %vm1311_vm3, %v1310_v19  ;;  %v1308_v33 = vmax.f32 %v1300_v20, 0.0 }
 0x1fe   : > { %1317 = vst.msk [vmem:[%s1894_s26 + $0x28] sm:$0xff] %vm1311_vm3, %v1308_v33 }
 0x1ff PF: > { %s15_s18 = sadd.s32 1, %s1621_s18  }
 0x200   : > { %p12_p4 = scmp.ge.s32.totalorder %s15_s18, 4  }
 0x202   :  { %14 = sbr.rel (!%p12_p4) target bundleno = 1 (0x1), region = 80 }

// kernel: multihead_dense_block.13
= control target key start
LH: loop header
LB: loop body
LE: loop exit
PB: predicated region body
PF: predicated region fallthrough
CT: control target
= control target key end

     0   :  { %vm107_vm0 = vcmask 130048   ;;  %vm229_vm1 = vcmask 64512   ;;  %s482_s3 = inlined_call_operand.vmem [shape: f32[16,8], index: 3, kind: input, shape index: {}]   ;;  %s483_s0 = inlined_call_operand.vmem [shape: f32[128,16], index: 0, kind: input, shape index: {}]   ;;  %s484_s1 = inlined_call_operand.vmem [shape: f32[1,16], index: 1, kind: input, shape index: {}]   ;;  %s485_s2 = inlined_call_operand.vmem [shape: f32[1,16], index: 2, kind: input, shape index: {}]   ;;  %s486_s4 = inlined_call_operand.vmem [shape: f32[128,8], index: 4, kind: output, shape index: {}]  }
   0x1   :  { %v104_v0 = vld [vmem:[%s482_s3] sm:$0xff]  ;;  %v105_v1 = vld [vmem:[%s482_s3 + $0x8] sm:$0xff]  ;;  %v20_v11 = vld [vmem:[%s483_s0 + $0x10] sm:$0xff] }
   0x2   :  { %v18_v2 = vld [vmem:[%s483_s0] sm:$0xff]  ;;  %v106_v3 = vpack.c.bf16 %v105_v1, %v104_v0  ;;  %v19_v4 = vld [vmem:[%s483_s0 + $0x8] sm:$0xff]  ;;  %v21_v14 = vld [vmem:[%s483_s0 + $0x18] sm:$0xff] }
   0x3   :  { %v329_v5 = vld [vmem:[%s484_s1] ss:$0 sm:$0xff]  ;;  %v27_v10 = vld [vmem:[%s483_s0 + $0x48] sm:$0xff]  ;;  %v28_v16 = vld [vmem:[%s483_s0 + $0x50] sm:$0xff] }
   0x4   :  { %v334_v6 = vld [vmem:[%s485_s2] ss:$0 sm:$0xff]  ;;  %v41_v7 = vmul.f32 %v329_v5, %v18_v2  ;;  %v42_v8 = vmul.f32 %v329_v5, %v19_v4  ;;  %269 = vmatprep.subr.bf16.mxu0 %v106_v3  ;;  %287 = vmatprep.subr.bf16.mxu1 %v106_v3  ;;  %v50_v13 = vmul.f32 %v329_v5, %v27_v10  ;;  %v29_v17 = vld [vmem:[%s483_s0 + $0x58] sm:$0xff]  ;;  %v23_v30 = vld [vmem:[%s483_s0 + $0x28] sm:$0xff] }
   0x5   :  { %v26_v9 = vld [vmem:[%s483_s0 + $0x40] sm:$0xff]  ;;  %v43_v15 = vmul.f32 %v329_v5, %v20_v11  ;;  %270 = vmatpush3.bf16.msra.mxu0 %v106_v3  ;;  %288 = vmatpush3.bf16.msra.mxu1 %v106_v3  ;;  %v44_v20 = vmul.f32 %v329_v5, %v21_v14  ;;  %v51_v24 = vmul.f32 %v329_v5, %v28_v16  ;;  %v31_v36 = vld [vmem:[%s483_s0 + $0x68] sm:$0xff]  ;;  %v24_v41 = vld [vmem:[%s483_s0 + $0x30] sm:$0xff] }
   0x6   :  { %v49_v12 = vmul.f32 %v329_v5, %v26_v9  ;;  %v64_v18 = vadd.f32 %v334_v6, %v41_v7  ;;  %v65_v19 = vadd.f32 %v334_v6, %v42_v8  ;;  %v73_v22 = vadd.f32 %v334_v6, %v50_v13  ;;  %v22_v25 = vld [vmem:[%s483_s0 + $0x20] sm:$0xff]  ;;  %v25_v42 = vld [vmem:[%s483_s0 + $0x38] sm:$0xff]  ;;  %v32_v47 = vld [vmem:[%s483_s0 + $0x70] sm:$0xff] }
   0x7   :  { %v66_v23 = vadd.f32 %v334_v6, %v43_v15  ;;  %v67_v28 = vadd.f32 %v334_v6, %v44_v20  ;;  %v52_v29 = vmul.f32 %v329_v5, %v29_v17  ;;  %v30_v31 = vld [vmem:[%s483_s0 + $0x60] sm:$0xff]  ;;  %v74_v35 = vadd.f32 %v334_v6, %v51_v24  ;;  %v33_v56 = vld [vmem:[%s483_s0 + $0x78] sm:$0xff] }
   0x8   :  { %v72_v21 = vadd.f32 %v334_v6, %v49_v12  ;;  %v80_v26 = vmax.f32 %v64_v18, 0.0  ;;  %v81_v27 = vmax.f32 %v65_v19, 0.0  ;;  %v89_v33 = vmax.f32 %v73_v22, 0.0 }
   0x9   :  { %v82_v34 = vmax.f32 %v66_v23, 0.0  ;;  %v83_v38 = vmax.f32 %v67_v28, 0.0  ;;  %v75_v39 = vadd.f32 %v334_v6, %v52_v29  ;;  %v45_v40 = vmul.f32 %v329_v5, %v22_v25 }
   0xa   :  { %v88_v32 = vmax.f32 %v72_v21, 0.0  ;;  %v96_v37 = vpack.c.bf16 %v81_v27, %v80_v26  ;;  %v90_v44 = vmax.f32 %v74_v35, 0.0  ;;  %v46_v45 = vmul.f32 %v329_v5, %v23_v30 }
   0xb   :  { %v53_v46 = vmul.f32 %v329_v5, %v30_v31  ;;  %v97_v48 = vpack.c.bf16 %v83_v38, %v82_v34  ;;  %v91_v49 = vmax.f32 %v75_v39, 0.0  ;;  %v68_v50 = vadd.f32 %v334_v6, %v45_v40 }
   0xc   :  { %v100_v43 = vpack.c.bf16 %v89_v33, %v88_v32  ;;  %271 = vmatprep.mubr.msk.bf16.mxu0 %vm107_vm0, %v96_v37  ;;  %v54_v51 = vmul.f32 %v329_v5, %v31_v36  ;;  %v69_v52 = vadd.f32 %v334_v6, %v46_v45  ;;  %v47_v54 = vmul.f32 %v329_v5, %v24_v41 }
   0xd   :  { %v76_v53 = vadd.f32 %v334_v6, %v53_v46  ;;  %v48_v55 = vmul.f32 %v329_v5, %v25_v42  ;;  %272 = vmatmul.mubr.msk.bf16.vlgmr.msra.gmra.mxu0 %vm107_vm0, %v97_v48  ;;  %v101_v57 = vpack.c.bf16 %v91_v49, %v90_v44  ;;  %v84_v58 = vmax.f32 %v68_v50, 0.0 }
   0xe   :  { %279 = vmatprep.mubr.msk.bf16.mxu1 %vm107_vm0, %v100_v43  ;;  %v77_v59 = vadd.f32 %v334_v6, %v54_v51  ;;  %v55_v60 = vmul.f32 %v329_v5, %v32_v47  ;;  %v85_v61 = vmax.f32 %v69_v52, 0.0  ;;  %v70_v63 = vadd.f32 %v334_v6, %v47_v54 }
   0xf   :  { %v92_v62 = vmax.f32 %v76_v53, 0.0  ;;  %v71_v0 = vadd.f32 %v334_v6, %v48_v55  ;;  %280 = vmatmul.mubr.msk.bf16.vlgmr.msra.gmra.mxu1 %vm107_vm0, %v101_v57  ;;  %v56_v2 = vmul.f32 %v329_v5, %v33_v56 }
  0x10   :  { %v93_v1 = vmax.f32 %v77_v59, 0.0  ;;  %v78_v3 = vadd.f32 %v334_v6, %v55_v60  ;;  %v98_v4 = vpack.c.bf16 %v85_v61, %v84_v58  ;;  %v86_v7 = vmax.f32 %v70_v63, 0.0 }
  0x11   :  { %v87_v8 = vmax.f32 %v71_v0, 0.0  ;;  %v79_v10 = vadd.f32 %v334_v6, %v56_v2 }
  0x12   :  { %v102_v9 = vpack.c.bf16 %v93_v1, %v92_v62  ;;  %v94_v11 = vmax.f32 %v78_v3, 0.0  ;;  %275 = vmatprep.mubr.msk.bf16.mxu0 %vm107_vm0, %v98_v4 }
  0x13   :  { %v99_v12 = vpack.c.bf16 %v87_v8, %v86_v7  ;;  %v95_v13 = vmax.f32 %v79_v10, 0.0 }
  0x14   :  { %283 = vmatprep.mubr.msk.bf16.mxu1 %vm107_vm0, %v102_v9 }
  0x15   :  { %276 = vmatmul.mubr.msk.bf16.gmra.mxu0 %vm107_vm0, %v99_v12  ;;  %v103_v14 = vpack.c.bf16 %v95_v13, %v94_v11 }
  0x17   :  { %284 = vmatmul.mubr.msk.bf16.gmra.mxu1 %vm107_vm0, %v103_v14 }
  0xcd   :  { %v273_v5 = vpop.f32.mrf.mxu0 }
  0xce   :  { %232 = vst.msk [vmem:[%s486_s4 + $0x10] sm:$0xff] %vm229_vm1, %v273_v5 }
  0xcf   :  { %v281_v6 = vpop.f32.mrf.mxu1  ;;  %v166_v15 = vpop.f32.mrf.mxu0 }
  0xd0   :  { %240 = vst.msk [vmem:[%s486_s4 + $0x50] sm:$0xff] %vm229_vm1, %v281_v6  ;;  %230 = vst.msk [vmem:[%s486_s4] sm:$0xff] %vm229_vm1, %v166_v15 }
  0xd1   :  { %v198_v16 = vpop.f32.mrf.mxu1  ;;  %v274_v17 = vpop.f32.mrf.mxu0 }
  0xd2   :  { %238 = vst.msk [vmem:[%s486_s4 + $0x40] sm:$0xff] %vm229_vm1, %v198_v16  ;;  %233 = vst.msk [vmem:[%s486_s4 + $0x18] sm:$0xff] %vm229_vm1, %v274_v17 }
  0xd3   :  { %v282_v18 = vpop.f32.mrf.mxu1  ;;  %v169_v19 = vpop.f32.mrf.mxu0 }
  0xd4   :  { %241 = vst.msk [vmem:[%s486_s4 + $0x58] sm:$0xff] %vm229_vm1, %v282_v18  ;;  %231 = vst.msk [vmem:[%s486_s4 + $0x8] sm:$0xff] %vm229_vm1, %v169_v19 }
  0xd5   :  { %v201_v20 = vpop.f32.mrf.mxu1  ;;  %v277_v21 = vpop.f32.mrf.mxu0 }
  0xd6   :  { %239 = vst.msk [vmem:[%s486_s4 + $0x48] sm:$0xff] %vm229_vm1, %v201_v20  ;;  %236 = vst.msk [vmem:[%s486_s4 + $0x30] sm:$0xff] %vm229_vm1, %v277_v21 }
  0xd7   :  { %v285_v22 = vpop.f32.mrf.mxu1  ;;  %v182_v23 = vpop.f32.mrf.mxu0 }
  0xd8   :  { %244 = vst.msk [vmem:[%s486_s4 + $0x70] sm:$0xff] %vm229_vm1, %v285_v22  ;;  %234 = vst.msk [vmem:[%s486_s4 + $0x20] sm:$0xff] %vm229_vm1, %v182_v23 }
  0xd9   :  { %v214_v24 = vpop.f32.mrf.mxu1  ;;  %v278_v25 = vpop.f32.mrf.mxu0 }
  0xda   :  { %242 = vst.msk [vmem:[%s486_s4 + $0x60] sm:$0xff] %vm229_vm1, %v214_v24  ;;  %237 = vst.msk [vmem:[%s486_s4 + $0x38] sm:$0xff] %vm229_vm1, %v278_v25 }
  0xdb   :  { %v286_v26 = vpop.f32.mrf.mxu1  ;;  %v185_v27 = vpop.f32.mrf.mxu0 }
  0xdc   :  { %245 = vst.msk [vmem:[%s486_s4 + $0x78] sm:$0xff] %vm229_vm1, %v286_v26  ;;  %235 = vst.msk [vmem:[%s486_s4 + $0x28] sm:$0xff] %vm229_vm1, %v185_v27 }
  0xdd   :  { %v217_v28 = vpop.f32.mrf.mxu1 }
  0xde   :  { %243 = vst.msk [vmem:[%s486_s4 + $0x68] sm:$0xff] %vm229_vm1, %v217_v28 }

// kernel: multihead_dense_block.8
= control target key start
LH: loop header
LB: loop body
LE: loop exit
PB: predicated region body
PF: predicated region fallthrough
CT: control target
= control target key end

     0   :  { %s11135_s18 = smov 0   ;;  %s12561_s0 = inlined_call_operand.vmem [shape: f32[2,4,64,4], index: 0, kind: input, shape index: {}]   ;;  %s12562_s1 = inlined_call_operand.vmem [shape: f32[2,4,64,4], index: 1, kind: input, shape index: {}]   ;;  %s12563_s2 = inlined_call_operand.vmem [shape: f32[2,4,64,4], index: 2, kind: input, shape index: {}]   ;;  %s12564_s3 = inlined_call_operand.vmem [shape: f32[2,4,8,4], index: 3, kind: input, shape index: {}]   ;;  %s12565_s4 = inlined_call_operand.vmem [shape: f32[2,4,8,4], index: 4, kind: input, shape index: {}]   ;;  %s12566_s5 = inlined_call_operand.vmem [shape: f32[2,4,64,4], index: 5, kind: output, shape index: {}]  }
   0x1 LB: > { %s9751_s19 = sadd.s32 4294967295, %s11101_s18   ;;  %p9755_p0 = scmp.ge.s32.totalorder %s11101_s18, 1  ;;  %s11101_s18 = sphi %s11135_s18, %s15_s18  }
   0x2   : > { %p227_p1 = scmp.lt.s32.totalorder %s11101_s18, 3 }
   0x4   : > { %p228_p2 = pnand %p9755_p0, %p227_p1 }
   0x6   : > { %231 = sbr.rel (%p228_p2) target bundleno = 5918 (0x171e), region = 40 }
   0xb   : > { %p275_p3 = scmp.lt.s32.totalorder %s9751_s19, 1  ;;  %vm466_vm0 = vcmask 31744   ;;  %v12567_v38 = vmov 0.0   ;;  %vm11104_vm1 = vmmov 0   ;;  %vm1167_vm2 = vcmask 64512  }
   0xc   : > { %vm1564_vm3 = vcmask 523264   ;;  %vm9307_vm5 = vcmask 1043456  }
   0xd   : > { %s12590_s19 = smov (!%p275_p3, %s9751_s19), 1 }
   0xe   : > { %s11146_s20 = sshll.u32 %s12590_s19, 8  ;;  %s9918_s21 = sshll.u32 %s12590_s19, 5 }
   0xf   : > { %s11153_s24 = scalar_lea.vmem %s12561_s0, %s11146_s20  ;;  %s299_s27 = scalar_lea.vmem %s12565_s4, %s9918_s21 }
  0x10   : > { %v306_v0 = vld [vmem:[%s11153_s24] sm:$0xff]  ;;  %v307_v1 = vld [vmem:[%s11153_s24 + $0x8] sm:$0xff]  ;;  %v308_v10 = vld [vmem:[%s11153_s24 + $0x10] sm:$0xff]  ;;  %s294_s30 = scalar_lea.vmem %s12564_s3, %s9918_s21  ;;  %s11355_s8 = scalar_lea.vmem %s12562_s1, %s11146_s20 }
  0x11   : > { %v410_v2 = vpack.c.bf16 %v307_v1, %v306_v0  ;;  %v314_v3 = vld [vmem:[%s11153_s24 + $0x40] sm:$0xff]  ;;  %v407_v5 = vld [vmem:[%s299_s27 + $0x8] sm:$0xff]  ;;  %v309_v13 = vld [vmem:[%s11153_s24 + $0x18] sm:$0xff]  ;;  %s12325_s11 = scalar_lea.vmem %s12563_s2, %s11146_s20  ;;  %s12492_s14 = scalar_lea.vmem %s12566_s5, %s11146_s20 }
  0x12   : > { %v406_v4 = vld [vmem:[%s299_s27] sm:$0xff]  ;;  %v463_v7 = vpack.c.bf16 %v407_v5, %v407_v5  ;;  %v315_v8 = vld [vmem:[%s11153_s24 + $0x48] sm:$0xff]  ;;  %v316_v14 = vld [vmem:[%s11153_s24 + $0x50] sm:$0xff]  ;;  %v411_v24 = vpack.c.bf16 %v309_v13, %v308_v10 }
  0x13   : > { %v462_v6 = vpack.c.bf16 %v406_v4, %v406_v4  ;;  %10211 = vmatprep.mubr.msk.bf16.mxu0 %vm466_vm0, %v410_v2  ;;  %v414_v9 = vpack.c.bf16 %v315_v8, %v314_v3  ;;  %v317_v15 = vld [vmem:[%s11153_s24 + $0x58] sm:$0xff]  ;;  %v310_v16 = vld [vmem:[%s11153_s24 + $0x20] sm:$0xff]  ;;  %v311_v17 = vld [vmem:[%s11153_s24 + $0x28] sm:$0xff] }
  0x14   : > { %10910 = vmatprep.subr.msk.bf16.mxu1 %vm466_vm0, %v463_v7  ;;  %v11172_v12 = vsel %vm466_vm0, %v463_v7, 0  ;;  %v318_v18 = vld [vmem:[%s11153_s24 + $0x60] sm:$0xff]  ;;  %v319_v19 = vld [vmem:[%s11153_s24 + $0x68] sm:$0xff]  ;;  %v408_v20 = vld [vmem:[%s299_s27 + $0x10] sm:$0xff]  ;;  %v415_v25 = vpack.c.bf16 %v317_v15, %v316_v14  ;;  %v412_v26 = vpack.c.bf16 %v311_v17, %v310_v16 }
  0x15   : > { %10909 = vmatprep.subr.msk.bf16.mxu0 %vm466_vm0, %v462_v6  ;;  %v11169_v11 = vsel %vm466_vm0, %v462_v6, 0  ;;  %10220 = vmatpush3.bf16.xpose.msra.mxu1 %v11172_v12  ;;  %v409_v21 = vld [vmem:[%s299_s27 + $0x18] sm:$0xff]  ;;  %v464_v22 = vpack.c.bf16 %v408_v20, %v408_v20  ;;  %v416_v27 = vpack.c.bf16 %v319_v19, %v318_v18  ;;  %v312_v30 = vld [vmem:[%s11153_s24 + $0x30] sm:$0xff]  ;;  %v322_v34 = vld [vmem:[%s11153_s24 + $0x80] sm:$0xff] }
  0x16   : > { %10210 = vmatpush3.bf16.xpose.msra.mxu0 %v11169_v11  ;;  %10221 = vmatprep.mubr.msk.bf16.mxu1 %vm466_vm0, %v414_v9  ;;  %v465_v23 = vpack.c.bf16 %v409_v21, %v409_v21  ;;  %v313_v31 = vld [vmem:[%s11153_s24 + $0x38] sm:$0xff]  ;;  %v320_v32 = vld [vmem:[%s11153_s24 + $0x70] sm:$0xff]  ;;  %v323_v35 = vld [vmem:[%s11153_s24 + $0x88] sm:$0xff] }
  0x17   : > { %10911 = vmatprep.subr.msk.bf16.mxu0 %vm466_vm0, %v464_v22  ;;  %v11187_v28 = vsel %vm466_vm0, %v464_v22, 0  ;;  %v321_v33 = vld [vmem:[%s11153_s24 + $0x78] sm:$0xff]  ;;  %v330_v36 = vld [vmem:[%s11153_s24 + $0xc0] sm:$0xff]  ;;  %v331_v37 = vld [vmem:[%s11153_s24 + $0xc8] sm:$0xff]  ;;  %v413_v39 = vpack.c.bf16 %v313_v31, %v312_v30  ;;  %v418_v41 = vpack.c.bf16 %v323_v35, %v322_v34 }
  0x18   : > { %10912 = vmatprep.subr.msk.bf16.mxu1 %vm466_vm0, %v465_v23  ;;  %v11190_v29 = vsel %vm466_vm0, %v465_v23, 0  ;;  %v417_v40 = vpack.c.bf16 %v321_v33, %v320_v32  ;;  %v422_v42 = vpack.c.bf16 %v331_v37, %v330_v36  ;;  %v324_v43 = vld [vmem:[%s11153_s24 + $0x90] sm:$0xff]  ;;  %v325_v44 = vld [vmem:[%s11153_s24 + $0x98] sm:$0xff]  ;;  %v326_v47 = vld [vmem:[%s11153_s24 + $0xa0] sm:$0xff] }
  0x19   : > { %v332_v45 = vld [vmem:[%s11153_s24 + $0xd0] sm:$0xff]  ;;  %v333_v46 = vld [vmem:[%s11153_s24 + $0xd8] sm:$0xff]  ;;  %v327_v48 = vld [vmem:[%s11153_s24 + $0xa8] sm:$0xff]  ;;  %v419_v51 = vpack.c.bf16 %v325_v44, %v324_v43 }
  0x1a   : > { %v334_v49 = vld [vmem:[%s11153_s24 + $0xe0] sm:$0xff]  ;;  %v335_v50 = vld [vmem:[%s11153_s24 + $0xe8] sm:$0xff]  ;;  %v423_v52 = vpack.c.bf16 %v333_v46, %v332_v45  ;;  %v420_v53 = vpack.c.bf16 %v327_v48, %v326_v47  ;;  %v328_v55 = vld [vmem:[%s11153_s24 + $0xb0] sm:$0xff] }
  0x1b   : > { %v424_v54 = vpack.c.bf16 %v335_v50, %v334_v49  ;;  %v329_v56 = vld [vmem:[%s11153_s24 + $0xb8] sm:$0xff]  ;;  %v336_v57 = vld [vmem:[%s11153_s24 + $0xf0] sm:$0xff]  ;;  %v402_v61 = vld [vmem:[%s294_s30] sm:$0xff] }
  0x1c   : > { %10222 = vmatmul.mubr.msk.bf16.vlgmr.msra.gmra.mxu1 %vm466_vm0, %v415_v25  ;;  %v337_v58 = vld [vmem:[%s11153_s24 + $0xf8] sm:$0xff]  ;;  %v421_v59 = vpack.c.bf16 %v329_v56, %v328_v55  ;;  %v403_v62 = vld [vmem:[%s294_s30 + $0x8] sm:$0xff]  ;;  %v11243_v63 = vpack.c.bf16 %v402_v61, %v402_v61  ;;  %v404_v1 = vld [vmem:[%s294_s30 + $0x10] sm:$0xff] }
  0x1d   : > { %10212 = vmatmul.mubr.msk.bf16.vlgmr.msra.gmra.mxu0 %vm466_vm0, %v411_v24  ;;  %10225 = vmatprep.mubr.msk.bf16.mxu1 %vm466_vm0, %v416_v27  ;;  %v425_v60 = vpack.c.bf16 %v337_v58, %v336_v57  ;;  %v11245_v0 = vpack.c.bf16 %v403_v62, %v403_v62  ;;  %v405_v2 = vld [vmem:[%s294_s30 + $0x18] sm:$0xff]  ;;  %v11259_v3 = vpack.c.bf16 %v404_v1, %v404_v1  ;;  %v344_v58 = vld [vmem:[%s11355_s8 + $0x30] sm:$0xff] }
  0x1e   : > { %10215 = vmatprep.mubr.msk.bf16.mxu0 %vm466_vm0, %v412_v26  ;;  %10230 = vmatpush3.bf16.xpose.msra.mxu0 %v11187_v28  ;;  %v11261_v4 = vpack.c.bf16 %v405_v2, %v405_v2  ;;  %v353_v62 = vld [vmem:[%s11355_s8 + $0x78] sm:$0xff]  ;;  %v342_v2 = vld [vmem:[%s11355_s8 + $0x20] sm:$0xff] }
  0x1f   : > { %10240 = vmatpush3.bf16.xpose.msra.mxu1 %v11190_v29  ;;  %10249 = vmatprep.subr.bf16.mxu0 %v12567_v38 }
  0x20   : > { %10255 = vmatprep.subr.bf16.mxu1 %v12567_v38 }
  0x24   : > { %10226 = vmatmul.mubr.msk.bf16.gmra.mxu1 %vm466_vm0, %v417_v40 }
  0x25   : > { %10216 = vmatmul.mubr.msk.bf16.gmra.mxu0 %vm466_vm0, %v413_v39  ;;  %10241 = vmatprep.mubr.msk.bf16.mxu1 %vm466_vm0, %v422_v42 }
  0x26   : > { %10231 = vmatprep.mubr.msk.bf16.mxu0 %vm466_vm0, %v418_v41 }
  0x2c   : > { %10242 = vmatmul.mubr.msk.bf16.vlgmr.msra.gmra.mxu1 %vm466_vm0, %v423_v52 }
  0x2d   : > { %10232 = vmatmul.mubr.msk.bf16.vlgmr.msra.gmra.mxu0 %vm466_vm0, %v419_v51  ;;  %10245 = vmatprep.mubr.msk.bf16.mxu1 %vm466_vm0, %v424_v54 }
  0x2e   : > { %10235 = vmatprep.mubr.msk.bf16.mxu0 %vm466_vm0, %v420_v53  ;;  %10250 = vmatpush3.bf16.xpose.msra.mxu0 %v11169_v11 }
  0x2f   : > { %10256 = vmatpush3.bf16.xpose.msra.mxu1 %v11172_v12  ;;  %10261 = vmatprep.subr.bf16.mxu0 %v12567_v38 }
  0x30   : > { %10267 = vmatprep.subr.bf16.mxu1 %v12567_v38 }
  0x34   : > { %10246 = vmatmul.mubr.msk.bf16.gmra.mxu1 %vm466_vm0, %v425_v60  ;;  %v352_v60 = vld [vmem:[%s11355_s8 + $0x70] sm:$0xff] }
  0x35   : > { %10236 = vmatmul.mubr.msk.bf16.gmra.mxu0 %vm466_vm0, %v421_v59  ;;  %10257 = vmatprep.mubr.msk.bf16.mxu1 %vm11104_vm1, %v12567_v38  ;;  %v345_v59 = vld [vmem:[%s11355_s8 + $0x38] sm:$0xff]  ;;  %v433_v1 = vpack.c.bf16 %v353_v62, %v352_v60  ;;  %v339_v60 = vld [vmem:[%s11355_s8 + $0x8] sm:$0xff] }
  0x36   : > { %10251 = vmatprep.mubr.msk.bf16.mxu0 %vm11104_vm1, %v12567_v38  ;;  %v429_v61 = vpack.c.bf16 %v345_v59, %v344_v58  ;;  %v338_v59 = vld [vmem:[%s11355_s8] sm:$0xff]  ;;  %v347_v62 = vld [vmem:[%s11355_s8 + $0x48] sm:$0xff] }
  0x3c   : > { %10258 = vmatmul.mubr.msk.bf16.vlgmr.msra.gmra.mxu1 %vm466_vm0, %v11245_v0 }
  0x3d   : > { %10252 = vmatmul.mubr.msk.bf16.vlgmr.msra.gmra.mxu0 %vm466_vm0, %v11243_v63  ;;  %10268 = vmatpush3.bf16.xpose.msra.mxu1 %v11190_v29 }
  0x3e   : > { %10262 = vmatpush3.bf16.xpose.msra.mxu0 %v11187_v28  ;;  %10263 = vmatprep.mubr.msk.bf16.mxu0 %vm11104_vm1, %v12567_v38 }
  0x3f   : > { %10269 = vmatprep.mubr.msk.bf16.mxu1 %vm11104_vm1, %v12567_v38  ;;  %10273 = vmatprep.subr.bf16.mxu0 %v12567_v38 }
  0x40   : > { %10285 = vmatprep.subr.bf16.mxu1 %v12567_v38 }
  0x44   : > { %10270 = vmatmul.mubr.msk.bf16.vlgmr.msra.gmra.mxu1 %vm466_vm0, %v11261_v4 }
  0x45   : > { %10264 = vmatmul.mubr.msk.bf16.vlgmr.msra.gmra.mxu0 %vm466_vm0, %v11259_v3  ;;  %10293 = vmatprep.mubr.msk.bf16.mxu1 %vm11104_vm1, %v12567_v38 }
  0x46   : > { %10281 = vmatprep.mubr.msk.bf16.mxu0 %vm11104_vm1, %v12567_v38 }
  0xdc   : > { %v11273_v6 = vpop.f32.mrf.mxu1 }
  0xdd   : > { %v11271_v5 = vpop.f32.mrf.mxu0 }
  0xde   : > { %v11277_v8 = vpop.f32.mrf.mxu1 }
  0xdf   : > { %v11275_v7 = vpop.f32.mrf.mxu0 }
  0xe0   : > { %v11281_v10 = vpop.f32.mrf.mxu1 }
  0xe1   : > { %v11279_v9 = vpop.f32.mrf.mxu0 }
  0xe2   : > { %v11285_v12 = vpop.f32.mrf.mxu1 }
  0xe3   : > { %v11283_v11 = vpop.f32.mrf.mxu0 }
  0xe4   : > { %v11289_v14 = vpop.f32.mrf.mxu1 }
  0xe5   : > { %v11287_v13 = vpop.f32.mrf.mxu0 }
  0xe6   : > { %v11293_v16 = vpop.f32.mrf.mxu1 }
  0xe7   : > { %v11291_v15 = vpop.f32.mrf.mxu0 }
  0xe8   : > { %v11297_v18 = vpop.f32.mrf.mxu1 }
  0xe9   : > { %v11295_v17 = vpop.f32.mrf.mxu0 }
  0xea   : > { %v11301_v20 = vpop.f32.mrf.mxu1 }
  0xeb   : > { %v11299_v19 = vpop.f32.mrf.mxu0 }
  0xec   : > { %v11305_v22 = vpop.f32.mrf.mxu1 }
  0xed   : > { %v11303_v21 = vpop.f32.mrf.mxu0 }
  0xee   : > { %v11309_v24 = vpop.f32.mrf.mxu1 }
  0xef   : > { %v11307_v23 = vpop.f32.mrf.mxu0 }
  0xf0   : > { %v11313_v26 = vpop.f32.mrf.mxu1 }
  0xf1   : > { %v11311_v25 = vpop.f32.mrf.mxu0 }
  0xf2   : > { %v11317_v28 = vpop.f32.mrf.mxu1 }
  0xf3   : > { %v11315_v27 = vpop.f32.mrf.mxu0 }
  0xf4   : > { %v11321_v30 = vpop.f32.mrf.mxu1 }
  0xf5   : > { %v11319_v29 = vpop.f32.mrf.mxu0  ;;  %12574 = vst [vmem:[#allocation2_spill] sm:$0xff] %v11321_v30 }
  0xf6   : > { %v11325_v32 = vpop.f32.mrf.mxu1 }
  0xf7   : > { %v11323_v31 = vpop.f32.mrf.mxu0 }
  0xf8   : > { %v11329_v34 = vpop.f32.mrf.mxu1 }
  0xf9   : > { %v11327_v33 = vpop.f32.mrf.mxu0  ;;  %12575 = vst [vmem:[#allocation3_spill] sm:$0xff] %v11329_v34 }
  0xfa   : > { %v11333_v36 = vpop.f32.mrf.mxu1 }
  0xfb   : > { %v11331_v35 = vpop.f32.mrf.mxu0 }
  0xfc   : > { %v11337_v39 = vpop.f32.mrf.mxu1 }
  0xfd   : > { %v11335_v37 = vpop.f32.mrf.mxu0  ;;  %v1523_v43 = vsel %vm1167_vm2, %v11337_v39, -inf }
  0xfe   : > { %v1520_v40 = vsel %vm1167_vm2, %v11335_v37, -inf  ;;  %v10259_v41 = vpop.f32.mrf.mxu1 }
  0xff   : > { %1521 = vmax.xlane.f32.xlu0 %v1520_v40  ;;  %v10253_v42 = vpop.f32.mrf.mxu0  ;;  %v343_v40 = vld [vmem:[%s11355_s8 + $0x28] sm:$0xff]  ;;  %v969_v41 = vsel %vm466_vm0, %v429_v61, 0  ;;  %v346_v61 = vld [vmem:[%s11355_s8 + $0x40] sm:$0xff] }
 0x100   : > { %v870_v45 = vpop.f32.mrf.mxu1  ;;  %v350_v42 = vld [vmem:[%s11355_s8 + $0x60] sm:$0xff]  ;;  %10274 = vmatpush3.bf16.xpose.msra.mxu0 %v969_v41 }
 0x101   : > { %v827_v44 = vpop.f32.mrf.mxu0  ;;  %10275 = vmatprep.subr.bf16.mxu0 %v12567_v38  ;;  %v428_v45 = vpack.c.bf16 %v343_v40, %v342_v2  ;;  %v430_v2 = vpack.c.bf16 %v347_v62, %v346_v61  ;;  %v365_v61 = vld [vmem:[%s11355_s8 + $0xd8] sm:$0xff] }
 0x102   : > { %v10260_v46 = vpop.f32.mrf.mxu1  ;;  %v1021_v44 = vsel %vm466_vm0, %v433_v1, 0  ;;  %v426_v1 = vpack.c.bf16 %v339_v60, %v338_v59  ;;  %v357_v59 = vld [vmem:[%s11355_s8 + $0x98] sm:$0xff]  ;;  %v364_v60 = vld [vmem:[%s11355_s8 + $0xd0] sm:$0xff] }
 0x103   : > { %1524 = vmax.xlane.f32.xlu0 %v1523_v43  ;;  %v10254_v47 = vpop.f32.mrf.mxu0  ;;  %v351_v43 = vld [vmem:[%s11355_s8 + $0x68] sm:$0xff]  ;;  %10286 = vmatpush3.bf16.xpose.msra.mxu1 %v1021_v44  ;;  %v1012_v41 = vsel %vm466_vm0, %v430_v2, 0  ;;  %v368_v44 = vld [vmem:[%s11355_s8 + $0xf0] sm:$0xff] }
 0x104   : > { %v11345_v49 = vpop.f32.mrf.mxu1  ;;  %10287 = vmatprep.subr.bf16.mxu1 %v12567_v38  ;;  %v432_v46 = vpack.c.bf16 %v351_v43, %v350_v42  ;;  %v966_v47 = vsel %vm466_vm0, %v428_v45, 0  ;;  %v960_v40 = vsel %vm466_vm0, %v426_v1, 0  ;;  %v360_v42 = vld [vmem:[%s11355_s8 + $0xb0] sm:$0xff]  ;;  %v361_v43 = vld [vmem:[%s11355_s8 + $0xb8] sm:$0xff]  ;;  %v439_v1 = vpack.c.bf16 %v365_v61, %v364_v60 }
 0x105   : > { %v11343_v48 = vpop.f32.mrf.mxu0  ;;  %v1529_v53 = vsel %vm1167_vm2, %v11345_v49, -inf  ;;  %v369_v45 = vld [vmem:[%s11355_s8 + $0xf8] sm:$0xff] }
 0x106   : > { %v1526_v50 = vsel %vm1167_vm2, %v11343_v48, -inf  ;;  %v10271_v51 = vpop.f32.mrf.mxu1 }
 0x107   : > { %1527 = vmax.xlane.f32.xlu1 %v1526_v50  ;;  %v10265_v52 = vpop.f32.mrf.mxu0  ;;  %v1018_v50 = vsel %vm466_vm0, %v432_v46, 0  ;;  %v340_v51 = vld [vmem:[%s11355_s8 + $0x10] sm:$0xff]  ;;  %v437_v46 = vpack.c.bf16 %v361_v43, %v360_v42  ;;  %v355_v42 = vld [vmem:[%s11355_s8 + $0x88] sm:$0xff]  ;;  %v362_v43 = vld [vmem:[%s11355_s8 + $0xc0] sm:$0xff] }
 0x108   : > { %v956_v55 = vpop.f32.mrf.mxu1  ;;  %v341_v52 = vld [vmem:[%s11355_s8 + $0x18] sm:$0xff]  ;;  %10276 = vmatpush3.bf16.xpose.msra.mxu0 %v966_v47  ;;  %v441_v47 = vpack.c.bf16 %v369_v45, %v368_v44  ;;  %v363_v44 = vld [vmem:[%s11355_s8 + $0xc8] sm:$0xff] }
 0x109   : > { %v913_v54 = vpop.f32.mrf.mxu0  ;;  %10277 = vmatprep.subr.bf16.mxu0 %v12567_v38  ;;  %v427_v55 = vpack.c.bf16 %v341_v52, %v340_v51  ;;  %v358_v52 = vld [vmem:[%s11355_s8 + $0xa0] sm:$0xff] }
 0x10a   : > { %v10272_v56 = vpop.f32.mrf.mxu1  ;;  %v349_v54 = vld [vmem:[%s11355_s8 + $0x58] sm:$0xff]  ;;  %v1125_v51 = vsel %vm466_vm0, %v441_v47, 0 }
 0x10b   : > { %1530 = vmax.xlane.f32.xlu1 %v1529_v53  ;;  %v10266_v57 = vpop.f32.mrf.mxu0  ;;  %v348_v53 = vld [vmem:[%s11355_s8 + $0x50] sm:$0xff]  ;;  %10288 = vmatpush3.bf16.xpose.msra.mxu1 %v1018_v50  ;;  %v1073_v50 = vsel %vm466_vm0, %v437_v46, 0  ;;  %v438_v46 = vpack.c.bf16 %v363_v44, %v362_v43 }
 0x10c   : > { %10289 = vmatprep.subr.bf16.mxu1 %v12567_v38  ;;  %v431_v56 = vpack.c.bf16 %v349_v54, %v348_v53  ;;  %v963_v57 = vsel %vm466_vm0, %v427_v55, 0  ;;  %v359_v53 = vld [vmem:[%s11355_s8 + $0xa8] sm:$0xff]  ;;  %v366_v54 = vld [vmem:[%s11355_s8 + $0xe0] sm:$0xff] }
 0x10d   : > { %v367_v55 = vld [vmem:[%s11355_s8 + $0xe8] sm:$0xff] }
 0x10e   : > { %v1015_v58 = vsel %vm466_vm0, %v431_v56, 0  ;;  %v436_v56 = vpack.c.bf16 %v359_v53, %v358_v52 }
 0x110   : > { %10278 = vmatpush3.bf16.xpose.msra.mxu0 %v963_v57  ;;  %v440_v57 = vpack.c.bf16 %v367_v55, %v366_v54 }
 0x111   : > { %10279 = vmatprep.subr.bf16.mxu0 %v12567_v38 }
 0x113   : > { %10290 = vmatpush3.bf16.xpose.msra.mxu1 %v1015_v58  ;;  %v356_v58 = vld [vmem:[%s11355_s8 + $0x90] sm:$0xff] }
 0x114   : > { %10291 = vmatprep.subr.bf16.mxu1 %v12567_v38  ;;  %v435_v62 = vpack.c.bf16 %v357_v59, %v356_v58 }
 0x116   : > { %v1067_v2 = vsel %vm466_vm0, %v435_v62, 0 }
 0x118   : > { %10280 = vmatpush3.bf16.xpose.msra.mxu0 %v960_v40  ;;  %v1119_v40 = vsel %vm466_vm0, %v439_v1, 0 }
 0x119   : > { %10297 = vmatprep.subr.bf16.mxu0 %v12567_v38 }
 0x11b   : > { %10292 = vmatpush3.bf16.xpose.msra.mxu1 %v1012_v41  ;;  %v354_v41 = vld [vmem:[%s11355_s8 + $0x80] sm:$0xff] }
 0x11c   : > { %10309 = vmatprep.subr.bf16.mxu1 %v12567_v38  ;;  %v434_v45 = vpack.c.bf16 %v355_v42, %v354_v41 }
 0x11e   : > { %v1064_v47 = vsel %vm466_vm0, %v434_v45, 0 }
 0x11f   : > { %10282 = vmatmul.mubr.msk.bf16.vlgmr.msra.gmra.mxu0 %vm466_vm0, %v11243_v63  ;;  %v1070_v63 = vsel %vm466_vm0, %v436_v56, 0 }
 0x120   : > { %10298 = vmatpush3.bf16.xpose.msra.mxu0 %v1073_v50  ;;  %10305 = vmatprep.mubr.msk.bf16.mxu0 %vm11104_vm1, %v12567_v38  ;;  %v1116_v50 = vsel %vm466_vm0, %v438_v46, 0 }
 0x121   : > { %10299 = vmatprep.subr.bf16.mxu0 %v12567_v38 }
 0x122   : > { %10294 = vmatmul.mubr.msk.bf16.vlgmr.msra.gmra.mxu1 %vm466_vm0, %v11245_v0  ;;  %v1122_v0 = vsel %vm466_vm0, %v440_v57, 0 }
 0x123   : > { %10310 = vmatpush3.bf16.xpose.msra.mxu1 %v1125_v51  ;;  %10317 = vmatprep.mubr.msk.bf16.mxu1 %vm11104_vm1, %v12567_v38 }
 0x124   : > { %10311 = vmatprep.subr.bf16.mxu1 %v12567_v38 }
 0x128   : > { %10300 = vmatpush3.bf16.xpose.msra.mxu0 %v1070_v63 }
 0x129   : > { %10301 = vmatprep.subr.bf16.mxu0 %v12567_v38 }
 0x12b   : > { %10312 = vmatpush3.bf16.xpose.msra.mxu1 %v1122_v0 }
 0x12c   : > { %10313 = vmatprep.subr.bf16.mxu1 %v12567_v38 }
 0x130   : > { %10302 = vmatpush3.bf16.xpose.msra.mxu0 %v1067_v2 }
 0x131   : > { %10303 = vmatprep.subr.bf16.mxu0 %v12567_v38 }
 0x133   : > { %10314 = vmatpush3.bf16.xpose.msra.mxu1 %v1119_v40 }
 0x134   : > { %10315 = vmatprep.subr.bf16.mxu1 %v12567_v38 }
 0x138   : > { %10304 = vmatpush3.bf16.xpose.msra.mxu0 %v1064_v47 }
 0x139   : > { %10321 = vmatprep.subr.mxu0 %v12567_v38 }
 0x13b   : > { %10316 = vmatpush3.bf16.xpose.msra.mxu1 %v1116_v50 }
 0x13c   : > { %10326 = vmatprep.subr.mxu1 %v12567_v38 }
 0x13f   : > { %10306 = vmatmul.mubr.msk.bf16.vlgmr.msra.gmra.mxu0 %vm466_vm0, %v11259_v3 }
 0x140   : > { %10323 = vmatprep.mubr.msk.f32.mxu0 %vm11104_vm1, %v12567_v38 }
 0x142   : > { %10318 = vmatmul.mubr.msk.bf16.vlgmr.msra.gmra.mxu1 %vm466_vm0, %v11261_v4 }
 0x143   : > { %10328 = vmatprep.mubr.msk.f32.mxu1 %vm11104_vm1, %v12567_v38 }
 0x188   : > { %v1522_v51 = vpop.xlane.xlu0 %1521 }
 0x189   : > { %v1532_v52 = vsub.f32 %v11335_v37, %v1522_v51 }
 0x18b   : > { %v1536_v53 = vmul.f32 1.442695, %v1532_v52 }
 0x18c   : > { %v1525_v54 = vpop.xlane.xlu0 %1524 }
 0x18d   : > { %10927 = vpow2.f32 %v1536_v53  ;;  %v1533_v55 = vsub.f32 %v11337_v39, %v1525_v54 }
 0x18f   : > { %v1538_v56 = vmul.f32 1.442695, %v1533_v55 }
 0x190   : > { %v1528_v57 = vpop.xlane.xlu1 %1527 }
 0x191   : > { %10929 = vpow2.f32 %v1538_v56  ;;  %v1534_v3 = vsub.f32 %v11343_v48, %v1528_v57 }
 0x193   : > { %v1540_v4 = vmul.f32 1.442695, %v1534_v3 }
 0x194   : > { %v1531_v63 = vpop.xlane.xlu1 %1530 }
 0x195   : > { %10931 = vpow2.f32 %v1540_v4  ;;  %v1535_v0 = vsub.f32 %v11345_v49, %v1531_v63 }
 0x197   : > { %v1542_v58 = vmul.f32 1.442695, %v1535_v0 }
 0x199   : > { %10933 = vpow2.f32 %v1542_v58 }
 0x19a   : > { %v10928_v59 = vpop.eup %10927 }
 0x19b   : > { %v1544_v37 = vsel %vm1167_vm2, %v10928_v59, 0.0 }
 0x19c   : > { %1545 = vadd.xlane.f32.xlu0 %v1544_v37 }
 0x19e   : > { %v10930_v60 = vpop.eup %10929 }
 0x19f   : > { %v1547_v61 = vsel %vm1167_vm2, %v10930_v60, 0.0 }
 0x1a0   : > { %1548 = vadd.xlane.f32.xlu1 %v1547_v61 }
 0x1a2   : > { %v10932_v39 = vpop.eup %10931 }
 0x1a3   : > { %v1550_v62 = vsel %vm1167_vm2, %v10932_v39, 0.0 }
 0x1a4   : > { %1551 = vadd.xlane.f32.xlu0 %v1550_v62 }
 0x1a6   : > { %v10934_v48 = vpop.eup %10933 }
 0x1a7   : > { %v1553_v1 = vsel %vm1167_vm2, %v10934_v48, 0.0 }
 0x1a8   : > { %1554 = vadd.xlane.f32.xlu1 %v1553_v1 }
 0x1df   : > { %v11445_v2 = vpop.f32.mrf.mxu0 }
 0x1e1   : > { %v10283_v40 = vpop.f32.mrf.mxu0 }
 0x1e2   : > { %v11447_v49 = vpop.f32.mrf.mxu1 }
 0x1e3   : > { %v1008_v42 = vpop.f32.mrf.mxu0 }
 0x1e4   : > { %v10295_v41 = vpop.f32.mrf.mxu1 }
 0x1e5   : > { %v10284_v44 = vpop.f32.mrf.mxu0 }
 0x1e6   : > { %v1060_v43 = vpop.f32.mrf.mxu1 }
 0x1e8   : > { %v10296_v45 = vpop.f32.mrf.mxu1 }
 0x1ff   : > { %v11449_v50 = vpop.f32.mrf.mxu0 }
 0x201   : > { %v10307_v52 = vpop.f32.mrf.mxu0 }
 0x202   : > { %v11451_v53 = vpop.f32.mrf.mxu1 }
 0x203   : > { %v1112_v54 = vpop.f32.mrf.mxu0 }
 0x204   : > { %v10319_v57 = vpop.f32.mrf.mxu1 }
 0x205   : > { %v10308_v56 = vpop.f32.mrf.mxu0 }
 0x206   : > { %v1164_v63 = vpop.f32.mrf.mxu1 }
 0x208   : > { %v10320_v58 = vpop.f32.mrf.mxu1 }
 0x225   : > { %v1546_v46 = vpop.xlane.xlu0 %1545 }
 0x226   : > { %10935 = vrcp.f32 %v1546_v46 }
 0x229   : > { %v1549_v47 = vpop.xlane.xlu1 %1548 }
 0x22a   : > { %10937 = vrcp.f32 %v1549_v47 }
 0x22d   : > { %v1552_v51 = vpop.xlane.xlu0 %1551 }
 0x22e   : > { %10939 = vrcp.f32 %v1552_v51 }
 0x231   : > { %v1555_v55 = vpop.xlane.xlu1 %1554 }
 0x232   : > { %10941 = vrcp.f32 %v1555_v55 }
 0x233   : > { %v10936_v3 = vpop.eup %10935 }
 0x234   : > { %v11453_v4 = vmul.f32 %v10936_v3, %v10928_v59 }
 0x236   : > { %v1616_v0 = vand.u32 2147483647, %v11453_v4 }
 0x237   : > { %v10938_v37 = vpop.eup %10937 }
 0x238   : > { %v11456_v61 = vmul.f32 %v10938_v37, %v10930_v60  ;;  %v1620_v62 = vsel %vm1167_vm2, %v1616_v0, 0.0 }
 0x239   : > { %v1656_v1 = vrot.slane %v1620_v62, 4  ;;  %1621 = vadd.xlane.f32.xlu0 %v1620_v62 }
 0x23a   : > { %v1617_v40 = vand.u32 2147483647, %v11456_v61 }
 0x23b   : > { %v10940_v41 = vpop.eup %10939  ;;  %v1657_v42 = vadd.f32 %v1656_v1, %v1620_v62 }
 0x23c   : > { %v11460_v43 = vmul.f32 %v10940_v41, %v10932_v39  ;;  %v1623_v59 = vsel %vm1167_vm2, %v1617_v40, 0.0 }
 0x23d   : > { %v1658_v44 = vrot.slane %v1657_v42, 2  ;;  %1624 = vadd.xlane.f32.xlu1 %v1623_v59  ;;  %v1662_v45 = vrot.slane %v1623_v59, 4 }
 0x23e   : > { %v1618_v46 = vand.u32 2147483647, %v11460_v43 }
 0x23f   : > { %v10942_v47 = vpop.eup %10941  ;;  %v1663_v60 = vadd.f32 %v1662_v45, %v1623_v59  ;;  %v1659_v51 = vadd.f32 %v1658_v44, %v1657_v42 }
 0x240   : > { %v11464_v52 = vmul.f32 %v10942_v47, %v10934_v48  ;;  %v1626_v54 = vsel %vm1167_vm2, %v1618_v46, 0.0 }
 0x241   : > { %v1664_v55 = vrot.slane %v1663_v60, 2  ;;  %1627 = vadd.xlane.f32.xlu0 %v1626_v54  ;;  %v1668_v56 = vrot.slane %v1626_v54, 4  ;;  %v1660_v57 = vrot.slane %v1659_v51, 1 }
 0x242   : > { %v1619_v39 = vand.u32 2147483647, %v11464_v52 }
 0x243   : > { %v1669_v3 = vadd.f32 %v1668_v56, %v1626_v54  ;;  %v1661_v63 = vadd.f32 %v1660_v57, %v1659_v51  ;;  %v1665_v0 = vadd.f32 %v1664_v55, %v1663_v60  ;;  %v1565_v56 = vsel %vm1564_vm3, %v11445_v2, -inf }
 0x244   : > { %v1629_v58 = vsel %vm1167_vm2, %v1619_v39, 0.0  ;;  %v1568_v57 = vsel %vm1564_vm3, %v11447_v49, -inf  ;;  %v1571_v39 = vsel %vm1564_vm3, %v11449_v50, -inf }
 0x245   : > { %v1670_v37 = vrot.slane %v1669_v3, 2  ;;  %1630 = vadd.xlane.f32.xlu1 %v1629_v58  ;;  %v1674_v62 = vrot.slane %v1629_v58, 4  ;;  %v1680_v1 = vsel %vm1167_vm2, %v1661_v63, -inf  ;;  %v1666_v48 = vrot.slane %v1665_v0, 1 }
 0x246   : > { %1681 = vmax.xlane.f32.xlu0 %v1680_v1 }
 0x247   : > { %v1675_v40 = vadd.f32 %v1674_v62, %v1629_v58  ;;  %v1667_v41 = vadd.f32 %v1666_v48, %v1665_v0  ;;  %v1671_v42 = vadd.f32 %v1670_v37, %v1669_v3  ;;  %v1574_v3 = vsel %vm1564_vm3, %v11451_v53, -inf }
 0x249   : > { %v1676_v59 = vrot.slane %v1675_v40, 2  ;;  %v1683_v44 = vsel %vm1167_vm2, %v1667_v41, -inf  ;;  %v1672_v45 = vrot.slane %v1671_v42, 1 }
 0x24a   : > { %1684 = vmax.xlane.f32.xlu1 %v1683_v44 }
 0x24b   : > { %v1673_v46 = vadd.f32 %v1672_v45, %v1671_v42  ;;  %v1677_v47 = vadd.f32 %v1676_v59, %v1675_v40 }
 0x24d   : > { %v1686_v60 = vsel %vm1167_vm2, %v1673_v46, -inf  ;;  %v1678_v51 = vrot.slane %v1677_v47, 1 }
 0x24e   : > { %1687 = vmax.xlane.f32.xlu0 %v1686_v60 }
 0x24f   : > { %v1679_v54 = vadd.f32 %v1678_v51, %v1677_v47 }
 0x251   : > { %v1689_v55 = vsel %vm1167_vm2, %v1679_v54, -inf }
 0x252   : > { %1690 = vmax.xlane.f32.xlu1 %v1689_v55 }
 0x27b   : > { %1692 = vxpose.xlu0.b32.start.end [1/1] (short) (narrow) %v11453_v4, 8 }
 0x27f   : > { %1756 = vxpose.xlu0.b32.start.end [1/1] (short) (narrow) %v11460_v43, 8 }
 0x283   : > { %1788 = vxpose.xlu0.b32.start.end [1/1] (short) (narrow) %v11464_v52, 8 }
 0x285   : > { %1724 = vxpose.xlu1.b32.start.end [1/1] (short) (narrow) %v11456_v61, 8 }
 0x2ac   : > { %1566 = vmax.xlane.f32.xlu1 %v1565_v56 }
 0x2b0   : > { %1569 = vmax.xlane.f32.xlu0 %v1568_v57  ;;  %1572 = vmax.xlane.f32.xlu1 %v1571_v39 }
 0x2b4   : > { %1575 = vmax.xlane.f32.xlu1 %v1574_v3 }
 0x2c2   : > { %v1622_v63 = vpop.xlane.xlu0 %1621 }
 0x2c3   : > { %v1632_v0 = vrot.slane %v1622_v63, 4 }
 0x2c5   : > { %v1633_v37 = vmax.f32 %v1622_v63, %v1632_v0 }
 0x2c6   : > { %v1625_v1 = vpop.xlane.xlu1 %1624 }
 0x2c7   : > { %v1634_v48 = vrot.slane %v1633_v37, 2  ;;  %v1638_v42 = vrot.slane %v1625_v1, 4 }
 0x2c9   : > { %v1635_v59 = vmax.f32 %v1633_v37, %v1634_v48  ;;  %v1639_v46 = vmax.f32 %v1625_v1, %v1638_v42 }
 0x2ca   : > { %v1628_v58 = vpop.xlane.xlu0 %1627 }
 0x2cb   : > { %v1644_v62 = vrot.slane %v1628_v58, 4  ;;  %v1636_v51 = vrot.slane %v1635_v59, 1  ;;  %v1640_v54 = vrot.slane %v1639_v46, 2 }
 0x2cd   : > { %v1645_v40 = vmax.f32 %v1628_v58, %v1644_v62  ;;  %v1637_v56 = vmax.f32 %v1635_v59, %v1636_v51  ;;  %v1641_v3 = vmax.f32 %v1639_v46, %v1640_v54 }
 0x2ce   : > { %v1631_v41 = vpop.xlane.xlu1 %1630 }
 0x2cf   : > { %v1646_v44 = vrot.slane %v1645_v40, 2  ;;  %v1650_v45 = vrot.slane %v1631_v41, 4  ;;  %v1682_v39 = vpop.xlane.xlu0 %1681  ;;  %v1642_v58 = vrot.slane %v1641_v3, 1 }
 0x2d0   : > { %v1820_v0 = vmul.f32 %v1682_v39, %v1637_v56 }
 0x2d1   : > { %v1647_v47 = vmax.f32 %v1645_v40, %v1646_v44  ;;  %v1651_v60 = vmax.f32 %v1631_v41, %v1650_v45  ;;  %v1643_v30 = vmax.f32 %v1641_v3, %v1642_v58 }
 0x2d2   : > { %10943 = vrcp.f32 %v1820_v0 }
 0x2d3   : > { %v1652_v55 = vrot.slane %v1651_v60, 2  ;;  %v1648_v57 = vrot.slane %v1647_v47, 1  ;;  %v1685_v48 = vpop.xlane.xlu1 %1684 }
 0x2d4   : > { %v1821_v41 = vmul.f32 %v1685_v48, %v1643_v30 }
 0x2d5   : > { %v1653_v63 = vmax.f32 %v1651_v60, %v1652_v55  ;;  %v1649_v38 = vmax.f32 %v1647_v47, %v1648_v57 }
 0x2d7   : > { %v1688_v34 = vpop.xlane.xlu0 %1687  ;;  %v1654_v37 = vrot.slane %v1653_v63, 1 }
 0x2d8   : > { %v1822_v62 = vmul.f32 %v1688_v34, %v1649_v38  ;;  %v12576_v34 = vmov 0.0  }
 0x2d9   : > { %v1655_v1 = vmax.f32 %v1653_v63, %v1654_v37 }
 0x2da   : > { %10945 = vrcp.f32 %v1822_v62 }
 0x2db   : > { %v1691_v40 = vpop.xlane.xlu1 %1690  ;;  %10947 = vrcp.f32 %v1821_v41 }
 0x2dc   : > { %v1823_v42 = vmul.f32 %v1691_v40, %v1655_v1 }
 0x2de   : > { %10949 = vrcp.f32 %v1823_v42 }
 0x2df   : > { %v10944_v59 = vpop.eup %10943 }
 0x2e7   : > { %v10946_v46 = vpop.eup %10945 }
 0x2e8   : > { %v10948_v30 = vpop.eup %10947 }
 0x2eb   : > { %v10950_v55 = vpop.eup %10949 }
 0x2f7   : > { %v1708_v44 = vpop.trf.xlu0 }
 0x2f8   : > { %v11485_v45 = vmul.f32 %v10944_v59, %v1708_v44 }
 0x2fa   : > { %10322 = vmatpush3.msra.mxu0 %v11485_v45 }
 0x2fb   : > { %10324 = vmatmul.mubr.msk.f32.vlgmr.msra.gmra.mxu0 %vm1167_vm2, %v11453_v4  ;;  %v1772_v38 = vpop.trf.xlu0  ;;  %10331 = vmatprep.subr.mxu0 %v12576_v34 }
 0x2fc   : > { %v11491_v47 = vmul.f32 %v10946_v46, %v1772_v38  ;;  %10333 = vmatprep.mubr.msk.f32.mxu0 %vm11104_vm1, %v12576_v34  ;;  %v1168_v38 = vsel %vm1167_vm2, %v11275_v7, -inf }
 0x2fe   : > { %10332 = vmatpush3.msra.mxu0 %v11491_v47 }
 0x2ff   : > { %10334 = vmatmul.mubr.msk.f32.vlgmr.msra.gmra.mxu0 %vm1167_vm2, %v11460_v43  ;;  %10341 = vmatprep.subr.mxu0 %v12576_v34  ;;  %v1804_v60 = vpop.trf.xlu0 }
 0x300   : > { %10343 = vmatprep.mubr.msk.f32.mxu0 %vm11104_vm1, %v12576_v34  ;;  %v11503_v56 = vmul.f32 %v10950_v55, %v1804_v60  ;;  %v1192_v60 = vsel %vm1167_vm2, %v11277_v8, -inf  ;;  %v1174_v55 = vsel %vm1167_vm2, %v11271_v5, -inf }
 0x301   : > { %v1740_v51 = vpop.trf.xlu1 }
 0x302   : > { %v11501_v54 = vmul.f32 %v10948_v30, %v1740_v51  ;;  %v1171_v30 = vsel %vm1167_vm2, %v11283_v11, -inf  ;;  %v1195_v51 = vsel %vm1167_vm2, %v11285_v12, -inf }
 0x304   : > { %10327 = vmatpush3.msra.mxu1 %v11501_v54 }
 0x305   : > { %10329 = vmatmul.mubr.msk.f32.vlgmr.msra.gmra.mxu1 %vm1167_vm2, %v11456_v61  ;;  %10336 = vmatprep.subr.mxu1 %v12576_v34 }
 0x306   : > { %10337 = vmatpush3.msra.mxu1 %v11503_v56  ;;  %10338 = vmatprep.mubr.msk.f32.mxu1 %vm11104_vm1, %v12576_v34 }
 0x307   : > { %10346 = vmatprep.subr.mxu1 %v12576_v34 }
 0x309   : > { %10339 = vmatmul.mubr.msk.f32.vlgmr.msra.gmra.mxu1 %vm1167_vm2, %v11464_v52 }
 0x30a   : > { %10348 = vmatprep.mubr.msk.f32.mxu1 %vm11104_vm1, %v12576_v34 }
 0x335   : > { %v1567_v57 = vpop.xlane.xlu1 %1566 }
 0x336   : > { %v1577_v39 = vsub.f32 %v11445_v2, %v1567_v57  ;;  %v1177_v57 = vsel %vm1167_vm2, %v11279_v9, -inf }
 0x338   : > { %v1581_v3 = vmul.f32 1.442695, %v1577_v39  ;;  %v1198_v39 = vsel %vm1167_vm2, %v11273_v6, -inf }
 0x339   : > { %v1570_v63 = vpop.xlane.xlu0 %1569  ;;  %v1573_v0 = vpop.xlane.xlu1 %1572 }
 0x33a   : > { %10951 = vpow2.f32 %v1581_v3  ;;  %v1578_v58 = vsub.f32 %v11447_v49, %v1570_v63  ;;  %v1579_v62 = vsub.f32 %v11449_v50, %v1573_v0  ;;  %v1201_v3 = vsel %vm1167_vm2, %v11281_v10, -inf }
 0x33b   : > { %v1180_v63 = vsel %vm1167_vm2, %v11291_v15, -inf  ;;  %v1183_v0 = vsel %vm1167_vm2, %v11299_v19, -inf }
 0x33c   : > { %v1583_v37 = vmul.f32 1.442695, %v1578_v58  ;;  %v1585_v48 = vmul.f32 1.442695, %v1579_v62  ;;  %v1204_v58 = vsel %vm1167_vm2, %v11293_v16, -inf  ;;  %v1207_v62 = vsel %vm1167_vm2, %v11301_v20, -inf }
 0x33d   : > { %v1576_v1 = vpop.xlane.xlu1 %1575 }
 0x33e   : > { %10953 = vpow2.f32 %v1583_v37  ;;  %v1580_v40 = vsub.f32 %v11451_v53, %v1576_v1  ;;  %v1186_v37 = vsel %vm1167_vm2, %v11287_v13, -inf  ;;  %v1210_v1 = vsel %vm1167_vm2, %v11289_v14, -inf }
 0x33f   : > { %10955 = vpow2.f32 %v1585_v48  ;;  %v1189_v48 = vsel %vm1167_vm2, %v11295_v17, -inf }
 0x340   : > { %v1587_v41 = vmul.f32 1.442695, %v1580_v40  ;;  %v1213_v40 = vsel %vm1167_vm2, %v11297_v18, -inf }
 0x342   : > { %10957 = vpow2.f32 %v1587_v41  ;;  %v1216_v41 = vsel %vm1167_vm2, %v11307_v23, -inf }
 0x347   : > { %v11521_v42 = vpop.eup %10951 }
 0x348   : > { %v1589_v2 = vsel %vm1564_vm3, %v11521_v42, 0.0 }
 0x349   : > { %1590 = vadd.xlane.f32.xlu0 %v1589_v2  ;;  %v1219_v2 = vsel %vm1167_vm2, %v11315_v27, -inf }
 0x34b   : > { %v11525_v59 = vpop.eup %10953 }
 0x34c   : > { %12577 = vst [vmem:[#allocation4_spill] sm:$0xff] %v11525_v59  ;;  %v11527_v49 = vpop.eup %10955  ;;  %v1592_v50 = vsel %vm1564_vm3, %v11525_v59, 0.0 }
 0x34d   : > { %12578 = vst [vmem:[#allocation5_spill] sm:$0xff] %v11527_v49  ;;  %1593 = vadd.xlane.f32.xlu1 %v1592_v50  ;;  %v1595_v53 = vsel %vm1564_vm3, %v11527_v49, 0.0  ;;  %v1240_v50 = vsel %vm1167_vm2, %v11309_v24, -inf }
 0x34e   : > { %1596 = vadd.xlane.f32.xlu0 %v1595_v53  ;;  %v1243_v53 = vsel %vm1167_vm2, %v11317_v28, -inf }
 0x34f   : > { %v11533_v44 = vpop.eup %10957 }
 0x350   : > { %12579 = vst [vmem:[#allocation6_spill] sm:$0xff] %v11533_v44  ;;  %v1598_v46 = vsel %vm1564_vm3, %v11533_v44, 0.0 }
 0x351   : > { %1599 = vadd.xlane.f32.xlu1 %v1598_v46  ;;  %v1222_v46 = vsel %vm1167_vm2, %v11303_v21, -inf }
 0x352   : > { %1169 = vmax.xlane.f32.xlu0 %v1168_v38  ;;  %v1225_v38 = vsel %vm1167_vm2, %v11311_v25, -inf }
 0x355   : > { %1172 = vmax.xlane.f32.xlu1 %v1171_v30  ;;  %v1246_v30 = vsel %vm1167_vm2, %v11305_v22, -inf }
 0x356   : > { %1193 = vmax.xlane.f32.xlu0 %v1192_v60  ;;  %v1249_v60 = vsel %vm1167_vm2, %v11313_v26, -inf }
 0x359   : > { %1196 = vmax.xlane.f32.xlu1 %v1195_v51  ;;  %v1228_v51 = vsel %vm1167_vm2, %v11323_v31, -inf }
 0x35a   : > { %1175 = vmax.xlane.f32.xlu0 %v1174_v55  ;;  %v1231_v55 = vsel %vm1167_vm2, %v11331_v35, -inf }
 0x35d   : > { %1178 = vmax.xlane.f32.xlu1 %v1177_v57  ;;  %v1252_v57 = vsel %vm1167_vm2, %v11325_v32, -inf }
 0x35e   : > { %1199 = vmax.xlane.f32.xlu0 %v1198_v39  ;;  %v1255_v39 = vsel %vm1167_vm2, %v11333_v36, -inf }
 0x361   : > { %1202 = vmax.xlane.f32.xlu1 %v1201_v3  ;;  %v1234_v3 = vsel %vm1167_vm2, %v11319_v29, -inf }
 0x362   : > { %1181 = vmax.xlane.f32.xlu0 %v1180_v63  ;;  %v1237_v63 = vsel %vm1167_vm2, %v11327_v33, -inf }
 0x365   : > { %1184 = vmax.xlane.f32.xlu1 %v1183_v0  ;;  %v12580_v0 = vld [vmem:[#allocation2_spill] sm:$0xff] }
 0x366   : > { %1205 = vmax.xlane.f32.xlu0 %v1204_v58  ;;  %v1258_v58 = vsel %vm1167_vm2, %v12580_v0, -inf }
 0x369   : > { %1208 = vmax.xlane.f32.xlu1 %v1207_v62  ;;  %v12581_v62 = vld [vmem:[#allocation3_spill] sm:$0xff] }
 0x36a   : > { %1187 = vmax.xlane.f32.xlu0 %v1186_v37  ;;  %v1261_v37 = vsel %vm1167_vm2, %v12581_v62, -inf }
 0x36d   : > { %1190 = vmax.xlane.f32.xlu1 %v1189_v48  ;;  %v1609_v48 = vlaneseq }
 0x36e   : > { %1211 = vmax.xlane.f32.xlu0 %v1210_v1 }
 0x36f   : > { %v1610_v1 = vshrl.u32 %v1609_v48, 7 }
 0x371   : > { %1214 = vmax.xlane.f32.xlu1 %v1213_v40  ;;  %v1612_v40 = vand.u32 127, %v1609_v48 }
 0x372   : > { %1217 = vmax.xlane.f32.xlu0 %v1216_v41 }
 0x373   : > { %vm1613_vm4 = vcmp.eq.s32.totalorder %v1610_v1, %v1612_v40 }
 0x374   : > { %v11602_v41 = vsel %vm1613_vm4, 1.0, %v12576_v34 }
 0x375   : > { %1220 = vmax.xlane.f32.xlu1 %v1219_v2  ;;  %v11605_v2 = vmul.f32 7.0, %v11602_v41 }
 0x376   : > { %1241 = vmax.xlane.f32.xlu0 %v1240_v50 }
 0x379   : > { %1244 = vmax.xlane.f32.xlu1 %v1243_v53 }
 0x37a   : > { %1223 = vmax.xlane.f32.xlu0 %v1222_v46 }
 0x37d   : > { %1226 = vmax.xlane.f32.xlu1 %v1225_v38 }
 0x37e   : > { %1247 = vmax.xlane.f32.xlu0 %v1246_v30 }
 0x381   : > { %1250 = vmax.xlane.f32.xlu1 %v1249_v60 }
 0x382   : > { %1229 = vmax.xlane.f32.xlu0 %v1228_v51 }
 0x385   : > { %1232 = vmax.xlane.f32.xlu1 %v1231_v55 }
 0x386   : > { %1253 = vmax.xlane.f32.xlu0 %v1252_v57 }
 0x389   : > { %1256 = vmax.xlane.f32.xlu1 %v1255_v39 }
 0x38a   : > { %1235 = vmax.xlane.f32.xlu0 %v1234_v3 }
 0x38d   : > { %1238 = vmax.xlane.f32.xlu1 %v1237_v63 }
 0x38e   : > { %1259 = vmax.xlane.f32.xlu0 %v1258_v58 }
 0x391   : > { %1262 = vmax.xlane.f32.xlu1 %v1261_v37 }
 0x3bb   : > { %v11607_v50 = vpop.f32.mrf.mxu0 }
 0x3bc   : > { %v2125_v53 = vsub.f32 %v11605_v2, %v11607_v50 }
 0x3bd   : > { %v10325_v46 = vpop.f32.mrf.mxu0 }
 0x3be   : > { %10342 = vmatpush3.msra.mxu0 %v2125_v53 }
 0x3bf   : > { %v11611_v38 = vpop.f32.mrf.mxu0  ;;  %10344 = vmatmul.mubr.msk.f32.vlgmr.msra.gmra.mxu0 %vm1167_vm2, %v11607_v50  ;;  %10351 = vmatprep.subr.mxu0 %v12576_v34 }
 0x3c0   : > { %v2127_v30 = vsub.f32 %v11605_v2, %v11611_v38  ;;  %10353 = vmatprep.mubr.msk.f32.mxu0 %vm11104_vm1, %v12576_v34 }
 0x3c1   : > { %v10335_v60 = vpop.f32.mrf.mxu0 }
 0x3c2   : > { %10352 = vmatpush3.msra.mxu0 %v2127_v30 }
 0x3c3   : > { %10354 = vmatmul.mubr.msk.f32.vlgmr.msra.gmra.mxu0 %vm1167_vm2, %v11611_v38  ;;  %10361 = vmatprep.subr.mxu0 %v12576_v34 }
 0x3c4   : > { %10363 = vmatprep.mubr.msk.f32.mxu0 %vm11104_vm1, %v12576_v34 }
 0x3c5   : > { %v11625_v51 = vpop.f32.mrf.mxu1 }
 0x3c6   : > { %v2126_v55 = vsub.f32 %v11605_v2, %v11625_v51 }
 0x3c7   : > { %v10330_v57 = vpop.f32.mrf.mxu1 }
 0x3c8   : > { %10347 = vmatpush3.msra.mxu1 %v2126_v55 }
 0x3c9   : > { %v11629_v39 = vpop.f32.mrf.mxu1  ;;  %10349 = vmatmul.mubr.msk.f32.vlgmr.msra.gmra.mxu1 %vm1167_vm2, %v11625_v51  ;;  %10356 = vmatprep.subr.mxu1 %v12576_v34 }
 0x3ca   : > { %v2128_v3 = vsub.f32 %v11605_v2, %v11629_v39  ;;  %10358 = vmatprep.mubr.msk.f32.mxu1 %vm11104_vm1, %v12576_v34 }
 0x3cb   : > { %v10340_v63 = vpop.f32.mrf.mxu1 }
 0x3cc   : > { %10357 = vmatpush3.msra.mxu1 %v2128_v3 }
 0x3cd   : > { %10359 = vmatmul.mubr.msk.f32.vlgmr.msra.gmra.mxu1 %vm1167_vm2, %v11629_v39  ;;  %10366 = vmatprep.subr.mxu1 %v12576_v34 }
 0x3ce   : > { %10368 = vmatprep.mubr.msk.f32.mxu1 %vm11104_vm1, %v12576_v34 }
 0x3d2   : > { %v11643_v58 = vpop.xlane.xlu0 %1590 }
 0x3d6   : > { %v11645_v37 = vpop.xlane.xlu1 %1593 }
 0x3d7   : > { %v11647_v48 = vpop.xlane.xlu0 %1596 }
 0x3d8   : > { %12582 = vst [vmem:[#allocation2_spill] sm:$0xff] %v11647_v48 }
 0x3da   : > { %v11649_v1 = vpop.xlane.xlu1 %1599 }
 0x3db   : > { %12583 = vst [vmem:[#allocation3_spill] sm:$0xff] %v11649_v1  ;;  %v1170_v40 = vpop.xlane.xlu0 %1169 }
 0x3dc   : > { %v1264_v53 = vsub.f32 %v11275_v7, %v1170_v40 }
 0x3de   : > { %v1296_v46 = vmul.f32 1.442695, %v1264_v53  ;;  %v1173_v30 = vpop.xlane.xlu1 %1172 }
 0x3df   : > { %v1194_v60 = vpop.xlane.xlu0 %1193  ;;  %v1265_v55 = vsub.f32 %v11283_v11, %v1173_v30 }
 0x3e0   : > { %10959 = vpow2.f32 %v1296_v46  ;;  %v1272_v57 = vsub.f32 %v11277_v8, %v1194_v60 }
 0x3e1   : > { %v1298_v3 = vmul.f32 1.442695, %v1265_v55 }
 0x3e2   : > { %v1312_v63 = vmul.f32 1.442695, %v1272_v57  ;;  %v1197_v44 = vpop.xlane.xlu1 %1196 }
 0x3e3   : > { %10961 = vpow2.f32 %v1298_v3  ;;  %v1176_v49 = vpop.xlane.xlu0 %1175  ;;  %v1273_v59 = vsub.f32 %v11285_v12, %v1197_v44 }
 0x3e4   : > { %10963 = vpow2.f32 %v1312_v63  ;;  %v1266_v1 = vsub.f32 %v11271_v5, %v1176_v49 }
 0x3e5   : > { %v1314_v48 = vmul.f32 1.442695, %v1273_v59 }
 0x3e6   : > { %v1300_v7 = vmul.f32 1.442695, %v1266_v1  ;;  %v1179_v40 = vpop.xlane.xlu1 %1178 }
 0x3e7   : > { %10965 = vpow2.f32 %v1314_v48  ;;  %v1200_v53 = vpop.xlane.xlu0 %1199  ;;  %v1267_v11 = vsub.f32 %v11279_v9, %v1179_v40 }
 0x3e8   : > { %10967 = vpow2.f32 %v1300_v7  ;;  %v1274_v8 = vsub.f32 %v11273_v6, %v1200_v53 }
 0x3e9   : > { %v1302_v46 = vmul.f32 1.442695, %v1267_v11 }
 0x3ea   : > { %v1316_v30 = vmul.f32 1.442695, %v1274_v8  ;;  %v1203_v60 = vpop.xlane.xlu1 %1202 }
 0x3eb   : > { %10969 = vpow2.f32 %v1302_v46  ;;  %v1182_v55 = vpop.xlane.xlu0 %1181  ;;  %v1275_v12 = vsub.f32 %v11281_v10, %v1203_v60 }
 0x3ec   : > { %10971 = vpow2.f32 %v1316_v30  ;;  %v1268_v5 = vsub.f32 %v11291_v15, %v1182_v55 }
 0x3ed   : > { %v11660_v59 = vpop.eup %10959  ;;  %v1318_v49 = vmul.f32 1.442695, %v1275_v12 }
 0x3ee   : > { %v1304_v44 = vmul.f32 1.442695, %v1268_v5  ;;  %v1360_v9 = vsel %vm1167_vm2, %v11660_v59, 0.0  ;;  %v1185_v48 = vpop.xlane.xlu1 %1184 }
 0x3ef   : > { %10973 = vpow2.f32 %v1318_v49  ;;  %1361 = vadd.xlane.f32.xlu0 %v1360_v9  ;;  %v1206_v6 = vpop.xlane.xlu0 %1205  ;;  %v1269_v1 = vsub.f32 %v11299_v19, %v1185_v48 }
 0x3f0   : > { %v11665_v57 = vpop.eup %10961  ;;  %10975 = vpow2.f32 %v1304_v44  ;;  %v1276_v10 = vsub.f32 %v11293_v16, %v1206_v6 }
 0x3f1   : > { %v11668_v3 = vpop.eup %10963  ;;  %v1306_v15 = vmul.f32 1.442695, %v1269_v1  ;;  %v1363_v63 = vsel %vm1167_vm2, %v11665_v57, 0.0 }
 0x3f2   : > { %v1320_v7 = vmul.f32 1.442695, %v1276_v10  ;;  %v1384_v40 = vsel %vm1167_vm2, %v11668_v3, 0.0  ;;  %1364 = vadd.xlane.f32.xlu1 %v1363_v63  ;;  %v1209_v53 = vpop.xlane.xlu1 %1208 }
 0x3f3   : > { %10977 = vpow2.f32 %v1306_v15  ;;  %1385 = vadd.xlane.f32.xlu0 %v1384_v40  ;;  %v1188_v19 = vpop.xlane.xlu0 %1187  ;;  %v1277_v11 = vsub.f32 %v11301_v20, %v1209_v53 }
 0x3f4   : > { %v11675_v8 = vpop.eup %10965  ;;  %10979 = vpow2.f32 %v1320_v7  ;;  %v1270_v16 = vsub.f32 %v11287_v13, %v1188_v19 }
 0x3f5   : > { %v11678_v46 = vpop.eup %10967  ;;  %v1322_v30 = vmul.f32 1.442695, %v1277_v11  ;;  %v1387_v60 = vsel %vm1167_vm2, %v11675_v8, 0.0 }
 0x3f6   : > { %v1308_v55 = vmul.f32 1.442695, %v1270_v16  ;;  %v1366_v12 = vsel %vm1167_vm2, %v11678_v46, 0.0  ;;  %1388 = vadd.xlane.f32.xlu1 %v1387_v60  ;;  %v1191_v5 = vpop.xlane.xlu1 %1190 }
 0x3f7   : > { %10981 = vpow2.f32 %v1322_v30  ;;  %1367 = vadd.xlane.f32.xlu0 %v1366_v12  ;;  %v1212_v20 = vpop.xlane.xlu0 %1211  ;;  %v1271_v49 = vsub.f32 %v11295_v17, %v1191_v5 }
 0x3f8   : > { %v11685_v44 = vpop.eup %10969  ;;  %10983 = vpow2.f32 %v1308_v55  ;;  %v1278_v13 = vsub.f32 %v11289_v14, %v1212_v20 }
 0x3f9   : > { %v11688_v9 = vpop.eup %10971  ;;  %v1310_v48 = vmul.f32 1.442695, %v1271_v49  ;;  %v1369_v6 = vsel %vm1167_vm2, %v11685_v44, 0.0 }
 0x3fa   : > { %v1324_v1 = vmul.f32 1.442695, %v1278_v13  ;;  %v1390_v10 = vsel %vm1167_vm2, %v11688_v9, 0.0  ;;  %1370 = vadd.xlane.f32.xlu1 %v1369_v6  ;;  %v1215_v15 = vpop.xlane.xlu1 %1214 }
 0x3fb   : > { %10985 = vpow2.f32 %v1310_v48  ;;  %1391 = vadd.xlane.f32.xlu0 %v1390_v10  ;;  %v1218_v17 = vpop.xlane.xlu0 %1217  ;;  %v1279_v63 = vsub.f32 %v11297_v18, %v1215_v15 }
 0x3fc   : > { %v11695_v7 = vpop.eup %10973  ;;  %10987 = vpow2.f32 %v1324_v1  ;;  %v1280_v14 = vsub.f32 %v11307_v23, %v1218_v17 }
 0x3fd   : > { %v11698_v40 = vpop.eup %10975  ;;  %v1326_v53 = vmul.f32 1.442695, %v1279_v63  ;;  %v1393_v19 = vsel %vm1167_vm2, %v11695_v7, 0.0 }
 0x3fe   : > { %v1328_v11 = vmul.f32 1.442695, %v1280_v14  ;;  %v1372_v16 = vsel %vm1167_vm2, %v11698_v40, 0.0  ;;  %1394 = vadd.xlane.f32.xlu1 %v1393_v19  ;;  %v1221_v30 = vpop.xlane.xlu1 %1220 }
 0x3ff   : > { %10989 = vpow2.f32 %v1326_v53  ;;  %1373 = vadd.xlane.f32.xlu0 %v1372_v16  ;;  %v1242_v18 = vpop.xlane.xlu0 %1241  ;;  %v1281_v60 = vsub.f32 %v11315_v27, %v1221_v30 }
 0x400   : > { %v11705_v55 = vpop.eup %10977  ;;  %10991 = vpow2.f32 %v1328_v11  ;;  %v1288_v23 = vsub.f32 %v11309_v24, %v1242_v18 }
 0x401   : > { %v11708_v12 = vpop.eup %10979  ;;  %v1330_v5 = vmul.f32 1.442695, %v1281_v60  ;;  %v1375_v20 = vsel %vm1167_vm2, %v11705_v55, 0.0 }
 0x402   : > { %v1344_v49 = vmul.f32 1.442695, %v1288_v23  ;;  %v1396_v13 = vsel %vm1167_vm2, %v11708_v12, 0.0  ;;  %1376 = vadd.xlane.f32.xlu1 %v1375_v20  ;;  %v1245_v48 = vpop.xlane.xlu1 %1244 }
 0x403   : > { %10993 = vpow2.f32 %v1330_v5  ;;  %1397 = vadd.xlane.f32.xlu0 %v1396_v13  ;;  %v1224_v27 = vpop.xlane.xlu0 %1223  ;;  %v1289_v6 = vsub.f32 %v11317_v28, %v1245_v48 }
 0x404   : > { %v11715_v1 = vpop.eup %10981  ;;  %10995 = vpow2.f32 %v1344_v49  ;;  %v1282_v24 = vsub.f32 %v11303_v21, %v1224_v27 }
 0x405   : > { %v11718_v10 = vpop.eup %10983  ;;  %v1346_v15 = vmul.f32 1.442695, %v1289_v6  ;;  %v1399_v17 = vsel %vm1167_vm2, %v11715_v1, 0.0 }
 0x406   : > { %v1332_v63 = vmul.f32 1.442695, %v1282_v24  ;;  %v1378_v14 = vsel %vm1167_vm2, %v11718_v10, 0.0  ;;  %1400 = vadd.xlane.f32.xlu1 %v1399_v17  ;;  %v1227_v53 = vpop.xlane.xlu1 %1226 }
 0x407   : > { %10997 = vpow2.f32 %v1346_v15  ;;  %1379 = vadd.xlane.f32.xlu0 %v1378_v14  ;;  %v1248_v28 = vpop.xlane.xlu0 %1247  ;;  %v1283_v19 = vsub.f32 %v11311_v25, %v1227_v53 }
 0x408   : > { %v11725_v11 = vpop.eup %10985  ;;  %10999 = vpow2.f32 %v1332_v63  ;;  %v1290_v21 = vsub.f32 %v11305_v22, %v1248_v28 }
 0x409   : > { %v11728_v16 = vpop.eup %10987  ;;  %v1334_v30 = vmul.f32 1.442695, %v1283_v19  ;;  %v1381_v18 = vsel %vm1167_vm2, %v11725_v11, 0.0 }
 0x40a   : > { %v1348_v60 = vmul.f32 1.442695, %v1290_v21  ;;  %v1402_v23 = vsel %vm1167_vm2, %v11728_v16, 0.0  ;;  %1382 = vadd.xlane.f32.xlu1 %v1381_v18  ;;  %v1251_v5 = vpop.xlane.xlu1 %1250 }
 0x40b   : > { %11001 = vpow2.f32 %v1334_v30  ;;  %1403 = vadd.xlane.f32.xlu0 %v1402_v23  ;;  %v1230_v25 = vpop.xlane.xlu0 %1229  ;;  %v1291_v20 = vsub.f32 %v11313_v26, %v1251_v5 }
 0x40c   : > { %v11735_v49 = vpop.eup %10989  ;;  %11003 = vpow2.f32 %v1348_v60  ;;  %v1284_v22 = vsub.f32 %v11323_v31, %v1230_v25 }
 0x40d   : > { %v11738_v13 = vpop.eup %10991  ;;  %v1350_v48 = vmul.f32 1.442695, %v1291_v20  ;;  %v1405_v27 = vsel %vm1167_vm2, %v11735_v49, 0.0 }
 0x40e   : > { %v1336_v6 = vmul.f32 1.442695, %v1284_v22  ;;  %v1408_v24 = vsel %vm1167_vm2, %v11738_v13, 0.0  ;;  %1406 = vadd.xlane.f32.xlu1 %v1405_v27  ;;  %v1233_v15 = vpop.xlane.xlu1 %1232 }
 0x40f   : > { %11005 = vpow2.f32 %v1350_v48  ;;  %1409 = vadd.xlane.f32.xlu0 %v1408_v24  ;;  %v1254_v26 = vpop.xlane.xlu0 %1253  ;;  %v1285_v17 = vsub.f32 %v11331_v35, %v1233_v15 }
 0x410   : > { %v11745_v63 = vpop.eup %10993  ;;  %11007 = vpow2.f32 %v1336_v6  ;;  %v1292_v31 = vsub.f32 %v11325_v32, %v1254_v26 }
 0x411   : > { %v11748_v14 = vpop.eup %10995  ;;  %v1338_v53 = vmul.f32 1.442695, %v1285_v17  ;;  %v1411_v28 = vsel %vm1167_vm2, %v11745_v63, 0.0 }
 0x412   : > { %v1352_v19 = vmul.f32 1.442695, %v1292_v31  ;;  %v1432_v21 = vsel %vm1167_vm2, %v11748_v14, 0.0  ;;  %1412 = vadd.xlane.f32.xlu1 %v1411_v28  ;;  %v1257_v30 = vpop.xlane.xlu1 %1256 }
 0x413   : > { %11009 = vpow2.f32 %v1338_v53  ;;  %1433 = vadd.xlane.f32.xlu0 %v1432_v21  ;;  %v1236_v35 = vpop.xlane.xlu0 %1235  ;;  %v1293_v18 = vsub.f32 %v11333_v36, %v1257_v30 }
 0x414   : > { %v11755_v60 = vpop.eup %10997  ;;  %11011 = vpow2.f32 %v1352_v19  ;;  %v1286_v32 = vsub.f32 %v11319_v29, %v1236_v35 }
 0x415   : > { %v11758_v23 = vpop.eup %10999  ;;  %v1354_v5 = vmul.f32 1.442695, %v1293_v18  ;;  %v1435_v25 = vsel %vm1167_vm2, %v11755_v60, 0.0 }
 0x416   : > { %v1340_v20 = vmul.f32 1.442695, %v1286_v32  ;;  %v1414_v22 = vsel %vm1167_vm2, %v11758_v23, 0.0  ;;  %1436 = vadd.xlane.f32.xlu1 %v1435_v25  ;;  %v1239_v48 = vpop.xlane.xlu1 %1238 }
 0x417   : > { %11013 = vpow2.f32 %v1354_v5  ;;  %1415 = vadd.xlane.f32.xlu0 %v1414_v22  ;;  %v1260_v36 = vpop.xlane.xlu0 %1259  ;;  %v1287_v27 = vsub.f32 %v11327_v33, %v1239_v48 }
 0x418   : > { %v11765_v6 = vpop.eup %11001  ;;  %11015 = vpow2.f32 %v1340_v20  ;;  %v1294_v29 = vsub.f32 %v12580_v0, %v1260_v36 }
 0x419   : > { %v11768_v24 = vpop.eup %11003  ;;  %v1342_v15 = vmul.f32 1.442695, %v1287_v27  ;;  %v1417_v26 = vsel %vm1167_vm2, %v11765_v6, 0.0 }
 0x41a   : > { %v1356_v17 = vmul.f32 1.442695, %v1294_v29  ;;  %v1438_v31 = vsel %vm1167_vm2, %v11768_v24, 0.0  ;;  %1418 = vadd.xlane.f32.xlu1 %v1417_v26  ;;  %v1263_v53 = vpop.xlane.xlu1 %1262 }
 0x41b   : > { %11017 = vpow2.f32 %v1342_v15  ;;  %1439 = vadd.xlane.f32.xlu0 %v1438_v31  ;;  %v1295_v33 = vsub.f32 %v12581_v62, %v1263_v53 }
 0x41c   : > { %v11775_v28 = vpop.eup %11005  ;;  %11019 = vpow2.f32 %v1356_v17  ;;  %v11812_v17 = vmul.f32 15.0, %v11602_v41 }
 0x41d   : > { %v11777_v0 = vpop.eup %11007  ;;  %v1358_v19 = vmul.f32 1.442695, %v1295_v33  ;;  %v1441_v21 = vsel %vm1167_vm2, %v11775_v28, 0.0 }
 0x41e   : > { %v1420_v30 = vsel %vm1167_vm2, %v11777_v0, 0.0  ;;  %1442 = vadd.xlane.f32.xlu1 %v1441_v21 }
 0x41f   : > { %11021 = vpow2.f32 %v1358_v19  ;;  %1421 = vadd.xlane.f32.xlu0 %v1420_v30 }
 0x420   : > { %v11783_v35 = vpop.eup %11009  ;;  %11023 = vrcp.f32 %v11643_v58  ;;  %v374_v58 = vld [vmem:[%s12325_s11 + $0x20] sm:$0xff] }
 0x421   : > { %v11785_v18 = vpop.eup %11011  ;;  %v1423_v62 = vsel %vm1167_vm2, %v11783_v35, 0.0  ;;  %11025 = vrcp.f32 %v11645_v37 }
 0x422   : > { %v1444_v32 = vsel %vm1167_vm2, %v11785_v18, 0.0  ;;  %1424 = vadd.xlane.f32.xlu1 %v1423_v62 }
 0x423   : > { %1445 = vadd.xlane.f32.xlu0 %v1444_v32 }
 0x424   : > { %v11791_v5 = vpop.eup %11013 }
 0x425   : > { %v11793_v25 = vpop.eup %11015  ;;  %v1447_v20 = vsel %vm1167_vm2, %v11791_v5, 0.0 }
 0x426   : > { %v1426_v22 = vsel %vm1167_vm2, %v11793_v25, 0.0  ;;  %1448 = vadd.xlane.f32.xlu1 %v1447_v20 }
 0x427   : > { %1427 = vadd.xlane.f32.xlu0 %v1426_v22 }
 0x428   : > { %v11799_v48 = vpop.eup %11017 }
 0x429   : > { %v11801_v36 = vpop.eup %11019  ;;  %v1429_v27 = vsel %vm1167_vm2, %v11799_v48, 0.0 }
 0x42a   : > { %v1450_v29 = vsel %vm1167_vm2, %v11801_v36, 0.0  ;;  %1430 = vadd.xlane.f32.xlu1 %v1429_v27  ;;  %v11839_v27 = vmul.f32 13.0, %v11602_v41 }
 0x42b   : > { %1451 = vadd.xlane.f32.xlu0 %v1450_v29 }
 0x42c   : > { %v11807_v15 = vpop.eup %11021 }
 0x42d   : > { %v1453_v26 = vsel %vm1167_vm2, %v11807_v15, 0.0 }
 0x42e   : > { %1454 = vadd.xlane.f32.xlu1 %v1453_v26 }
 0x47f   : > { %v2199_v31 = vpop.f32.mrf.mxu0 }
 0x480   : > { %v2422_v53 = vsub.f32 %v11812_v17, %v2199_v31 }
 0x481   : > { %v10345_v33 = vpop.f32.mrf.mxu0 }
 0x482   : > { %10362 = vmatpush3.msra.mxu0 %v2422_v53 }
 0x483   : > { %v2345_v19 = vpop.f32.mrf.mxu0  ;;  %10364 = vmatmul.mubr.msk.f32.vlgmr.msra.gmra.mxu0 %vm1167_vm2, %v11607_v50  ;;  %10371 = vmatprep.subr.mxu0 %v12576_v34 }
 0x484   : > { %v2424_v21 = vsub.f32 %v11812_v17, %v2345_v19  ;;  %10373 = vmatprep.mubr.msk.f32.mxu0 %vm11104_vm1, %v12576_v34 }
 0x485   : > { %v10355_v30 = vpop.f32.mrf.mxu0 }
 0x486   : > { %10372 = vmatpush3.msra.mxu0 %v2424_v21 }
 0x487   : > { %10374 = vmatmul.mubr.msk.f32.vlgmr.msra.gmra.mxu0 %vm1167_vm2, %v11611_v38  ;;  %10381 = vmatprep.subr.mxu0 %v12576_v34 }
 0x488   : > { %10383 = vmatprep.mubr.msk.f32.mxu0 %vm11104_vm1, %v12576_v34 }
 0x489   : > { %v2272_v62 = vpop.f32.mrf.mxu1 }
 0x48a   : > { %v2423_v50 = vsub.f32 %v11812_v17, %v2272_v62 }
 0x48b   : > { %v10350_v32 = vpop.f32.mrf.mxu1 }
 0x48c   : > { %10367 = vmatpush3.msra.mxu1 %v2423_v50 }
 0x48d   : > { %v2418_v20 = vpop.f32.mrf.mxu1  ;;  %10369 = vmatmul.mubr.msk.f32.vlgmr.msra.gmra.mxu1 %vm1167_vm2, %v11625_v51  ;;  %10376 = vmatprep.subr.mxu1 %v12576_v34 }
 0x48e   : > { %v2425_v22 = vsub.f32 %v11812_v17, %v2418_v20  ;;  %10378 = vmatprep.mubr.msk.f32.mxu1 %vm11104_vm1, %v12576_v34 }
 0x48f   : > { %v10360_v38 = vpop.f32.mrf.mxu1 }
 0x490   : > { %10377 = vmatpush3.msra.mxu1 %v2425_v22 }
 0x491   : > { %10379 = vmatmul.mubr.msk.f32.vlgmr.msra.gmra.mxu1 %vm1167_vm2, %v11629_v39  ;;  %10386 = vmatprep.subr.mxu1 %v12576_v34 }
 0x492   : > { %10388 = vmatprep.mubr.msk.f32.mxu1 %vm11104_vm1, %v12576_v34 }
 0x543   : > { %v2493_v51 = vpop.f32.mrf.mxu0 }
 0x544   : > { %v2707_v29 = vsub.f32 %v11839_v27, %v2493_v51 }
 0x545   : > { %v10365_v26 = vpop.f32.mrf.mxu0 }
 0x546   : > { %10382 = vmatpush3.msra.mxu0 %v2707_v29 }
 0x547   : > { %v2633_v31 = vpop.f32.mrf.mxu0  ;;  %10384 = vmatmul.mubr.msk.f32.vlgmr.msra.gmra.mxu0 %vm1167_vm2, %v11485_v45  ;;  %10391 = vmatprep.subr.mxu0 %v12576_v34 }
 0x548   : > { %v2709_v39 = vsub.f32 %v11839_v27, %v2633_v31  ;;  %10393 = vmatprep.mubr.msk.f32.mxu0 %vm11104_vm1, %v12576_v34 }
 0x549   : > { %v10375_v53 = vpop.f32.mrf.mxu0 }
 0x54a   : > { %10392 = vmatpush3.msra.mxu0 %v2709_v39 }
 0x54b   : > { %10394 = vmatmul.mubr.msk.f32.vlgmr.msra.gmra.mxu0 %vm1167_vm2, %v11491_v47  ;;  %10401 = vmatprep.subr.mxu0 %v12576_v34 }
 0x54c   : > { %10403 = vmatprep.mubr.msk.f32.mxu0 %vm11104_vm1, %v12576_v34 }
 0x54d   : > { %v2563_v41 = vpop.f32.mrf.mxu1 }
 0x54e   : > { %v2708_v45 = vsub.f32 %v11839_v27, %v2563_v41 }
 0x54f   : > { %v10370_v33 = vpop.f32.mrf.mxu1 }
 0x550   : > { %10387 = vmatpush3.msra.mxu1 %v2708_v45 }
 0x551   : > { %v2703_v19 = vpop.f32.mrf.mxu1  ;;  %10389 = vmatmul.mubr.msk.f32.vlgmr.msra.gmra.mxu1 %vm1167_vm2, %v11501_v54  ;;  %10396 = vmatprep.subr.mxu1 %v12576_v34 }
 0x552   : > { %v2710_v21 = vsub.f32 %v11839_v27, %v2703_v19  ;;  %10398 = vmatprep.mubr.msk.f32.mxu1 %vm11104_vm1, %v12576_v34 }
 0x553   : > { %v10380_v47 = vpop.f32.mrf.mxu1 }
 0x554   : > { %10397 = vmatpush3.msra.mxu1 %v2710_v21 }
 0x555   : > { %10399 = vmatmul.mubr.msk.f32.vlgmr.msra.gmra.mxu1 %vm1167_vm2, %v11503_v56  ;;  %10406 = vmatprep.subr.mxu1 %v12576_v34 }
 0x556   : > { %10408 = vmatprep.mubr.msk.f32.mxu1 %vm11104_vm1, %v12576_v34 }
 0x607   : > { %v2780_v30 = vpop.f32.mrf.mxu0 }
 0x608   : > { %v11865_v62 = vmul.f32 0.25, %v2780_v30 }
 0x609   : > { %v10385_v54 = vpop.f32.mrf.mxu0 }
 0x60a   : > { %10402 = vmatpush3.msra.mxu0 %v11865_v62 }
 0x60b   : > { %v2926_v50 = vpop.f32.mrf.mxu0  ;;  %10404 = vmatmul.mubr.msk.f32.vlgmr.msra.gmra.mxu0 %vm1167_vm2, %v11453_v4  ;;  %10411 = vmatprep.subr.mxu0 %v12576_v34 }
 0x60c   : > { %v11871_v32 = vmul.f32 0.25, %v2926_v50  ;;  %10413 = vmatprep.mubr.msk.f32.mxu0 %vm11104_vm1, %v12576_v34 }
 0x60d   : > { %v10395_v56 = vpop.f32.mrf.mxu0 }
 0x60e   : > { %10412 = vmatpush3.msra.mxu0 %v11871_v32 }
 0x60f   : > { %10414 = vmatmul.mubr.msk.f32.vlgmr.msra.gmra.mxu0 %vm1167_vm2, %v11460_v43  ;;  %10421 = vmatprep.subr.mxu0 %v12576_v34 }
 0x610   : > { %10423 = vmatprep.mubr.msk.f32.mxu0 %vm11104_vm1, %v12576_v34 }
 0x611   : > { %v2853_v20 = vpop.f32.mrf.mxu1 }
 0x612   : > { %v11881_v22 = vmul.f32 0.25, %v2853_v20 }
 0x613   : > { %v10390_v38 = vpop.f32.mrf.mxu1 }
 0x614   : > { %10407 = vmatpush3.msra.mxu1 %v11881_v22 }
 0x615   : > { %v2999_v51 = vpop.f32.mrf.mxu1  ;;  %10409 = vmatmul.mubr.msk.f32.vlgmr.msra.gmra.mxu1 %vm1167_vm2, %v11456_v61  ;;  %10416 = vmatprep.subr.mxu1 %v12576_v34 }
 0x616   : > { %v11887_v29 = vmul.f32 0.25, %v2999_v51  ;;  %10418 = vmatprep.mubr.msk.f32.mxu1 %vm11104_vm1, %v12576_v34 }
 0x617   : > { %v10400_v26 = vpop.f32.mrf.mxu1 }
 0x618   : > { %10417 = vmatpush3.msra.mxu1 %v11887_v29 }
 0x619   : > { %10419 = vmatmul.mubr.msk.f32.vlgmr.msra.gmra.mxu1 %vm1167_vm2, %v11464_v52  ;;  %10426 = vmatprep.subr.mxu1 %v12576_v34 }
 0x61a   : > { %10428 = vmatprep.mubr.msk.f32.mxu1 %vm11104_vm1, %v12576_v34 }
 0x6cb   : > { %v3073_v31 = vpop.f32.mrf.mxu0 }
 0x6cc   : > { %v3287_v39 = vsub.f32 %v11605_v2, %v3073_v31 }
 0x6cd   : > { %v10405_v53 = vpop.f32.mrf.mxu0 }
 0x6ce   : > { %10422 = vmatpush3.msra.mxu0 %v3287_v39 }
 0x6cf   : > { %v3213_v41 = vpop.f32.mrf.mxu0  ;;  %10424 = vmatmul.mubr.msk.f32.vlgmr.msra.gmra.mxu0 %vm1167_vm2, %v3073_v31  ;;  %10431 = vmatprep.subr.mxu0 %v12576_v34 }
 0x6d0   : > { %v3289_v45 = vsub.f32 %v11605_v2, %v3213_v41  ;;  %10433 = vmatprep.mubr.msk.f32.mxu0 %vm11104_vm1, %v12576_v34 }
 0x6d1   : > { %v10415_v33 = vpop.f32.mrf.mxu0 }
 0x6d2   : > { %10432 = vmatpush3.msra.mxu0 %v3289_v45 }
 0x6d3   : > { %10434 = vmatmul.mubr.msk.f32.vlgmr.msra.gmra.mxu0 %vm1167_vm2, %v3213_v41  ;;  %10441 = vmatprep.subr.mxu0 %v12576_v34 }
 0x6d4   : > { %10443 = vmatprep.mubr.msk.f32.mxu0 %vm11104_vm1, %v12576_v34 }
 0x6d5   : > { %v3143_v19 = vpop.f32.mrf.mxu1 }
 0x6d6   : > { %v3288_v21 = vsub.f32 %v11605_v2, %v3143_v19 }
 0x6d7   : > { %v10410_v47 = vpop.f32.mrf.mxu1 }
 0x6d8   : > { %10427 = vmatpush3.msra.mxu1 %v3288_v21 }
 0x6d9   : > { %v3283_v30 = vpop.f32.mrf.mxu1  ;;  %10429 = vmatmul.mubr.msk.f32.vlgmr.msra.gmra.mxu1 %vm1167_vm2, %v3143_v19  ;;  %10436 = vmatprep.subr.mxu1 %v12576_v34 }
 0x6da   : > { %v3290_v54 = vsub.f32 %v11605_v2, %v3283_v30  ;;  %10438 = vmatprep.mubr.msk.f32.mxu1 %vm11104_vm1, %v12576_v34 }
 0x6db   : > { %v10420_v50 = vpop.f32.mrf.mxu1 }
 0x6dc   : > { %10437 = vmatpush3.msra.mxu1 %v3290_v54 }
 0x6dd   : > { %10439 = vmatmul.mubr.msk.f32.vlgmr.msra.gmra.mxu1 %vm1167_vm2, %v3283_v30  ;;  %10446 = vmatprep.subr.mxu1 %v12576_v34 }
 0x6de   : > { %10448 = vmatprep.mubr.msk.f32.mxu1 %vm11104_vm1, %v12576_v34 }
 0x78f   : > { %v3360_v56 = vpop.f32.mrf.mxu0 }
 0x790   : > { %v3583_v20 = vsub.f32 %v11812_v17, %v3360_v56 }
 0x791   : > { %v10425_v38 = vpop.f32.mrf.mxu0 }
 0x792   : > { %10442 = vmatpush3.msra.mxu0 %v3583_v20 }
 0x793   : > { %v3506_v51 = vpop.f32.mrf.mxu0  ;;  %10444 = vmatmul.mubr.msk.f32.vlgmr.msra.gmra.mxu0 %vm1167_vm2, %v3073_v31  ;;  %10451 = vmatprep.subr.mxu0 %v12576_v34 }
 0x794   : > { %v3585_v26 = vsub.f32 %v11812_v17, %v3506_v51  ;;  %10453 = vmatprep.mubr.msk.f32.mxu0 %vm11104_vm1, %v12576_v34 }
 0x795   : > { %v10435_v39 = vpop.f32.mrf.mxu0 }
 0x796   : > { %10452 = vmatpush3.msra.mxu0 %v3585_v26 }
 0x797   : > { %10454 = vmatmul.mubr.msk.f32.vlgmr.msra.gmra.mxu0 %vm1167_vm2, %v3213_v41  ;;  %10461 = vmatprep.subr.mxu0 %v12576_v34 }
 0x798   : > { %10463 = vmatprep.mubr.msk.f32.mxu0 %vm11104_vm1, %v12576_v34 }
 0x799   : > { %v3433_v53 = vpop.f32.mrf.mxu1 }
 0x79a   : > { %v3584_v45 = vsub.f32 %v11812_v17, %v3433_v53 }
 0x79b   : > { %v10430_v31 = vpop.f32.mrf.mxu1 }
 0x79c   : > { %10447 = vmatpush3.msra.mxu1 %v3584_v45 }
 0x79d   : > { %v3579_v33 = vpop.f32.mrf.mxu1  ;;  %10449 = vmatmul.mubr.msk.f32.vlgmr.msra.gmra.mxu1 %vm1167_vm2, %v3143_v19  ;;  %10456 = vmatprep.subr.mxu1 %v12576_v34 }
 0x79e   : > { %v3586_v21 = vsub.f32 %v11812_v17, %v3579_v33  ;;  %10458 = vmatprep.mubr.msk.f32.mxu1 %vm11104_vm1, %v12576_v34 }
 0x79f   : > { %v10440_v41 = vpop.f32.mrf.mxu1 }
 0x7a0   : > { %10457 = vmatpush3.msra.mxu1 %v3586_v21 }
 0x7a1   : > { %10459 = vmatmul.mubr.msk.f32.vlgmr.msra.gmra.mxu1 %vm1167_vm2, %v3283_v30  ;;  %10466 = vmatprep.subr.mxu1 %v12576_v34 }
 0x7a2   : > { %10468 = vmatprep.mubr.msk.f32.mxu1 %vm11104_vm1, %v12576_v34 }
 0x853   : > { %v3653_v47 = vpop.f32.mrf.mxu0 }
 0x854   : > { %v3867_v54 = vsub.f32 %v11839_v27, %v3653_v47 }
 0x855   : > { %v10445_v19 = vpop.f32.mrf.mxu0 }
 0x856   : > { %10462 = vmatpush3.msra.mxu0 %v3867_v54 }
 0x857   : > { %v3793_v50 = vpop.f32.mrf.mxu0  ;;  %10464 = vmatmul.mubr.msk.f32.vlgmr.msra.gmra.mxu0 %vm1167_vm2, %v11865_v62  ;;  %10471 = vmatprep.subr.mxu0 %v12576_v34 }
 0x858   : > { %v3869_v56 = vsub.f32 %v11839_v27, %v3793_v50  ;;  %10473 = vmatprep.mubr.msk.f32.mxu0 %vm11104_vm1, %v12576_v34 }
 0x859   : > { %v10455_v30 = vpop.f32.mrf.mxu0 }
 0x85a   : > { %10472 = vmatpush3.msra.mxu0 %v3869_v56 }
 0x85b   : > { %10474 = vmatmul.mubr.msk.f32.vlgmr.msra.gmra.mxu0 %vm1167_vm2, %v11871_v32  ;;  %10481 = vmatprep.subr.mxu0 %v12576_v34 }
 0x85c   : > { %10483 = vmatprep.mubr.msk.f32.mxu0 %vm11104_vm1, %v12576_v34 }
 0x85d   : > { %v3723_v20 = vpop.f32.mrf.mxu1 }
 0x85e   : > { %v3868_v62 = vsub.f32 %v11839_v27, %v3723_v20 }
 0x85f   : > { %v10450_v38 = vpop.f32.mrf.mxu1 }
 0x860   : > { %10467 = vmatpush3.msra.mxu1 %v3868_v62 }
 0x861   : > { %v3863_v51 = vpop.f32.mrf.mxu1  ;;  %10469 = vmatmul.mubr.msk.f32.vlgmr.msra.gmra.mxu1 %vm1167_vm2, %v11881_v22  ;;  %10476 = vmatprep.subr.mxu1 %v12576_v34 }
 0x862   : > { %v3870_v26 = vsub.f32 %v11839_v27, %v3863_v51  ;;  %10478 = vmatprep.mubr.msk.f32.mxu1 %vm11104_vm1, %v12576_v34 }
 0x863   : > { %v10460_v32 = vpop.f32.mrf.mxu1 }
 0x864   : > { %10477 = vmatpush3.msra.mxu1 %v3870_v26 }
 0x865   : > { %10479 = vmatmul.mubr.msk.f32.vlgmr.msra.gmra.mxu1 %vm1167_vm2, %v11887_v29  ;;  %10486 = vmatprep.subr.mxu1 %v12576_v34 }
 0x866   : > { %10488 = vmatprep.mubr.msk.f32.mxu1 %vm11104_vm1, %v12576_v34 }
 0x917   : > { %v3940_v39 = vpop.f32.mrf.mxu0 }
 0x918   : > { %v11961_v53 = vmul.f32 0.25, %v3940_v39 }
 0x919   : > { %v10465_v22 = vpop.f32.mrf.mxu0 }
 0x91a   : > { %10482 = vmatpush3.msra.mxu0 %v11961_v53 }
 0x91b   : > { %v4086_v45 = vpop.f32.mrf.mxu0  ;;  %10484 = vmatmul.mubr.msk.f32.vlgmr.msra.gmra.mxu0 %vm1167_vm2, %v11453_v4  ;;  %10491 = vmatprep.subr.mxu0 %v12576_v34 }
 0x91c   : > { %v11967_v31 = vmul.f32 0.25, %v4086_v45  ;;  %10493 = vmatprep.mubr.msk.f32.mxu0 %vm11104_vm1, %v12576_v34 }
 0x91d   : > { %v10475_v29 = vpop.f32.mrf.mxu0 }
 0x91e   : > { %10492 = vmatpush3.msra.mxu0 %v11967_v31 }
 0x91f   : > { %10494 = vmatmul.mubr.msk.f32.vlgmr.msra.gmra.mxu0 %vm1167_vm2, %v11460_v43  ;;  %10501 = vmatprep.subr.mxu0 %v12576_v34 }
 0x920   : > { %10503 = vmatprep.mubr.msk.f32.mxu0 %vm11104_vm1, %v12576_v34 }
 0x921   : > { %v4013_v33 = vpop.f32.mrf.mxu1 }
 0x922   : > { %v11977_v21 = vmul.f32 0.25, %v4013_v33 }
 0x923   : > { %v10470_v41 = vpop.f32.mrf.mxu1 }
 0x924   : > { %10487 = vmatpush3.msra.mxu1 %v11977_v21 }
 0x925   : > { %v4159_v47 = vpop.f32.mrf.mxu1  ;;  %10489 = vmatmul.mubr.msk.f32.vlgmr.msra.gmra.mxu1 %vm1167_vm2, %v11456_v61  ;;  %10496 = vmatprep.subr.mxu1 %v12576_v34 }
 0x926   : > { %v11983_v54 = vmul.f32 0.25, %v4159_v47  ;;  %10498 = vmatprep.mubr.msk.f32.mxu1 %vm11104_vm1, %v12576_v34 }
 0x927   : > { %v10480_v19 = vpop.f32.mrf.mxu1 }
 0x928   : > { %10497 = vmatpush3.msra.mxu1 %v11983_v54 }
 0x929   : > { %10499 = vmatmul.mubr.msk.f32.vlgmr.msra.gmra.mxu1 %vm1167_vm2, %v11464_v52  ;;  %10506 = vmatprep.subr.mxu1 %v12576_v34 }
 0x92a   : > { %10508 = vmatprep.mubr.msk.f32.mxu1 %vm11104_vm1, %v12576_v34 }
 0x9db   : > { %v4233_v50 = vpop.f32.mrf.mxu0 }
 0x9dc   : > { %v4447_v56 = vsub.f32 %v11605_v2, %v4233_v50 }
 0x9dd   : > { %v10485_v30 = vpop.f32.mrf.mxu0 }
 0x9de   : > { %10502 = vmatpush3.msra.mxu0 %v4447_v56 }
 0x9df   : > { %v4373_v20 = vpop.f32.mrf.mxu0  ;;  %10504 = vmatmul.mubr.msk.f32.vlgmr.msra.gmra.mxu0 %vm1167_vm2, %v4233_v50  ;;  %10511 = vmatprep.subr.mxu0 %v12576_v34 }
 0x9e0   : > { %v4449_v62 = vsub.f32 %v11605_v2, %v4373_v20  ;;  %10513 = vmatprep.mubr.msk.f32.mxu0 %vm11104_vm1, %v12576_v34 }
 0x9e1   : > { %v10495_v38 = vpop.f32.mrf.mxu0 }
 0x9e2   : > { %10512 = vmatpush3.msra.mxu0 %v4449_v62 }
 0x9e3   : > { %10514 = vmatmul.mubr.msk.f32.vlgmr.msra.gmra.mxu0 %vm1167_vm2, %v4373_v20  ;;  %10521 = vmatprep.subr.mxu0 %v12576_v34 }
 0x9e4   : > { %10523 = vmatprep.mubr.msk.f32.mxu0 %vm11104_vm1, %v12576_v34 }
 0x9e5   : > { %v4303_v51 = vpop.f32.mrf.mxu1 }
 0x9e6   : > { %v4448_v26 = vsub.f32 %v11605_v2, %v4303_v51 }
 0x9e7   : > { %v10490_v32 = vpop.f32.mrf.mxu1 }
 0x9e8   : > { %10507 = vmatpush3.msra.mxu1 %v4448_v26 }
 0x9e9   : > { %v4443_v39 = vpop.f32.mrf.mxu1  ;;  %10509 = vmatmul.mubr.msk.f32.vlgmr.msra.gmra.mxu1 %vm1167_vm2, %v4303_v51  ;;  %10516 = vmatprep.subr.mxu1 %v12576_v34 }
 0x9ea   : > { %v4450_v22 = vsub.f32 %v11605_v2, %v4443_v39  ;;  %10518 = vmatprep.mubr.msk.f32.mxu1 %vm11104_vm1, %v12576_v34 }
 0x9eb   : > { %v10500_v45 = vpop.f32.mrf.mxu1 }
 0x9ec   : > { %10517 = vmatpush3.msra.mxu1 %v4450_v22 }
 0x9ed   : > { %10519 = vmatmul.mubr.msk.f32.vlgmr.msra.gmra.mxu1 %vm1167_vm2, %v4443_v39  ;;  %10526 = vmatprep.subr.mxu1 %v12576_v34 }
 0x9ee   : > { %10528 = vmatprep.mubr.msk.f32.mxu1 %vm11104_vm1, %v12576_v34 }
 0xa9f   : > { %v4520_v29 = vpop.f32.mrf.mxu0 }
 0xaa0   : > { %v4743_v33 = vsub.f32 %v11812_v17, %v4520_v29 }
 0xaa1   : > { %v10505_v41 = vpop.f32.mrf.mxu0 }
 0xaa2   : > { %10522 = vmatpush3.msra.mxu0 %v4743_v33 }
 0xaa3   : > { %v4666_v47 = vpop.f32.mrf.mxu0  ;;  %10524 = vmatmul.mubr.msk.f32.vlgmr.msra.gmra.mxu0 %vm1167_vm2, %v4233_v50  ;;  %10531 = vmatprep.subr.mxu0 %v12576_v34 }
 0xaa4   : > { %v4745_v19 = vsub.f32 %v11812_v17, %v4666_v47  ;;  %10533 = vmatprep.mubr.msk.f32.mxu0 %vm11104_vm1, %v12576_v34 }
 0xaa5   : > { %v10515_v56 = vpop.f32.mrf.mxu0 }
 0xaa6   : > { %10532 = vmatpush3.msra.mxu0 %v4745_v19 }
 0xaa7   : > { %10534 = vmatmul.mubr.msk.f32.vlgmr.msra.gmra.mxu0 %vm1167_vm2, %v4373_v20  ;;  %10541 = vmatprep.subr.mxu0 %v12576_v34 }
 0xaa8   : > { %10543 = vmatprep.mubr.msk.f32.mxu0 %vm11104_vm1, %v12576_v34 }
 0xaa9   : > { %v4593_v30 = vpop.f32.mrf.mxu1 }
 0xaaa   : > { %v4744_v62 = vsub.f32 %v11812_v17, %v4593_v30 }
 0xaab   : > { %v10510_v50 = vpop.f32.mrf.mxu1 }
 0xaac   : > { %10527 = vmatpush3.msra.mxu1 %v4744_v62 }
 0xaad   : > { %v4739_v38 = vpop.f32.mrf.mxu1  ;;  %10529 = vmatmul.mubr.msk.f32.vlgmr.msra.gmra.mxu1 %vm1167_vm2, %v4303_v51  ;;  %10536 = vmatprep.subr.mxu1 %v12576_v34 }
 0xaae   : > { %v4746_v26 = vsub.f32 %v11812_v17, %v4739_v38  ;;  %10538 = vmatprep.mubr.msk.f32.mxu1 %vm11104_vm1, %v12576_v34 }
 0xaaf   : > { %v10520_v20 = vpop.f32.mrf.mxu1 }
 0xab0   : > { %10537 = vmatpush3.msra.mxu1 %v4746_v26 }
 0xab1   : > { %10539 = vmatmul.mubr.msk.f32.vlgmr.msra.gmra.mxu1 %vm1167_vm2, %v4443_v39  ;;  %10546 = vmatprep.subr.mxu1 %v12576_v34 }
 0xab2   : > { %10548 = vmatprep.mubr.msk.f32.mxu1 %vm11104_vm1, %v12576_v34 }
 0xb63   : > { %v4813_v32 = vpop.f32.mrf.mxu0 }
 0xb64   : > { %v5027_v22 = vsub.f32 %v11839_v27, %v4813_v32 }
 0xb65   : > { %v10525_v51 = vpop.f32.mrf.mxu0 }
 0xb66   : > { %10542 = vmatpush3.msra.mxu0 %v5027_v22 }
 0xb67   : > { %v4953_v45 = vpop.f32.mrf.mxu0  ;;  %10544 = vmatmul.mubr.msk.f32.vlgmr.msra.gmra.mxu0 %vm1167_vm2, %v11961_v53  ;;  %10551 = vmatprep.subr.mxu0 %v12576_v34 }
 0xb68   : > { %v5029_v29 = vsub.f32 %v11839_v27, %v4953_v45  ;;  %10553 = vmatprep.mubr.msk.f32.mxu0 %vm11104_vm1, %v12576_v34 }
 0xb69   : > { %v10535_v39 = vpop.f32.mrf.mxu0 }
 0xb6a   : > { %10552 = vmatpush3.msra.mxu0 %v5029_v29 }
 0xb6b   : > { %10554 = vmatmul.mubr.msk.f32.vlgmr.msra.gmra.mxu0 %vm1167_vm2, %v11967_v31  ;;  %10561 = vmatprep.subr.mxu0 %v12576_v34 }
 0xb6c   : > { %10563 = vmatprep.mubr.msk.f32.mxu0 %vm11104_vm1, %v12576_v34 }
 0xb6d   : > { %v4883_v33 = vpop.f32.mrf.mxu1 }
 0xb6e   : > { %v5028_v53 = vsub.f32 %v11839_v27, %v4883_v33 }
 0xb6f   : > { %v10530_v41 = vpop.f32.mrf.mxu1 }
 0xb70   : > { %10547 = vmatpush3.msra.mxu1 %v5028_v53 }
 0xb71   : > { %v5023_v47 = vpop.f32.mrf.mxu1  ;;  %10549 = vmatmul.mubr.msk.f32.vlgmr.msra.gmra.mxu1 %vm1167_vm2, %v11977_v21  ;;  %10556 = vmatprep.subr.mxu1 %v12576_v34 }
 0xb72   : > { %v5030_v19 = vsub.f32 %v11839_v27, %v5023_v47  ;;  %10558 = vmatprep.mubr.msk.f32.mxu1 %vm11104_vm1, %v12576_v34 }
 0xb73   : > { %v10540_v31 = vpop.f32.mrf.mxu1 }
 0xb74   : > { %10557 = vmatpush3.msra.mxu1 %v5030_v19 }
 0xb75   : > { %10559 = vmatmul.mubr.msk.f32.vlgmr.msra.gmra.mxu1 %vm1167_vm2, %v11983_v54  ;;  %10566 = vmatprep.subr.mxu1 %v12576_v34 }
 0xb76   : > { %10568 = vmatprep.mubr.msk.f32.mxu1 %vm11104_vm1, %v12576_v34 }
 0xc27   : > { %v5100_v56 = vpop.f32.mrf.mxu0 }
 0xc28   : > { %v12057_v30 = vmul.f32 0.25, %v5100_v56 }
 0xc29   : > { %v10545_v21 = vpop.f32.mrf.mxu0 }
 0xc2a   : > { %10562 = vmatpush3.msra.mxu0 %v12057_v30 }
 0xc2b   : > { %v5246_v62 = vpop.f32.mrf.mxu0  ;;  %10564 = vmatmul.mubr.msk.f32.vlgmr.msra.gmra.mxu0 %vm1167_vm2, %v11453_v4  ;;  %10571 = vmatprep.subr.mxu0 %v12576_v34 }
 0xc2c   : > { %v12063_v50 = vmul.f32 0.25, %v5246_v62  ;;  %10573 = vmatprep.mubr.msk.f32.mxu0 %vm11104_vm1, %v12576_v34 }
 0xc2d   : > { %v10555_v54 = vpop.f32.mrf.mxu0 }
 0xc2e   : > { %10572 = vmatpush3.msra.mxu0 %v12063_v50 }
 0xc2f   : > { %10574 = vmatmul.mubr.msk.f32.vlgmr.msra.gmra.mxu0 %vm1167_vm2, %v11460_v43  ;;  %10581 = vmatprep.subr.mxu0 %v12576_v34 }
 0xc30   : > { %10583 = vmatprep.mubr.msk.f32.mxu0 %vm11104_vm1, %v12576_v34 }
 0xc31   : > { %v5173_v38 = vpop.f32.mrf.mxu1 }
 0xc32   : > { %v12073_v26 = vmul.f32 0.25, %v5173_v38 }
 0xc33   : > { %v10550_v20 = vpop.f32.mrf.mxu1 }
 0xc34   : > { %10567 = vmatpush3.msra.mxu1 %v12073_v26 }
 0xc35   : > { %v5319_v32 = vpop.f32.mrf.mxu1  ;;  %10569 = vmatmul.mubr.msk.f32.vlgmr.msra.gmra.mxu1 %vm1167_vm2, %v11456_v61  ;;  %10576 = vmatprep.subr.mxu1 %v12576_v34 }
 0xc36   : > { %v12079_v22 = vmul.f32 0.25, %v5319_v32  ;;  %10578 = vmatprep.mubr.msk.f32.mxu1 %vm11104_vm1, %v12576_v34 }
 0xc37   : > { %v10560_v51 = vpop.f32.mrf.mxu1 }
 0xc38   : > { %10577 = vmatpush3.msra.mxu1 %v12079_v22 }
 0xc39   : > { %10579 = vmatmul.mubr.msk.f32.vlgmr.msra.gmra.mxu1 %vm1167_vm2, %v11464_v52  ;;  %10586 = vmatprep.subr.mxu1 %v12576_v34 }
 0xc3a   : > { %10588 = vmatprep.mubr.msk.f32.mxu1 %vm11104_vm1, %v12576_v34 }
 0xceb   : > { %v5393_v45 = vpop.f32.mrf.mxu0 }
 0xcec   : > { %v5607_v29 = vsub.f32 %v11605_v2, %v5393_v45 }
 0xced   : > { %v10565_v39 = vpop.f32.mrf.mxu0 }
 0xcee   : > { %10582 = vmatpush3.msra.mxu0 %v5607_v29 }
 0xcef   : > { %v5533_v33 = vpop.f32.mrf.mxu0  ;;  %10584 = vmatmul.mubr.msk.f32.vlgmr.msra.gmra.mxu0 %vm1167_vm2, %v5393_v45  ;;  %10591 = vmatprep.subr.mxu0 %v12576_v34 }
 0xcf0   : > { %v5609_v53 = vsub.f32 %v11605_v2, %v5533_v33  ;;  %10593 = vmatprep.mubr.msk.f32.mxu0 %vm11104_vm1, %v12576_v34 }
 0xcf1   : > { %v10575_v41 = vpop.f32.mrf.mxu0 }
 0xcf2   : > { %10592 = vmatpush3.msra.mxu0 %v5609_v53 }
 0xcf3   : > { %10594 = vmatmul.mubr.msk.f32.vlgmr.msra.gmra.mxu0 %vm1167_vm2, %v5533_v33  ;;  %10601 = vmatprep.subr.mxu0 %v12576_v34 }
 0xcf4   : > { %10603 = vmatprep.mubr.msk.f32.mxu0 %vm11104_vm1, %v12576_v34 }
 0xcf5   : > { %v5463_v47 = vpop.f32.mrf.mxu1 }
 0xcf6   : > { %v5608_v19 = vsub.f32 %v11605_v2, %v5463_v47 }
 0xcf7   : > { %v10570_v31 = vpop.f32.mrf.mxu1 }
 0xcf8   : > { %10587 = vmatpush3.msra.mxu1 %v5608_v19 }
 0xcf9   : > { %v5603_v56 = vpop.f32.mrf.mxu1  ;;  %10589 = vmatmul.mubr.msk.f32.vlgmr.msra.gmra.mxu1 %vm1167_vm2, %v5463_v47  ;;  %10596 = vmatprep.subr.mxu1 %v12576_v34 }
 0xcfa   : > { %v5610_v21 = vsub.f32 %v11605_v2, %v5603_v56  ;;  %10598 = vmatprep.mubr.msk.f32.mxu1 %vm11104_vm1, %v12576_v34 }
 0xcfb   : > { %v10580_v62 = vpop.f32.mrf.mxu1 }
 0xcfc   : > { %10597 = vmatpush3.msra.mxu1 %v5610_v21 }
 0xcfd   : > { %10599 = vmatmul.mubr.msk.f32.vlgmr.msra.gmra.mxu1 %vm1167_vm2, %v5603_v56  ;;  %10606 = vmatprep.subr.mxu1 %v12576_v34 }
 0xcfe   : > { %10608 = vmatprep.mubr.msk.f32.mxu1 %vm11104_vm1, %v12576_v34 }
 0xdaf   : > { %v5680_v54 = vpop.f32.mrf.mxu0 }
 0xdb0   : > { %v5903_v38 = vsub.f32 %v11812_v17, %v5680_v54 }
 0xdb1   : > { %v10585_v20 = vpop.f32.mrf.mxu0 }
 0xdb2   : > { %10602 = vmatpush3.msra.mxu0 %v5903_v38 }
 0xdb3   : > { %v5826_v32 = vpop.f32.mrf.mxu0  ;;  %10604 = vmatmul.mubr.msk.f32.vlgmr.msra.gmra.mxu0 %vm1167_vm2, %v5393_v45  ;;  %10611 = vmatprep.subr.mxu0 %v12576_v34 }
 0xdb4   : > { %v5905_v51 = vsub.f32 %v11812_v17, %v5826_v32  ;;  %10613 = vmatprep.mubr.msk.f32.mxu0 %vm11104_vm1, %v12576_v34 }
 0xdb5   : > { %v10595_v29 = vpop.f32.mrf.mxu0 }
 0xdb6   : > { %10612 = vmatpush3.msra.mxu0 %v5905_v51 }
 0xdb7   : > { %10614 = vmatmul.mubr.msk.f32.vlgmr.msra.gmra.mxu0 %vm1167_vm2, %v5533_v33  ;;  %10621 = vmatprep.subr.mxu0 %v12576_v34 }
 0xdb8   : > { %10623 = vmatprep.mubr.msk.f32.mxu0 %vm11104_vm1, %v12576_v34 }
 0xdb9   : > { %v5753_v39 = vpop.f32.mrf.mxu1 }
 0xdba   : > { %v5904_v53 = vsub.f32 %v11812_v17, %v5753_v39 }
 0xdbb   : > { %v10590_v45 = vpop.f32.mrf.mxu1 }
 0xdbc   : > { %10607 = vmatpush3.msra.mxu1 %v5904_v53 }
 0xdbd   : > { %v5899_v41 = vpop.f32.mrf.mxu1  ;;  %10609 = vmatmul.mubr.msk.f32.vlgmr.msra.gmra.mxu1 %vm1167_vm2, %v5463_v47  ;;  %10616 = vmatprep.subr.mxu1 %v12576_v34 }
 0xdbe   : > { %v5906_v19 = vsub.f32 %v11812_v17, %v5899_v41  ;;  %10618 = vmatprep.mubr.msk.f32.mxu1 %vm11104_vm1, %v12576_v34 }
 0xdbf   : > { %v10600_v33 = vpop.f32.mrf.mxu1 }
 0xdc0   : > { %10617 = vmatpush3.msra.mxu1 %v5906_v19 }
 0xdc1   : > { %10619 = vmatmul.mubr.msk.f32.vlgmr.msra.gmra.mxu1 %vm1167_vm2, %v5603_v56  ;;  %10626 = vmatprep.subr.mxu1 %v12576_v34 }
 0xdc2   : > { %10628 = vmatprep.mubr.msk.f32.mxu1 %vm11104_vm1, %v12576_v34 }
 0xe73   : > { %v5973_v31 = vpop.f32.mrf.mxu0 }
 0xe74   : > { %v6187_v21 = vsub.f32 %v11839_v27, %v5973_v31 }
 0xe75   : > { %v10605_v47 = vpop.f32.mrf.mxu0 }
 0xe76   : > { %10622 = vmatpush3.msra.mxu0 %v6187_v21 }
 0xe77   : > { %v6113_v62 = vpop.f32.mrf.mxu0  ;;  %10624 = vmatmul.mubr.msk.f32.vlgmr.msra.gmra.mxu0 %vm1167_vm2, %v12057_v30  ;;  %10631 = vmatprep.subr.mxu0 %v12576_v34 }
 0xe78   : > { %v6189_v54 = vsub.f32 %v11839_v27, %v6113_v62  ;;  %10633 = vmatprep.mubr.msk.f32.mxu0 %vm11104_vm1, %v12576_v34 }
 0xe79   : > { %v10615_v56 = vpop.f32.mrf.mxu0 }
 0xe7a   : > { %10632 = vmatpush3.msra.mxu0 %v6189_v54 }
 0xe7b   : > { %10634 = vmatmul.mubr.msk.f32.vlgmr.msra.gmra.mxu0 %vm1167_vm2, %v12063_v50  ;;  %10641 = vmatprep.subr.mxu0 %v12576_v34 }
 0xe7c   : > { %10643 = vmatprep.mubr.msk.f32.mxu0 %vm11104_vm1, %v12576_v34 }
 0xe7d   : > { %v6043_v38 = vpop.f32.mrf.mxu1 }
 0xe7e   : > { %v6188_v30 = vsub.f32 %v11839_v27, %v6043_v38 }
 0xe7f   : > { %v10610_v20 = vpop.f32.mrf.mxu1 }
 0xe80   : > { %10627 = vmatpush3.msra.mxu1 %v6188_v30 }
 0xe81   : > { %v6183_v32 = vpop.f32.mrf.mxu1  ;;  %10629 = vmatmul.mubr.msk.f32.vlgmr.msra.gmra.mxu1 %vm1167_vm2, %v12073_v26  ;;  %10636 = vmatprep.subr.mxu1 %v12576_v34 }
 0xe82   : > { %v6190_v51 = vsub.f32 %v11839_v27, %v6183_v32  ;;  %10638 = vmatprep.mubr.msk.f32.mxu1 %vm11104_vm1, %v12576_v34 }
 0xe83   : > { %v10620_v50 = vpop.f32.mrf.mxu1 }
 0xe84   : > { %10637 = vmatpush3.msra.mxu1 %v6190_v51 }
 0xe85   : > { %10639 = vmatmul.mubr.msk.f32.vlgmr.msra.gmra.mxu1 %vm1167_vm2, %v12079_v22  ;;  %10646 = vmatprep.subr.mxu1 %v12576_v34 }
 0xe86   : > { %10648 = vmatprep.mubr.msk.f32.mxu1 %vm11104_vm1, %v12576_v34 }
 0xf37   : > { %v6260_v29 = vpop.f32.mrf.mxu0 }
 0xf38   : > { %v12153_v39 = vmul.f32 0.25, %v6260_v29 }
 0xf39   : > { %v10625_v26 = vpop.f32.mrf.mxu0 }
 0xf3a   : > { %10642 = vmatpush3.msra.mxu0 %v12153_v39 }
 0xf3b   : > { %v6406_v53 = vpop.f32.mrf.mxu0  ;;  %10644 = vmatmul.mubr.msk.f32.vlgmr.msra.gmra.mxu0 %vm1167_vm2, %v11453_v4  ;;  %10651 = vmatprep.subr.mxu0 %v12576_v34 }
 0xf3c   : > { %v12159_v45 = vmul.f32 0.25, %v6406_v53  ;;  %10653 = vmatprep.mubr.msk.f32.mxu0 %vm11104_vm1, %v12576_v34 }
 0xf3d   : > { %v10635_v22 = vpop.f32.mrf.mxu0 }
 0xf3e   : > { %10652 = vmatpush3.msra.mxu0 %v12159_v45 }
 0xf3f   : > { %10654 = vmatmul.mubr.msk.f32.vlgmr.msra.gmra.mxu0 %vm1167_vm2, %v11460_v43  ;;  %10661 = vmatprep.subr.mxu0 %v12576_v34 }
 0xf40   : > { %10663 = vmatprep.mubr.msk.f32.mxu0 %vm11104_vm1, %v12576_v34 }
 0xf41   : > { %v6333_v41 = vpop.f32.mrf.mxu1 }
 0xf42   : > { %v12169_v19 = vmul.f32 0.25, %v6333_v41 }
 0xf43   : > { %v10630_v33 = vpop.f32.mrf.mxu1 }
 0xf44   : > { %10647 = vmatpush3.msra.mxu1 %v12169_v19 }
 0xf45   : > { %v6479_v31 = vpop.f32.mrf.mxu1  ;;  %10649 = vmatmul.mubr.msk.f32.vlgmr.msra.gmra.mxu1 %vm1167_vm2, %v11456_v61  ;;  %10656 = vmatprep.subr.mxu1 %v12576_v34 }
 0xf46   : > { %v12175_v21 = vmul.f32 0.25, %v6479_v31  ;;  %10658 = vmatprep.mubr.msk.f32.mxu1 %vm11104_vm1, %v12576_v34 }
 0xf47   : > { %v10640_v47 = vpop.f32.mrf.mxu1 }
 0xf48   : > { %10657 = vmatpush3.msra.mxu1 %v12175_v21 }
 0xf49   : > { %10659 = vmatmul.mubr.msk.f32.vlgmr.msra.gmra.mxu1 %vm1167_vm2, %v11464_v52  ;;  %10666 = vmatprep.subr.mxu1 %v12576_v34 }
 0xf4a   : > { %10668 = vmatprep.mubr.msk.f32.mxu1 %vm11104_vm1, %v12576_v34 }
 0xffb   : > { %v6553_v62 = vpop.f32.mrf.mxu0 }
 0xffc   : > { %v6767_v54 = vsub.f32 %v11605_v2, %v6553_v62 }
 0xffd   : > { %v10645_v56 = vpop.f32.mrf.mxu0 }
 0xffe   : > { %10662 = vmatpush3.msra.mxu0 %v6767_v54 }
 0xfff   : > { %v6693_v38 = vpop.f32.mrf.mxu0  ;;  %10664 = vmatmul.mubr.msk.f32.vlgmr.msra.gmra.mxu0 %vm1167_vm2, %v6553_v62  ;;  %10671 = vmatprep.subr.mxu0 %v12576_v34 }
0x1000   : > { %v6769_v30 = vsub.f32 %v11605_v2, %v6693_v38  ;;  %10673 = vmatprep.mubr.msk.f32.mxu0 %vm11104_vm1, %v12576_v34 }
0x1001   : > { %v10655_v20 = vpop.f32.mrf.mxu0 }
0x1002   : > { %10672 = vmatpush3.msra.mxu0 %v6769_v30 }
0x1003   : > { %10674 = vmatmul.mubr.msk.f32.vlgmr.msra.gmra.mxu0 %vm1167_vm2, %v6693_v38  ;;  %10681 = vmatprep.subr.mxu0 %v12576_v34 }
0x1004   : > { %10683 = vmatprep.mubr.msk.f32.mxu0 %vm11104_vm1, %v12576_v34 }
0x1005   : > { %v6623_v32 = vpop.f32.mrf.mxu1 }
0x1006   : > { %v6768_v51 = vsub.f32 %v11605_v2, %v6623_v32 }
0x1007   : > { %v10650_v50 = vpop.f32.mrf.mxu1 }
0x1008   : > { %10667 = vmatpush3.msra.mxu1 %v6768_v51 }
0x1009   : > { %v6763_v29 = vpop.f32.mrf.mxu1  ;;  %10669 = vmatmul.mubr.msk.f32.vlgmr.msra.gmra.mxu1 %vm1167_vm2, %v6623_v32  ;;  %10676 = vmatprep.subr.mxu1 %v12576_v34 }
0x100a   : > { %v6770_v26 = vsub.f32 %v11605_v2, %v6763_v29  ;;  %10678 = vmatprep.mubr.msk.f32.mxu1 %vm11104_vm1, %v12576_v34 }
0x100b   : > { %v10660_v53 = vpop.f32.mrf.mxu1 }
0x100c   : > { %10677 = vmatpush3.msra.mxu1 %v6770_v26 }
0x100d   : > { %10679 = vmatmul.mubr.msk.f32.vlgmr.msra.gmra.mxu1 %vm1167_vm2, %v6763_v29  ;;  %10686 = vmatprep.subr.mxu1 %v12576_v34 }
0x100e   : > { %10688 = vmatprep.mubr.msk.f32.mxu1 %vm11104_vm1, %v12576_v34 }
0x10bf   : > { %v6840_v22 = vpop.f32.mrf.mxu0 }
0x10c0   : > { %v7063_v41 = vsub.f32 %v11812_v17, %v6840_v22 }
0x10c1   : > { %v10665_v33 = vpop.f32.mrf.mxu0 }
0x10c2   : > { %10682 = vmatpush3.msra.mxu0 %v7063_v41 }
0x10c3   : > { %v6986_v31 = vpop.f32.mrf.mxu0  ;;  %10684 = vmatmul.mubr.msk.f32.vlgmr.msra.gmra.mxu0 %vm1167_vm2, %v6553_v62  ;;  %10691 = vmatprep.subr.mxu0 %v12576_v34 }
0x10c4   : > { %v7065_v47 = vsub.f32 %v11812_v17, %v6986_v31  ;;  %10693 = vmatprep.mubr.msk.f32.mxu0 %vm11104_vm1, %v12576_v34 }
0x10c5   : > { %v10675_v54 = vpop.f32.mrf.mxu0 }
0x10c6   : > { %10692 = vmatpush3.msra.mxu0 %v7065_v47 }
0x10c7   : > { %10694 = vmatmul.mubr.msk.f32.vlgmr.msra.gmra.mxu0 %vm1167_vm2, %v6693_v38  ;;  %10701 = vmatprep.subr.mxu0 %v12576_v34 }
0x10c8   : > { %10703 = vmatprep.mubr.msk.f32.mxu0 %vm11104_vm1, %v12576_v34 }
0x10c9   : > { %v6913_v56 = vpop.f32.mrf.mxu1 }
0x10ca   : > { %v7064_v30 = vsub.f32 %v11812_v17, %v6913_v56 }
0x10cb   : > { %v10670_v62 = vpop.f32.mrf.mxu1 }
0x10cc   : > { %10687 = vmatpush3.msra.mxu1 %v7064_v30 }
0x10cd   : > { %v7059_v20 = vpop.f32.mrf.mxu1  ;;  %10689 = vmatmul.mubr.msk.f32.vlgmr.msra.gmra.mxu1 %vm1167_vm2, %v6623_v32  ;;  %10696 = vmatprep.subr.mxu1 %v12576_v34 }
0x10ce   : > { %v7066_v51 = vsub.f32 %v11812_v17, %v7059_v20  ;;  %10698 = vmatprep.mubr.msk.f32.mxu1 %vm11104_vm1, %v12576_v34 }
0x10cf   : > { %v10680_v38 = vpop.f32.mrf.mxu1 }
0x10d0   : > { %10697 = vmatpush3.msra.mxu1 %v7066_v51 }
0x10d1   : > { %10699 = vmatmul.mubr.msk.f32.vlgmr.msra.gmra.mxu1 %vm1167_vm2, %v6763_v29  ;;  %10706 = vmatprep.subr.mxu1 %v12576_v34 }
0x10d2   : > { %10708 = vmatprep.mubr.msk.f32.mxu1 %vm11104_vm1, %v12576_v34 }
0x1183   : > { %v7133_v50 = vpop.f32.mrf.mxu0 }
0x1184   : > { %v7347_v26 = vsub.f32 %v11839_v27, %v7133_v50 }
0x1185   : > { %v10685_v32 = vpop.f32.mrf.mxu0 }
0x1186   : > { %10702 = vmatpush3.msra.mxu0 %v7347_v26 }
0x1187   : > { %v7273_v53 = vpop.f32.mrf.mxu0  ;;  %10704 = vmatmul.mubr.msk.f32.vlgmr.msra.gmra.mxu0 %vm1167_vm2, %v12153_v39  ;;  %10711 = vmatprep.subr.mxu0 %v12576_v34 }
0x1188   : > { %v7349_v22 = vsub.f32 %v11839_v27, %v7273_v53  ;;  %10713 = vmatprep.mubr.msk.f32.mxu0 %vm11104_vm1, %v12576_v34 }
0x1189   : > { %v10695_v29 = vpop.f32.mrf.mxu0 }
0x118a   : > { %10712 = vmatpush3.msra.mxu0 %v7349_v22 }
0x118b   : > { %10714 = vmatmul.mubr.msk.f32.vlgmr.msra.gmra.mxu0 %vm1167_vm2, %v12159_v45  ;;  %10721 = vmatprep.subr.mxu0 %v12576_v34 }
0x118c   : > { %10723 = vmatprep.mubr.msk.f32.mxu0 %vm11104_vm1, %v12576_v34 }
0x118d   : > { %v7203_v41 = vpop.f32.mrf.mxu1 }
0x118e   : > { %v7348_v39 = vsub.f32 %v11839_v27, %v7203_v41 }
0x118f   : > { %v10690_v33 = vpop.f32.mrf.mxu1 }
0x1190   : > { %10707 = vmatpush3.msra.mxu1 %v7348_v39 }
0x1191   : > { %v7343_v31 = vpop.f32.mrf.mxu1  ;;  %10709 = vmatmul.mubr.msk.f32.vlgmr.msra.gmra.mxu1 %vm1167_vm2, %v12169_v19  ;;  %10716 = vmatprep.subr.mxu1 %v12576_v34 }
0x1192   : > { %v7350_v47 = vsub.f32 %v11839_v27, %v7343_v31  ;;  %10718 = vmatprep.mubr.msk.f32.mxu1 %vm11104_vm1, %v12576_v34 }
0x1193   : > { %v10700_v45 = vpop.f32.mrf.mxu1 }
0x1194   : > { %10717 = vmatpush3.msra.mxu1 %v7350_v47 }
0x1195   : > { %10719 = vmatmul.mubr.msk.f32.vlgmr.msra.gmra.mxu1 %vm1167_vm2, %v12175_v21  ;;  %10726 = vmatprep.subr.mxu1 %v12576_v34 }
0x1196   : > { %10728 = vmatprep.mubr.msk.f32.mxu1 %vm11104_vm1, %v12576_v34 }
0x1247   : > { %v7420_v54 = vpop.f32.mrf.mxu0 }
0x1248   : > { %v12249_v56 = vmul.f32 0.25, %v7420_v54 }
0x1249   : > { %v10705_v19 = vpop.f32.mrf.mxu0 }
0x124a   : > { %10722 = vmatpush3.msra.mxu0 %v12249_v56 }
0x124b   : > { %v7566_v30 = vpop.f32.mrf.mxu0  ;;  %10724 = vmatmul.mubr.msk.f32.vlgmr.msra.gmra.mxu0 %vm1167_vm2, %v11453_v4  ;;  %10731 = vmatprep.subr.mxu0 %v12576_v34 }
0x124c   : > { %v12255_v62 = vmul.f32 0.25, %v7566_v30  ;;  %10733 = vmatprep.mubr.msk.f32.mxu0 %vm11104_vm1, %v12576_v34 }
0x124d   : > { %v10715_v21 = vpop.f32.mrf.mxu0 }
0x124e   : > { %10732 = vmatpush3.msra.mxu0 %v12255_v62 }
0x124f   : > { %10734 = vmatmul.mubr.msk.f32.vlgmr.msra.gmra.mxu0 %vm1167_vm2, %v11460_v43  ;;  %10741 = vmatprep.subr.mxu0 %v12576_v34 }
0x1250   : > { %10743 = vmatprep.mubr.msk.f32.mxu0 %vm11104_vm1, %v12576_v34 }
0x1251   : > { %v7493_v20 = vpop.f32.mrf.mxu1 }
0x1252   : > { %v12265_v4 = vmul.f32 0.25, %v7493_v20 }
0x1253   : > { %v10710_v51 = vpop.f32.mrf.mxu1 }
0x1254   : > { %10727 = vmatpush3.msra.mxu1 %v12265_v4 }
0x1255   : > { %v7639_v38 = vpop.f32.mrf.mxu1  ;;  %10729 = vmatmul.mubr.msk.f32.vlgmr.msra.gmra.mxu1 %vm1167_vm2, %v11456_v61  ;;  %10736 = vmatprep.subr.mxu1 %v12576_v34 }
0x1256   : > { %v12271_v50 = vmul.f32 0.25, %v7639_v38  ;;  %10738 = vmatprep.mubr.msk.f32.mxu1 %vm11104_vm1, %v12576_v34 }
0x1257   : > { %v10720_v43 = vpop.f32.mrf.mxu1 }
0x1258   : > { %10737 = vmatpush3.msra.mxu1 %v12271_v50 }
0x1259   : > { %10739 = vmatmul.mubr.msk.f32.vlgmr.msra.gmra.mxu1 %vm1167_vm2, %v11464_v52  ;;  %10746 = vmatprep.subr.mxu1 %v12576_v34 }
0x125a   : > { %10748 = vmatprep.mubr.msk.f32.mxu1 %vm11104_vm1, %v12576_v34 }
0x130b   : > { %v7713_v26 = vpop.f32.mrf.mxu0 }
0x130c   : > { %v7927_v61 = vsub.f32 %v11605_v2, %v7713_v26 }
0x130d   : > { %v10725_v32 = vpop.f32.mrf.mxu0 }
0x130e   : > { %10742 = vmatpush3.msra.mxu0 %v7927_v61 }
0x130f   : > { %v7853_v53 = vpop.f32.mrf.mxu0  ;;  %10744 = vmatmul.mubr.msk.f32.vlgmr.msra.gmra.mxu0 %vm1167_vm2, %v7713_v26  ;;  %10751 = vmatprep.subr.mxu0 %v12576_v34 }
0x1310   : > { %v7929_v22 = vsub.f32 %v11605_v2, %v7853_v53  ;;  %10753 = vmatprep.mubr.msk.f32.mxu0 %vm11104_vm1, %v12576_v34 }
0x1311   : > { %v10735_v52 = vpop.f32.mrf.mxu0 }
0x1312   : > { %10752 = vmatpush3.msra.mxu0 %v7929_v22  ;;  %v376_v22 = vld [vmem:[%s12325_s11 + $0x30] sm:$0xff]  ;;  %v377_v52 = vld [vmem:[%s12325_s11 + $0x38] sm:$0xff] }
0x1313   : > { %10754 = vmatmul.mubr.msk.f32.vlgmr.msra.gmra.mxu0 %vm1167_vm2, %v7853_v53  ;;  %10761 = vmatprep.subr.mxu0 %v12576_v34 }
0x1314   : > { %10763 = vmatprep.mubr.msk.f32.mxu0 %vm11104_vm1, %v12576_v34 }
0x1315   : > { %v7783_v29 = vpop.f32.mrf.mxu1 }
0x1316   : > { %v7928_v41 = vsub.f32 %v11605_v2, %v7783_v29 }
0x1317   : > { %v10730_v39 = vpop.f32.mrf.mxu1 }
0x1318   : > { %10747 = vmatpush3.msra.mxu1 %v7928_v41  ;;  %v445_v39 = vpack.c.bf16 %v377_v52, %v376_v22  ;;  %v12584_v22 = vld [vmem:[#allocation2_spill] sm:$0xff]  ;;  %v393_v52 = vld [vmem:[%s12325_s11 + $0xb8] sm:$0xff] }
0x1319   : > { %v7923_v33 = vpop.f32.mrf.mxu1  ;;  %10749 = vmatmul.mubr.msk.f32.vlgmr.msra.gmra.mxu1 %vm1167_vm2, %v7783_v29  ;;  %10756 = vmatprep.subr.mxu1 %v12576_v34  ;;  %11027 = vrcp.f32 %v12584_v22 }
0x131a   : > { %v7930_v31 = vsub.f32 %v11605_v2, %v7923_v33  ;;  %10758 = vmatprep.mubr.msk.f32.mxu1 %vm11104_vm1, %v12576_v34 }
0x131b   : > { %v10740_v47 = vpop.f32.mrf.mxu1 }
0x131c   : > { %10757 = vmatpush3.msra.mxu1 %v7930_v31  ;;  %v375_v31 = vld [vmem:[%s12325_s11 + $0x28] sm:$0xff] }
0x131d   : > { %10759 = vmatmul.mubr.msk.f32.vlgmr.msra.gmra.mxu1 %vm1167_vm2, %v7923_v33  ;;  %10766 = vmatprep.subr.mxu1 %v12576_v34 }
0x131e   : > { %10768 = vmatprep.mubr.msk.f32.mxu1 %vm11104_vm1, %v12576_v34 }
0x13cf   : > { %v8000_v45 = vpop.f32.mrf.mxu0 }
0x13d0   : > { %v8223_v54 = vsub.f32 %v11812_v17, %v8000_v45  ;;  %v372_v45 = vld [vmem:[%s12325_s11 + $0x10] sm:$0xff] }
0x13d1   : > { %v10745_v19 = vpop.f32.mrf.mxu0 }
0x13d2   : > { %10762 = vmatpush3.msra.mxu0 %v8223_v54  ;;  %v373_v54 = vld [vmem:[%s12325_s11 + $0x18] sm:$0xff] }
0x13d3   : > { %v8146_v30 = vpop.f32.mrf.mxu0  ;;  %10764 = vmatmul.mubr.msk.f32.vlgmr.msra.gmra.mxu0 %vm1167_vm2, %v7713_v26  ;;  %10771 = vmatprep.subr.mxu0 %v12576_v34 }
0x13d4   : > { %v8225_v2 = vsub.f32 %v11812_v17, %v8146_v30  ;;  %10773 = vmatprep.mubr.msk.f32.mxu0 %vm11104_vm1, %v12576_v34 }
0x13d5   : > { %v10755_v21 = vpop.f32.mrf.mxu0 }
0x13d6   : > { %10772 = vmatpush3.msra.mxu0 %v8225_v2  ;;  %v385_v2 = vld [vmem:[%s12325_s11 + $0x78] sm:$0xff]  ;;  %v443_v21 = vpack.c.bf16 %v373_v54, %v372_v45 }
0x13d7   : > { %10774 = vmatmul.mubr.msk.f32.vlgmr.msra.gmra.mxu0 %vm1167_vm2, %v7853_v53  ;;  %10781 = vmatprep.subr.mxu0 %v12576_v34 }
0x13d8   : > { %10783 = vmatprep.mubr.msk.f32.mxu0 %vm11104_vm1, %v12576_v34 }
0x13d9   : > { %v8073_v20 = vpop.f32.mrf.mxu1 }
0x13da   : > { %v8224_v51 = vsub.f32 %v11812_v17, %v8073_v20 }
0x13db   : > { %v10750_v38 = vpop.f32.mrf.mxu1 }
0x13dc   : > { %10767 = vmatpush3.msra.mxu1 %v8224_v51  ;;  %v370_v51 = vld [vmem:[%s12325_s11] sm:$0xff]  ;;  %v371_v38 = vld [vmem:[%s12325_s11 + $0x8] sm:$0xff] }
0x13dd   : > { %v8219_v43 = vpop.f32.mrf.mxu1  ;;  %10769 = vmatmul.mubr.msk.f32.vlgmr.msra.gmra.mxu1 %vm1167_vm2, %v7783_v29  ;;  %10776 = vmatprep.subr.mxu1 %v12576_v34 }
0x13de   : > { %v8226_v26 = vsub.f32 %v11812_v17, %v8219_v43  ;;  %10778 = vmatprep.mubr.msk.f32.mxu1 %vm11104_vm1, %v12576_v34  ;;  %v11024_v43 = vpop.eup %11023 }
0x13df   : > { %v10760_v61 = vpop.f32.mrf.mxu1  ;;  %v11026_v45 = vpop.eup %11025 }
0x13e0   : > { %10777 = vmatpush3.msra.mxu1 %v8226_v26 }
0x13e1   : > { %10779 = vmatmul.mubr.msk.f32.vlgmr.msra.gmra.mxu1 %vm1167_vm2, %v7923_v33  ;;  %10786 = vmatprep.subr.mxu1 %v12576_v34 }
0x13e2   : > { %10788 = vmatprep.mubr.msk.f32.mxu1 %vm11104_vm1, %v12576_v34 }
0x1493   : > { %v8293_v17 = vpop.f32.mrf.mxu0 }
0x1494   : > { %v8507_v32 = vsub.f32 %v11839_v27, %v8293_v17  ;;  %v382_v17 = vld [vmem:[%s12325_s11 + $0x60] sm:$0xff] }
0x1495   : > { %v10765_v53 = vpop.f32.mrf.mxu0 }
0x1496   : > { %10782 = vmatpush3.msra.mxu0 %v8507_v32  ;;  %v442_v32 = vpack.c.bf16 %v371_v38, %v370_v51  ;;  %v1605_v53 = vmul.f32 %v11024_v43, %v11521_v42  ;;  %v380_v42 = vld [vmem:[%s12325_s11 + $0x50] sm:$0xff]  ;;  %v401_v38 = vld [vmem:[%s12325_s11 + $0xf8] sm:$0xff] }
0x1497   : > { %v8433_v29 = vpop.f32.mrf.mxu0  ;;  %10784 = vmatmul.mubr.msk.f32.vlgmr.msra.gmra.mxu0 %vm1167_vm2, %v12249_v56  ;;  %10791 = vmatprep.subr.mxu0 %v12576_v34  ;;  %v444_v56 = vpack.c.bf16 %v375_v31, %v374_v58  ;;  %v391_v58 = vld [vmem:[%s12325_s11 + $0xa8] sm:$0xff]  ;;  %v400_v51 = vld [vmem:[%s12325_s11 + $0xf0] sm:$0xff] }
0x1498   : > { %v8509_v41 = vsub.f32 %v11839_v27, %v8433_v29  ;;  %10793 = vmatprep.mubr.msk.f32.mxu0 %vm11104_vm1, %v12576_v34 }
0x1499   : > { %v10775_v33 = vpop.f32.mrf.mxu0 }
0x149a   : > { %10792 = vmatpush3.msra.mxu0 %v8509_v41  ;;  %v381_v41 = vld [vmem:[%s12325_s11 + $0x58] sm:$0xff]  ;;  %v390_v33 = vld [vmem:[%s12325_s11 + $0xa0] sm:$0xff] }
0x149b   : > { %10794 = vmatmul.mubr.msk.f32.vlgmr.msra.gmra.mxu0 %vm1167_vm2, %v12255_v62  ;;  %10801 = vmatprep.subr.bf16.mxu0 %v12576_v34  ;;  %v384_v62 = vld [vmem:[%s12325_s11 + $0x70] sm:$0xff]  ;;  %v447_v31 = vpack.c.bf16 %v381_v41, %v380_v42  ;;  %v452_v54 = vpack.c.bf16 %v391_v58, %v390_v33  ;;  %v397_v41 = vld [vmem:[%s12325_s11 + $0xd8] sm:$0xff]  ;;  %v394_v33 = vld [vmem:[%s12325_s11 + $0xc0] sm:$0xff] }
0x149c   : > { %10802 = vmatpush3.bf16.msra.mxu0 %v445_v39  ;;  %10809 = vmatprep.mubr.msk.bf16.mxu0 %vm11104_vm1, %v12576_v34  ;;  %v449_v26 = vpack.c.bf16 %v385_v2, %v384_v62  ;;  %v8807_v39 = vpack.c.bf16 %v1605_v53, %v1605_v53  ;;  %v12585_v2 = vld [vmem:[#allocation4_spill] sm:$0xff]  ;;  %v399_v53 = vld [vmem:[%s12325_s11 + $0xe8] sm:$0xff] }
0x149d   : > { %v8363_v47 = vpop.f32.mrf.mxu1  ;;  %10803 = vmatprep.subr.bf16.mxu0 %v12576_v34  ;;  %v396_v42 = vld [vmem:[%s12325_s11 + $0xd0] sm:$0xff]  ;;  %v395_v58 = vld [vmem:[%s12325_s11 + $0xc8] sm:$0xff] }
0x149e   : > { %v8508_v19 = vsub.f32 %v11839_v27, %v8363_v47  ;;  %v379_v47 = vld [vmem:[%s12325_s11 + $0x48] sm:$0xff] }
0x149f   : > { %v10770_v30 = vpop.f32.mrf.mxu1 }
0x14a0   : > { %10787 = vmatpush3.msra.mxu1 %v8508_v19  ;;  %10804 = vmatpush3.bf16.msra.mxu0 %v444_v56  ;;  %v378_v56 = vld [vmem:[%s12325_s11 + $0x40] sm:$0xff]  ;;  %v388_v19 = vld [vmem:[%s12325_s11 + $0x90] sm:$0xff]  ;;  %v389_v30 = vld [vmem:[%s12325_s11 + $0x98] sm:$0xff] }
0x14a1   : > { %v8503_v20 = vpop.f32.mrf.mxu1  ;;  %10789 = vmatmul.mubr.msk.f32.vlgmr.msra.gmra.mxu1 %vm1167_vm2, %v12265_v4  ;;  %10796 = vmatprep.subr.mxu1 %v12576_v34  ;;  %v383_v4 = vld [vmem:[%s12325_s11 + $0x68] sm:$0xff]  ;;  %v446_v62 = vpack.c.bf16 %v379_v47, %v378_v56  ;;  %v451_v43 = vpack.c.bf16 %v389_v30, %v388_v19  ;;  %v454_v56 = vpack.c.bf16 %v395_v58, %v394_v33  ;;  %v12588_v47 = vld [vmem:[#allocation6_spill] sm:$0xff] }
0x14a2   : > { %v8510_v37 = vsub.f32 %v11839_v27, %v8503_v20  ;;  %10805 = vmatprep.subr.bf16.mxu0 %v12576_v34  ;;  %10798 = vmatprep.mubr.msk.f32.mxu1 %vm11104_vm1, %v12576_v34  ;;  %v392_v27 = vld [vmem:[%s12325_s11 + $0xb0] sm:$0xff]  ;;  %v448_v29 = vpack.c.bf16 %v383_v4, %v382_v17  ;;  %v12586_v20 = vld [vmem:[#allocation3_spill] sm:$0xff]  ;;  %v457_v17 = vpack.c.bf16 %v401_v38, %v400_v51  ;;  %v1365_v51 = vpop.xlane.xlu1 %1364 }
0x14a3   : > { %v10780_v61 = vpop.f32.mrf.mxu1  ;;  %11029 = vrcp.f32 %v12586_v20 }
0x14a4   : > { %10797 = vmatpush3.msra.mxu1 %v8510_v37  ;;  %10806 = vmatpush3.bf16.msra.mxu0 %v443_v21  ;;  %v1606_v21 = vmul.f32 %v11026_v45, %v12585_v2  ;;  %v386_v37 = vld [vmem:[%s12325_s11 + $0x80] sm:$0xff]  ;;  %v11028_v61 = vpop.eup %11027  ;;  %11031 = vrcp.f32 %v1365_v51 }
0x14a5   : > { %10799 = vmatmul.mubr.msk.f32.vlgmr.msra.gmra.mxu1 %vm1167_vm2, %v12271_v50  ;;  %10813 = vmatprep.subr.bf16.mxu1 %v12576_v34  ;;  %v453_v50 = vpack.c.bf16 %v393_v52, %v392_v27  ;;  %v12587_v27 = vld [vmem:[#allocation5_spill] sm:$0xff] }
0x14a6   : > { %10814 = vmatpush3.bf16.msra.mxu1 %v449_v26  ;;  %10807 = vmatprep.subr.bf16.mxu0 %v12576_v34  ;;  %v387_v26 = vld [vmem:[%s12325_s11 + $0x88] sm:$0xff]  ;;  %v8808_v4 = vpack.c.bf16 %v1606_v21, %v1606_v21  ;;  %v1607_v52 = vmul.f32 %v11028_v61, %v12587_v27 }
0x14a7   : > { %10815 = vmatprep.subr.bf16.mxu1 %v12576_v34  ;;  %10821 = vmatprep.mubr.msk.bf16.mxu1 %vm11104_vm1, %v12576_v34  ;;  %v450_v22 = vpack.c.bf16 %v387_v26, %v386_v37 }
0x14a8   : > { %10808 = vmatpush3.bf16.msra.mxu0 %v442_v32  ;;  %v398_v32 = vld [vmem:[%s12325_s11 + $0xe0] sm:$0xff] }
0x14a9   : > { %10825 = vmatprep.subr.bf16.mxu0 %v12576_v34 }
0x14aa   : > { %10816 = vmatpush3.bf16.msra.mxu1 %v448_v29  ;;  %v456_v29 = vpack.c.bf16 %v399_v53, %v398_v32 }
0x14ab   : > { %10810 = vmatmul.mubr.msk.bf16.vlgmr.msra.gmra.mxu0 %vm1564_vm3, %v8807_v39  ;;  %10817 = vmatprep.subr.bf16.mxu1 %v12576_v34  ;;  %v455_v39 = vpack.c.bf16 %v397_v41, %v396_v42 }
0x14ac   : > { %10826 = vmatpush3.bf16.msra.mxu0 %v453_v50  ;;  %10833 = vmatprep.mubr.msk.bf16.mxu0 %vm11104_vm1, %v12576_v34  ;;  %v8809_v50 = vpack.c.bf16 %v1607_v52, %v1607_v52 }
0x14ad   : > { %10827 = vmatprep.subr.bf16.mxu0 %v12576_v34 }
0x14ae   : > { %10818 = vmatpush3.bf16.msra.mxu1 %v447_v31 }
0x14af   : > { %10819 = vmatprep.subr.bf16.mxu1 %v12576_v34 }
0x14b0   : > { %10828 = vmatpush3.bf16.msra.mxu0 %v452_v54  ;;  %v11030_v31 = vpop.eup %11029 }
0x14b1   : > { %10829 = vmatprep.subr.bf16.mxu0 %v12576_v34  ;;  %v1608_v45 = vmul.f32 %v11030_v31, %v12588_v47  ;;  %v11032_v27 = vpop.eup %11031 }
0x14b2   : > { %10820 = vmatpush3.bf16.msra.mxu1 %v446_v62 }
0x14b3   : > { %10837 = vmatprep.subr.bf16.mxu1 %v12576_v34  ;;  %v8810_v54 = vpack.c.bf16 %v1608_v45, %v1608_v45 }
0x14b4   : > { %10830 = vmatpush3.bf16.msra.mxu0 %v451_v43  ;;  %v1362_v43 = vpop.xlane.xlu0 %1361 }
0x14b5   : > { %10822 = vmatmul.mubr.msk.bf16.vlgmr.msra.gmra.mxu1 %vm1564_vm3, %v8808_v4  ;;  %10831 = vmatprep.subr.bf16.mxu0 %v12576_v34  ;;  %11033 = vrcp.f32 %v1362_v43  ;;  %v1389_v4 = vpop.xlane.xlu1 %1388 }
0x14b6   : > { %10838 = vmatpush3.bf16.msra.mxu1 %v457_v17  ;;  %10845 = vmatprep.mubr.msk.bf16.mxu1 %vm11104_vm1, %v12576_v34  ;;  %11035 = vrcp.f32 %v1389_v4 }
0x14b7   : > { %10839 = vmatprep.subr.bf16.mxu1 %v12576_v34 }
0x14b8   : > { %10832 = vmatpush3.bf16.msra.mxu0 %v450_v22  ;;  %v1386_v53 = vpop.xlane.xlu0 %1385 }
0x14b9   : > { %10849 = vmatprep.subr.mxu0 %v12576_v34  ;;  %11037 = vrcp.f32 %v1386_v53 }
0x14ba   : > { %10840 = vmatpush3.bf16.msra.mxu1 %v456_v29 }
0x14bb   : > { %10834 = vmatmul.mubr.msk.bf16.vlgmr.msra.gmra.mxu0 %vm1564_vm3, %v8809_v50  ;;  %10841 = vmatprep.subr.bf16.mxu1 %v12576_v34  ;;  %v1489_v50 = vmul.f32 %v11032_v27, %v11665_v57 }
0x14bc   : > { %10851 = vmatprep.mubr.msk.f32.mxu0 %vm11104_vm1, %v12576_v34 }
0x14be   : > { %10842 = vmatpush3.bf16.msra.mxu1 %v455_v39 }
0x14bf   : > { %10843 = vmatprep.subr.bf16.mxu1 %v12576_v34 }
0x14c2   : > { %10844 = vmatpush3.bf16.msra.mxu1 %v454_v56  ;;  %v11034_v42 = vpop.eup %11033 }
0x14c3   : > { %10854 = vmatprep.subr.mxu1 %v12576_v34  ;;  %v1488_v33 = vmul.f32 %v11034_v42, %v11660_v59 }
0x14c5   : > { %10846 = vmatmul.mubr.msk.bf16.vlgmr.msra.gmra.mxu1 %vm1564_vm3, %v8810_v54  ;;  %v9275_v47 = vpack.c.bf16 %v1489_v50, %v1488_v33  ;;  %v11036_v54 = vpop.eup %11035 }
0x14c6   : > { %10856 = vmatprep.mubr.msk.f32.mxu1 %vm11104_vm1, %v12576_v34 }
0x1557   : > { %v8580_v19 = vpop.f32.mrf.mxu0 }
0x1558   : > { %v8803_v26 = vmul.f32 0.25, %v8580_v19 }
0x1559   : > { %v10785_v30 = vpop.f32.mrf.mxu0 }
0x155a   : > { %v11038_v30 = vpop.eup %11037 }
0x155b   : > { %v8726_v62 = vpop.f32.mrf.mxu0 }
0x155c   : > { %v8805_v58 = vmul.f32 0.25, %v8726_v62 }
0x155d   : > { %v10795_v2 = vpop.f32.mrf.mxu0 }
0x155e   : > { %v1497_v2 = vmul.f32 %v11036_v54, %v11675_v8 }
0x1561   : > { %v8653_v21 = vpop.f32.mrf.mxu1 }
0x1562   : > { %v8804_v52 = vmul.f32 0.25, %v8653_v21 }
0x1563   : > { %v10790_v20 = vpop.f32.mrf.mxu1 }
0x1565   : > { %v8799_v38 = vpop.f32.mrf.mxu1 }
0x1566   : > { %v8806_v21 = vmul.f32 0.25, %v8799_v38 }
0x1567   : > { %v10800_v37 = vpop.f32.mrf.mxu1 }
0x1568   : > { %v1371_v37 = vpop.xlane.xlu1 %1370 }
0x1569   : > { %11039 = vrcp.f32 %v1371_v37 }
0x156b   : > { %v8848_v61 = vpop.f32.mrf.mxu0 }
0x156c   : > { %10850 = vmatpush3.msra.mxu0 %v8848_v61  ;;  %v1395_v61 = vpop.xlane.xlu1 %1394 }
0x156d   : > { %v10811_v17 = vpop.f32.mrf.mxu0  ;;  %10852 = vmatmul.mubr.msk.f32.vlgmr.msra.gmra.mxu0 %vm1167_vm2, %v8803_v26  ;;  %10859 = vmatprep.subr.mxu0 %v12576_v34  ;;  %v1368_v26 = vpop.xlane.xlu0 %1367 }
0x156e   : > { %10861 = vmatprep.mubr.msk.f32.mxu0 %vm11104_vm1, %v12576_v34 }
0x156f   : > { %v8851_v32 = vpop.f32.mrf.mxu0 }
0x1570   : > { %v1377_v4 = vpop.xlane.xlu1 %1376 }
0x1571   : > { %v10812_v22 = vpop.f32.mrf.mxu0  ;;  %v1392_v17 = vpop.xlane.xlu0 %1391  ;;  %11041 = vrcp.f32 %v1377_v4 }
0x1572   : > { %11043 = vrcp.f32 %v1368_v26 }
0x1574   : > { %v1401_v8 = vpop.xlane.xlu1 %1400 }
0x1575   : > { %v8891_v29 = vpop.f32.mrf.mxu1  ;;  %v1374_v32 = vpop.xlane.xlu0 %1373 }
0x1576   : > { %10855 = vmatpush3.msra.mxu1 %v8891_v29  ;;  %11045 = vrcp.f32 %v1374_v32 }
0x1577   : > { %v10823_v41 = vpop.f32.mrf.mxu1  ;;  %10857 = vmatmul.mubr.msk.f32.vlgmr.msra.gmra.mxu1 %vm1167_vm2, %v8804_v52  ;;  %10864 = vmatprep.subr.mxu1 %v12576_v34  ;;  %11047 = vrcp.f32 %v1395_v61 }
0x1578   : > { %10866 = vmatprep.mubr.msk.f32.mxu1 %vm11104_vm1, %v12576_v34  ;;  %v1496_v34 = vmul.f32 %v11038_v30, %v11668_v3  ;;  %v1383_v3 = vpop.xlane.xlu1 %1382  ;;  %11049 = vrcp.f32 %v1401_v8 }
0x1579   : > { %v8894_v39 = vpop.f32.mrf.mxu1  ;;  %v1398_v53 = vpop.xlane.xlu0 %1397  ;;  %11051 = vrcp.f32 %v1383_v3 }
0x157a   : > { %v9279_v62 = vpack.c.bf16 %v1497_v2, %v1496_v34 }
0x157b   : > { %v10824_v31 = vpop.f32.mrf.mxu1  ;;  %v8934_v56 = vpop.f32.mrf.mxu0 }
0x157c   : > { %10860 = vmatpush3.msra.mxu0 %v8934_v56  ;;  %v1407_v22 = vpop.xlane.xlu1 %1406 }
0x157d   : > { %v10835_v45 = vpop.f32.mrf.mxu0  ;;  %10862 = vmatmul.mubr.msk.f32.vlgmr.msra.gmra.mxu0 %vm1167_vm2, %v8805_v58  ;;  %v1380_v38 = vpop.xlane.xlu0 %1379 }
0x157e   : > { %10871 = vmatprep.mubr.msk.bf16.mxu0 %vm1167_vm2, %v9275_v47  ;;  %v11040_v47 = vpop.eup %11039 }
0x157f   : > { %v8937_v19 = vpop.f32.mrf.mxu0  ;;  %v11042_v45 = vpop.eup %11041  ;;  %v1491_v2 = vmul.f32 %v11040_v47, %v11685_v44 }
0x1580   : > { %v1413_v52 = vpop.xlane.xlu1 %1412  ;;  %v11044_v54 = vpop.eup %11043 }
0x1581   : > { %v10836_v57 = vpop.f32.mrf.mxu0  ;;  %v1404_v27 = vpop.xlane.xlu0 %1403  ;;  %11053 = vrcp.f32 %v1413_v52 }
0x1582   : > { %11055 = vrcp.f32 %v1380_v38 }
0x1583   : > { %v11046_v57 = vpop.eup %11045 }
0x1584   : > { %v1437_v42 = vpop.xlane.xlu1 %1436  ;;  %v1492_v37 = vmul.f32 %v11046_v57, %v11698_v40 }
0x1585   : > { %v8977_v59 = vpop.f32.mrf.mxu1  ;;  %v1410_v29 = vpop.xlane.xlu0 %1409 }
0x1586   : > { %10865 = vmatpush3.msra.mxu1 %v8977_v59  ;;  %11057 = vrcp.f32 %v1410_v29 }
0x1587   : > { %v10847_v20 = vpop.f32.mrf.mxu1  ;;  %10867 = vmatmul.mubr.msk.f32.vlgmr.msra.gmra.mxu1 %vm1167_vm2, %v8806_v21  ;;  %11059 = vrcp.f32 %v1392_v17 }
0x1588   : > { %10881 = vmatprep.mubr.msk.bf16.mxu1 %vm1167_vm2, %v9279_v62  ;;  %v1419_v50 = vpop.xlane.xlu1 %1418  ;;  %11061 = vrcp.f32 %v1398_v53  ;;  %v1493_v62 = vmul.f32 %v11042_v45, %v11705_v55  ;;  %v1490_v20 = vmul.f32 %v11044_v54, %v11678_v46 }
0x1589   : > { %v8980_v51 = vpop.f32.mrf.mxu1  ;;  %v1434_v41 = vpop.xlane.xlu0 %1433  ;;  %11063 = vrcp.f32 %v1407_v22 }
0x158a   : > { %11065 = vrcp.f32 %v1437_v42  ;;  %v9276_v26 = vpack.c.bf16 %v1491_v2, %v1490_v20  ;;  %v9277_v4 = vpack.c.bf16 %v1493_v62, %v1492_v37 }
0x158b   : > { %v10848_v43 = vpop.f32.mrf.mxu1  ;;  %11067 = vrcp.f32 %v1419_v50 }
0x158c   : > { %v1443_v33 = vpop.xlane.xlu1 %1442  ;;  %v11048_v43 = vpop.eup %11047 }
0x158d   : > { %v1416_v39 = vpop.xlane.xlu0 %1415  ;;  %v11050_v44 = vpop.eup %11049 }
0x158e   : > { %v11052_v61 = vpop.eup %11051 }
0x158f   : > { %v11054_v55 = vpop.eup %11053  ;;  %v1495_v53 = vmul.f32 %v11052_v61, %v11725_v11 }
0x1590   : > { %v1425_v31 = vpop.xlane.xlu1 %1424  ;;  %v11056_v46 = vpop.eup %11055  ;;  %v1505_v38 = vmul.f32 %v11054_v55, %v11745_v63 }
0x1591   : > { %v12435_v58 = vpop.xlane.xlu0 %1439  ;;  %11069 = vrcp.f32 %v1425_v31  ;;  %v1494_v29 = vmul.f32 %v11056_v46, %v11718_v10 }
0x1592   : > { %11071 = vrcp.f32 %v1416_v39  ;;  %v1501_v39 = vmul.f32 %v11050_v44, %v11715_v1 }
0x1593   : > { %v11058_v8 = vpop.eup %11057 }
0x1594   : > { %v1449_v19 = vpop.xlane.xlu1 %1448  ;;  %v11060_v3 = vpop.eup %11059  ;;  %v1504_v50 = vmul.f32 %v11058_v8, %v11738_v13 }
0x1595   : > { %v1422_v56 = vpop.xlane.xlu0 %1421  ;;  %v11062_v22 = vpop.eup %11061 }
0x1596   : > { %11073 = vrcp.f32 %v1422_v56  ;;  %v11064_v42 = vpop.eup %11063  ;;  %v9283_v10 = vpack.c.bf16 %v1505_v38, %v1504_v50  ;;  %v1500_v56 = vmul.f32 %v11062_v22, %v11708_v12 }
0x1597   : > { %11075 = vrcp.f32 %v1404_v27  ;;  %v1499_v27 = vmul.f32 %v11048_v43, %v11695_v7  ;;  %v11066_v11 = vpop.eup %11065  ;;  %v9278_v7 = vpack.c.bf16 %v1495_v53, %v1494_v29 }
0x1598   : > { %11077 = vrcp.f32 %v1434_v41  ;;  %v1431_v17 = vpop.xlane.xlu1 %1430  ;;  %v11068_v31 = vpop.eup %11067 }
0x1599   : > { %v1446_v21 = vpop.xlane.xlu0 %1445  ;;  %11079 = vrcp.f32 %v1431_v17 }
0x159a   : > { %11081 = vrcp.f32 %v1443_v33  ;;  %v1498_v33 = vmul.f32 %v11060_v3, %v11688_v9 }
0x159c   : > { %v9280_v13 = vpack.c.bf16 %v1499_v27, %v1498_v33  ;;  %v1455_v45 = vpop.xlane.xlu1 %1454 }
0x159d   : > { %v1428_v32 = vpop.xlane.xlu0 %1427 }
0x159e   : > { %11083 = vrcp.f32 %v1428_v32  ;;  %v11070_v47 = vpop.eup %11069 }
0x159f   : > { %11085 = vrcp.f32 %v1449_v19  ;;  %v11072_v1 = vpop.eup %11071  ;;  %v1507_v19 = vmul.f32 %v11068_v31, %v11765_v6  ;;  %v1509_v12 = vmul.f32 %v11070_v47, %v11783_v35  ;;  %v1503_v6 = vmul.f32 %v11064_v42, %v11735_v49 }
0x15a0   : > { %11087 = vrcp.f32 %v12435_v58  ;;  %v9281_v58 = vpack.c.bf16 %v1501_v39, %v1500_v56 }
0x15a1   : > { %11089 = vrcp.f32 %v1446_v21  ;;  %v1452_v2 = vpop.xlane.xlu0 %1451 }
0x15a2   : > { %11091 = vrcp.f32 %v1455_v45 }
0x15a3   : > { %v11074_v54 = vpop.eup %11073  ;;  %11093 = vrcp.f32 %v1452_v2 }
0x15a4   : > { %v11076_v57 = vpop.eup %11075  ;;  %v1508_v20 = vmul.f32 %v11074_v54, %v11777_v0 }
0x15a5   : > { %v11078_v21 = vpop.eup %11077  ;;  %v1502_v37 = vmul.f32 %v11076_v57, %v11728_v16 }
0x15a6   : > { %v11080_v35 = vpop.eup %11079  ;;  %v9285_v44 = vpack.c.bf16 %v1509_v12, %v1508_v20 }
0x15a7   : > { %v9282_v61 = vpack.c.bf16 %v1503_v6, %v1502_v37 }
0x162d   : > { %v9052_v30 = vpop.f32.mrf.mxu0 }
0x162e   : > { %v9291_v34 = vpack.c.bf16 %v9052_v30, %v9052_v30 }
0x162f   : > { %v10853_v59 = vpop.f32.mrf.mxu0 }
0x1630   : > { %v9309_v51 = vsel %vm9307_vm5, %v9291_v34, 0  ;;  %10913 = vmatprep.subr.msk.bf16.mxu0 %vm9307_vm5, %v9291_v34  ;;  %v1506_v59 = vmul.f32 %v11072_v1, %v11758_v23  ;;  %v1512_v23 = vmul.f32 %v11078_v21, %v11748_v14 }
0x1631   : > { %10870 = vmatpush3.bf16.msra.mxu0 %v9309_v51  ;;  %v1513_v51 = vmul.f32 %v11066_v11, %v11755_v60  ;;  %v1511_v60 = vmul.f32 %v11080_v35, %v11799_v48 }
0x1632   : > { %v9284_v43 = vpack.c.bf16 %v1507_v19, %v1506_v59 }
0x1633   : > { %v9287_v49 = vpack.c.bf16 %v1513_v51, %v1512_v23 }
0x1634   : > { %10872 = vmatmul.mubr.msk.bf16.vlgmr.msra.gmra.mxu0 %vm1167_vm2, %v9276_v26  ;;  %v11082_v26 = vpop.eup %11081 }
0x1635   : > { %10875 = vmatprep.mubr.msk.bf16.mxu0 %vm1167_vm2, %v9277_v4  ;;  %v11084_v17 = vpop.eup %11083  ;;  %v1515_v14 = vmul.f32 %v11082_v26, %v11775_v28 }
0x1636   : > { %v11086_v4 = vpop.eup %11085  ;;  %v1510_v32 = vmul.f32 %v11084_v17, %v11793_v25 }
0x1637   : > { %v9125_v40 = vpop.f32.mrf.mxu1  ;;  %v11088_v0 = vpop.eup %11087  ;;  %v1517_v53 = vmul.f32 %v11086_v4, %v11791_v5 }
0x1638   : > { %v9292_v52 = vpack.c.bf16 %v9125_v40, %v9125_v40  ;;  %v11090_v16 = vpop.eup %11089  ;;  %v1514_v3 = vmul.f32 %v11088_v0, %v11768_v24  ;;  %v9286_v48 = vpack.c.bf16 %v1511_v60, %v1510_v32 }
0x1639   : > { %v10858_v41 = vpop.f32.mrf.mxu1  ;;  %v1516_v38 = vmul.f32 %v11090_v16, %v11785_v18  ;;  %v11092_v28 = vpop.eup %11091 }
0x163a   : > { %v9389_v63 = vsel %vm9307_vm5, %v9292_v52, 0  ;;  %10914 = vmatprep.subr.msk.bf16.mxu1 %vm9307_vm5, %v9292_v52  ;;  %v9288_v22 = vpack.c.bf16 %v1515_v14, %v1514_v3  ;;  %v11094_v25 = vpop.eup %11093  ;;  %v1519_v24 = vmul.f32 %v11092_v28, %v11807_v15 }
0x163b   : > { %10880 = vmatpush3.bf16.msra.mxu1 %v9389_v63  ;;  %v9289_v27 = vpack.c.bf16 %v1517_v53, %v1516_v38  ;;  %v1518_v5 = vmul.f32 %v11094_v25, %v11801_v36 }
0x163c   : > { %10876 = vmatmul.mubr.msk.bf16.gmra.mxu0 %vm1167_vm2, %v9278_v7 }
0x163d   : > { %v9198_v9 = vpop.f32.mrf.mxu0  ;;  %10891 = vmatprep.mubr.msk.bf16.mxu0 %vm1167_vm2, %v9283_v10  ;;  %v9290_v52 = vpack.c.bf16 %v1519_v24, %v1518_v5 }
0x163e   : > { %v9293_v30 = vpack.c.bf16 %v9198_v9, %v9198_v9  ;;  %10882 = vmatmul.mubr.msk.bf16.vlgmr.msra.gmra.mxu1 %vm1167_vm2, %v9280_v13 }
0x163f   : > { %v10863_v34 = vpop.f32.mrf.mxu0  ;;  %10885 = vmatprep.mubr.msk.bf16.mxu1 %vm1167_vm2, %v9281_v58 }
0x1640   : > { %v9469_v62 = vsel %vm9307_vm5, %v9293_v30, 0  ;;  %10915 = vmatprep.subr.msk.bf16.mxu0 %vm9307_vm5, %v9293_v30 }
0x1641   : > { %10890 = vmatpush3.bf16.msra.mxu0 %v9469_v62 }
0x1644   : > { %10892 = vmatmul.mubr.msk.bf16.vlgmr.msra.gmra.mxu0 %vm1167_vm2, %v9284_v43 }
0x1645   : > { %10895 = vmatprep.mubr.msk.bf16.mxu0 %vm1167_vm2, %v9285_v44 }
0x1646   : > { %10886 = vmatmul.mubr.msk.bf16.gmra.mxu1 %vm1167_vm2, %v9282_v61 }
0x1647   : > { %v9271_v55 = vpop.f32.mrf.mxu1  ;;  %10901 = vmatprep.mubr.msk.bf16.mxu1 %vm1167_vm2, %v9287_v49 }
0x1648   : > { %v9294_v46 = vpack.c.bf16 %v9271_v55, %v9271_v55 }
0x1649   : > { %v10868_v8 = vpop.f32.mrf.mxu1 }
0x164a   : > { %v9549_v40 = vsel %vm9307_vm5, %v9294_v46, 0  ;;  %10916 = vmatprep.subr.msk.bf16.mxu1 %vm9307_vm5, %v9294_v46 }
0x164b   : > { %10900 = vmatpush3.bf16.msra.mxu1 %v9549_v40 }
0x164c   : > { %10896 = vmatmul.mubr.msk.bf16.gmra.mxu0 %vm1167_vm2, %v9286_v48 }
0x164e   : > { %10902 = vmatmul.mubr.msk.bf16.vlgmr.msra.gmra.mxu1 %vm1167_vm2, %v9288_v22 }
0x164f   : > { %10905 = vmatprep.mubr.msk.bf16.mxu1 %vm1167_vm2, %v9289_v27 }
0x1656   : > { %10906 = vmatmul.mubr.msk.bf16.gmra.mxu1 %vm1167_vm2, %v9290_v52 }
0x16f4   : > { %v10873_v18 = vpop.f32.mrf.mxu0 }
0x16f5   : > { %9618 = vst.msk [vmem:[%s12492_s14 + $0x10] sm:$0xff] %vm466_vm0, %v10873_v18 }
0x16f6   : > { %v9345_v36 = vpop.f32.mrf.mxu0 }
0x16f7   : > { %9616 = vst.msk [vmem:[%s12492_s14] sm:$0xff] %vm466_vm0, %v9345_v36 }
0x16f8   : > { %v10874_v15 = vpop.f32.mrf.mxu0 }
0x16f9   : > { %9619 = vst.msk [vmem:[%s12492_s14 + $0x18] sm:$0xff] %vm466_vm0, %v10874_v15 }
0x16fa   : > { %v9348_v29 = vpop.f32.mrf.mxu0 }
0x16fb   : > { %9617 = vst.msk [vmem:[%s12492_s14 + $0x8] sm:$0xff] %vm466_vm0, %v9348_v29 }
0x16fc   : > { %v10877_v42 = vpop.f32.mrf.mxu0 }
0x16fd   : > { %9622 = vst.msk [vmem:[%s12492_s14 + $0x30] sm:$0xff] %vm466_vm0, %v10877_v42 }
0x16fe   : > { %v9361_v41 = vpop.f32.mrf.mxu0  ;;  %v10883_v50 = vpop.f32.mrf.mxu1 }
0x16ff   : > { %9620 = vst.msk [vmem:[%s12492_s14 + $0x20] sm:$0xff] %vm466_vm0, %v9361_v41  ;;  %9626 = vst.msk [vmem:[%s12492_s14 + $0x50] sm:$0xff] %vm466_vm0, %v10883_v50 }
0x1700   : > { %v10878_v39 = vpop.f32.mrf.mxu0  ;;  %v9425_v11 = vpop.f32.mrf.mxu1 }
0x1701   : > { %9623 = vst.msk [vmem:[%s12492_s14 + $0x38] sm:$0xff] %vm466_vm0, %v10878_v39  ;;  %9624 = vst.msk [vmem:[%s12492_s14 + $0x40] sm:$0xff] %vm466_vm0, %v9425_v11 }
0x1702   : > { %v9364_v33 = vpop.f32.mrf.mxu0  ;;  %v10884_v63 = vpop.f32.mrf.mxu1 }
0x1703   : > { %9621 = vst.msk [vmem:[%s12492_s14 + $0x28] sm:$0xff] %vm466_vm0, %v9364_v33  ;;  %9627 = vst.msk [vmem:[%s12492_s14 + $0x58] sm:$0xff] %vm466_vm0, %v10884_v63 }
0x1704   : > { %v9428_v7 = vpop.f32.mrf.mxu1  ;;  %v10893_v31 = vpop.f32.mrf.mxu0 }
0x1705   : > { %9625 = vst.msk [vmem:[%s12492_s14 + $0x48] sm:$0xff] %vm466_vm0, %v9428_v7  ;;  %9634 = vst.msk [vmem:[%s12492_s14 + $0x90] sm:$0xff] %vm466_vm0, %v10893_v31 }
0x1706   : > { %v10887_v10 = vpop.f32.mrf.mxu1  ;;  %v9505_v56 = vpop.f32.mrf.mxu0 }
0x1707   : > { %9630 = vst.msk [vmem:[%s12492_s14 + $0x70] sm:$0xff] %vm466_vm0, %v10887_v10  ;;  %9632 = vst.msk [vmem:[%s12492_s14 + $0x80] sm:$0xff] %vm466_vm0, %v9505_v56 }
0x1708   : > { %v9441_v47 = vpop.f32.mrf.mxu1  ;;  %v10894_v13 = vpop.f32.mrf.mxu0 }
0x1709   : > { %9628 = vst.msk [vmem:[%s12492_s14 + $0x60] sm:$0xff] %vm466_vm0, %v9441_v47  ;;  %9635 = vst.msk [vmem:[%s12492_s14 + $0x98] sm:$0xff] %vm466_vm0, %v10894_v13 }
0x170a   : > { %v10888_v1 = vpop.f32.mrf.mxu1  ;;  %v9508_v45 = vpop.f32.mrf.mxu0 }
0x170b   : > { %9631 = vst.msk [vmem:[%s12492_s14 + $0x78] sm:$0xff] %vm466_vm0, %v10888_v1  ;;  %9633 = vst.msk [vmem:[%s12492_s14 + $0x88] sm:$0xff] %vm466_vm0, %v9508_v45 }
0x170c   : > { %v9444_v9 = vpop.f32.mrf.mxu1  ;;  %v10897_v58 = vpop.f32.mrf.mxu0 }
0x170d   : > { %9629 = vst.msk [vmem:[%s12492_s14 + $0x68] sm:$0xff] %vm466_vm0, %v9444_v9  ;;  %9638 = vst.msk [vmem:[%s12492_s14 + $0xb0] sm:$0xff] %vm466_vm0, %v10897_v58 }
0x170e   : > { %v9521_v54 = vpop.f32.mrf.mxu0  ;;  %v10903_v19 = vpop.f32.mrf.mxu1 }
0x170f   : > { %9636 = vst.msk [vmem:[%s12492_s14 + $0xa0] sm:$0xff] %vm466_vm0, %v9521_v54  ;;  %9642 = vst.msk [vmem:[%s12492_s14 + $0xd0] sm:$0xff] %vm466_vm0, %v10903_v19 }
0x1710   : > { %v10898_v30 = vpop.f32.mrf.mxu0  ;;  %v9585_v57 = vpop.f32.mrf.mxu1 }
0x1711   : > { %9639 = vst.msk [vmem:[%s12492_s14 + $0xb8] sm:$0xff] %vm466_vm0, %v10898_v30  ;;  %9640 = vst.msk [vmem:[%s12492_s14 + $0xc0] sm:$0xff] %vm466_vm0, %v9585_v57 }
0x1712   : > { %v9524_v2 = vpop.f32.mrf.mxu0  ;;  %v10904_v34 = vpop.f32.mrf.mxu1 }
0x1713   : > { %9637 = vst.msk [vmem:[%s12492_s14 + $0xa8] sm:$0xff] %vm466_vm0, %v9524_v2  ;;  %9643 = vst.msk [vmem:[%s12492_s14 + $0xd8] sm:$0xff] %vm466_vm0, %v10904_v34 }
0x1714   : > { %v9588_v12 = vpop.f32.mrf.mxu1 }
0x1715   : > { %9641 = vst.msk [vmem:[%s12492_s14 + $0xc8] sm:$0xff] %vm466_vm0, %v9588_v12 }
0x1716   : > { %v10907_v21 = vpop.f32.mrf.mxu1 }
0x1717   : > { %9646 = vst.msk [vmem:[%s12492_s14 + $0xf0] sm:$0xff] %vm466_vm0, %v10907_v21 }
0x1718   : > { %v9601_v59 = vpop.f32.mrf.mxu1 }
0x1719   : > { %9644 = vst.msk [vmem:[%s12492_s14 + $0xe0] sm:$0xff] %vm466_vm0, %v9601_v59 }
0x171a   : > { %v10908_v62 = vpop.f32.mrf.mxu1 }
0x171b   : > { %9647 = vst.msk [vmem:[%s12492_s14 + $0xf8] sm:$0xff] %vm466_vm0, %v10908_v62 }
0x171c   : > { %v9604_v6 = vpop.f32.mrf.mxu1 }
0x171d   : > { %9645 = vst.msk [vmem:[%s12492_s14 + $0xe8] sm:$0xff] %vm466_vm0, %v9604_v6 }
0x171e PF: > { %s15_s18 = sadd.s32 1, %s11101_s18  }
0x171f   : > { %p12_p4 = scmp.ge.s32.totalorder %s15_s18, 4  }
0x1721   :  { %14 = sbr.rel (!%p12_p4) target bundleno = 1 (0x1), region = 82 }

</bundles_post_ra>
